<compile_context>
chip_gen: v5e
topology: v5e:2x2
jax: 0.10.0
libtpu: 0.0.40
codegen_flags: <defaults>
</compile_context>

<pallas_src>
import functools

import jax
import jax.numpy as jnp
from jax import lax
from jax.experimental import pallas as pl
from jax.experimental.pallas import tpu as pltpu

# (in_features, out_features) of the four Linear layers.
LAYER_DIMS = ((3, 12), (12, 9), (9, 6), (6, 1))
_PACK_ROWS = 16                                      # max out_f (12) padded up
_N_COLS = sum(in_f + 1 for in_f, _ in LAYER_DIMS)    # 30 weight cols + 4 bias cols = 34
_SUBLANES = 8
_LANE = 128
_MIN_TILE = _SUBLANES * _LANE                        # 1024 examples (8 sublanes x 128 lanes)


def _round_up(n, m):
    return ((n + m - 1) // m) * m


def pack_params(params):
    """Pack all weights/biases into one (16, 34) f32 block (SMEM resident).

    Per layer l the column group (width in_f + 1) is
      [ W_l[:, 0] ... W_l[:, in_f-1]  b_l ]   stored in rows 0..out_f-1.
    """
    blocks = []
    for idx, (in_f, out_f) in enumerate(LAYER_DIMS, start=1):
        w = params[f"w{idx}"].astype(jnp.float32)             # (out_f, in_f)
        b = params[f"b{idx}"].astype(jnp.float32).reshape(out_f, 1)
        blk = jnp.concatenate([w, b], axis=1)                 # (out_f, in_f+1)
        blk = jnp.pad(blk, ((0, _PACK_ROWS - out_f), (0, 0)))
        blocks.append(blk)
    return jnp.concatenate(blocks, axis=1)                    # (16, 34)


def mlp_kernel(p_ref, x_ref, o_ref, *, sub):
    """p_ref: SMEM (16, 34) f32 packed params.
    x_ref:  VMEM (3, 8, cols) activations, batch dense on (sublane, lane).
    o_ref:  VMEM (8, cols) output.
    Iterates over (8, sub) sub-slabs to bound vreg pressure."""
    cols = x_ref.shape[-1]
    n_sub = cols // sub

    def body(s, carry):
        j0 = pl.multiple_of(s * sub, sub)
        # Per-feature (8, sub) slabs; keep them as a Python list (no in-kernel
        # reshape -> no cross-tile copies).
        a = [x_ref[f, :, pl.ds(j0, sub)] for f in range(LAYER_DIMS[0][0])]

        col = 0
        for li, (in_f, out_f) in enumerate(LAYER_DIMS):
            nxt = []
            for j in range(out_f):
                # SMEM scalar weights -> scalar*vector MACs on the VPU.
                acc = a[0] * p_ref[j, col]
                for k in range(1, in_f):
                    acc = acc + a[k] * p_ref[j, col + k]
                acc = acc + p_ref[j, col + in_f]              # bias (scalar)
                nxt.append(acc)
            col += in_f + 1

            if li < 2:
                a = [jax.nn.sigmoid(v) for v in nxt]          # EUP
            elif li == 2:
                a = [jnp.maximum(v, 0.0) for v in nxt]        # VPU
            else:
                a = nxt

        o_ref[:, pl.ds(j0, sub)] = a[0]                       # dense (8, sub) store
        return carry

    lax.fori_loop(0, n_sub, body, 0, unroll=True)


def mlp_forward(x, params, *, batch_tile=32768):
    """x: (B, 3) float32 -> (B, 1) float32.  Matches MLPModel_C_Zn.forward."""
    B = x.shape[0]
    if B == 0:
        return jnp.zeros((0, 1), jnp.float32)

    packed = pack_params(params)                              # (16, 34)

    # Choose batch padding / tile (multiples of 1024 examples).
    b_pad = _round_up(B, _MIN_TILE)
    bt = max(_MIN_TILE, _round_up(batch_tile, _MIN_TILE))
    n_tiles = pl.cdiv(b_pad, min(bt, b_pad))
    if n_tiles < 2 and b_pad >= 2 * _MIN_TILE:
        n_tiles = 2           # let v7x's two TensorCores split the batch axis
    tb = _round_up(pl.cdiv(b_pad, n_tiles), _MIN_TILE)
    b_pad = tb * n_tiles

    # Layout plumbing (outside the kernel): batch -> (sublane, lane) dense.
    # TODO(synk): if the caller can supply feature-major (3, B) input, this
    # transpose (extra HBM pass, mostly relevant on v5e) goes away.
    xt = jnp.transpose(x.astype(jnp.float32))                 # (3, B)
    xt = jnp.pad(xt, ((0, 0), (0, b_pad - B)))
    xt = xt.reshape(3, _SUBLANES, b_pad // _SUBLANES)

    cols = tb // _SUBLANES                                    # multiple of 128
    sub = 256 if cols % 256 == 0 else 128
    macs = sum(i * o for i, o in LAYER_DIMS)                  # 204 MACs / example

    out = pl.pallas_call(
        functools.partial(mlp_kernel, sub=sub),
        out_shape=jax.ShapeDtypeStruct((_SUBLANES, b_pad // _SUBLANES), jnp.float32),
        grid=(b_pad // tb,),
        in_specs=[
            # packed params: whole (16, 34) block resident in SMEM (scalar reads)
            pl.BlockSpec(memory_space=pltpu.MemorySpace.SMEM),
            # activations: tile only the lane/batch axis
            pl.BlockSpec((3, _SUBLANES, cols), lambda i: (0, 0, i)),
        ],
        out_specs=pl.BlockSpec((_SUBLANES, cols), lambda i: (0, i)),
        compiler_params=pltpu.CompilerParams(
            dimension_semantics=("parallel",)),               # v7x: 2 TCs split batch
        cost_estimate=pl.CostEstimate(
            flops=2 * macs * b_pad,
            transcendentals=2 * 21 * b_pad,                   # 21 sigmoids ~ exp+recip
            bytes_accessed=4 * (4 * b_pad + _PACK_ROWS * _N_COLS),
        ),
    )(packed, xt)

    return out.reshape(b_pad)[:B].reshape(B, 1)


def init_params(key):
    """PyTorch nn.Linear-style init: U(-1/sqrt(fan_in), 1/sqrt(fan_in)),
    weights stored PyTorch-layout (out_features, in_features)."""
    params = {}
    for idx, (fin, fout) in enumerate(LAYER_DIMS, start=1):
        key, kw, kb = jax.random.split(key, 3)
        bound = 1.0 / (fin ** 0.5)
        params[f"w{idx}"] = jax.random.uniform(
            kw, (fout, fin), jnp.float32, minval=-bound, maxval=bound)
        params[f"b{idx}"] = jax.random.uniform(
            kb, (fout,), jnp.float32, minval=-bound, maxval=bound)
    return params


def reference_forward(x, p):
    h = jax.nn.sigmoid(x @ p["w1"].T + p["b1"])
    h = jax.nn.sigmoid(h @ p["w2"].T + p["b2"])
    h = jnp.maximum(h @ p["w3"].T + p["b3"], 0.0)
    return h @ p["w4"].T + p["b4"]


if __name__ == "__main__":
    key = jax.random.PRNGKey(0)
    key, kx1, kx2 = jax.random.split(key, 3)
    params = init_params(key)

    # Small test (single tile).
    B1 = 8
    x1 = jax.random.normal(kx1, (B1, 3), jnp.float32)
    out1 = jax.block_until_ready(mlp_forward(x1, params))
    ref1 = reference_forward(x1, params)
    assert out1.shape == (B1, 1)
    assert jnp.allclose(out1, ref1, atol=1e-5, rtol=1e-5), (
        f"max abs err {jnp.max(jnp.abs(out1 - ref1))}")

    # Slightly larger test: exercises grid > 1 and the sub-slab loop.
    B2 = 2050
    x2 = jax.random.normal(kx2, (B2, 3), jnp.float32)
    out2 = jax.block_until_ready(mlp_forward(x2, params))
    ref2 = reference_forward(x2, params)
    assert out2.shape == (B2, 1)
    assert jnp.allclose(out2, ref2, atol=1e-5, rtol=1e-5), (
        f"max abs err {jnp.max(jnp.abs(out2 - ref2))}")

    print("KERNEL_OK")
</pallas_src>

<mosaic_0001>
module attributes {stable_mosaic.version = 11 : i64} {
  func.func @mlp_kernel(%arg0: i32, %arg1: memref<16x34xf32, #tpu.memory_space<smem>>, %arg2: memref<3x8x128xf32, #tpu.memory_space<vmem>>, %arg3: memref<8x128xf32, #tpu.memory_space<vmem>>) attributes {dimension_semantics = [#tpu.dimension_semantics<parallel>], iteration_bounds = array<i64: 1>, scalar_prefetch = 0 : i64, scratch_operands = 0 : i64, tpu.core_type = #tpu.core_type<tc>, window_params = [{transform_indices = @transform_0, window_bounds = array<i64: 16, 34>}, {transform_indices = @transform_1, window_bounds = array<i64: 3, 8, 128>}, {transform_indices = @transform_2, window_bounds = array<i64: 8, 128>}]} {
    %c0_i32 = arith.constant 0 : i32
    %c128_i32 = arith.constant 128 : i32
    %0 = arith.muli %c0_i32, %c128_i32 : i32
    %1 = tpu.assume_multiple %0, 128 : i32
    %c0 = arith.constant 0 : index
    %c0_0 = arith.constant 0 : index
    %2 = arith.index_cast %1 : i32 to index
    %3 = vector.load %arg2[%c0, %c0_0, %2] : memref<3x8x128xf32, #tpu.memory_space<vmem>>, vector<1x8x128xf32>
    %4 = vector.shape_cast %3 : vector<1x8x128xf32> to vector<8x128xf32>
    %c1 = arith.constant 1 : index
    %c0_1 = arith.constant 0 : index
    %5 = arith.index_cast %1 : i32 to index
    %6 = vector.load %arg2[%c1, %c0_1, %5] : memref<3x8x128xf32, #tpu.memory_space<vmem>>, vector<1x8x128xf32>
    %7 = vector.shape_cast %6 : vector<1x8x128xf32> to vector<8x128xf32>
    %c2 = arith.constant 2 : index
    %c0_2 = arith.constant 0 : index
    %8 = arith.index_cast %1 : i32 to index
    %9 = vector.load %arg2[%c2, %c0_2, %8] : memref<3x8x128xf32, #tpu.memory_space<vmem>>, vector<1x8x128xf32>
    %10 = vector.shape_cast %9 : vector<1x8x128xf32> to vector<8x128xf32>
    %c0_3 = arith.constant 0 : index
    %c0_4 = arith.constant 0 : index
    %11 = memref.load %arg1[%c0_3, %c0_4] : memref<16x34xf32, #tpu.memory_space<smem>>
    %12 = vector.broadcast %11 : f32 to vector<8x128xf32>
    %13 = arith.mulf %4, %12 : vector<8x128xf32>
    %c0_5 = arith.constant 0 : index
    %c1_6 = arith.constant 1 : index
    %14 = memref.load %arg1[%c0_5, %c1_6] : memref<16x34xf32, #tpu.memory_space<smem>>
    %15 = vector.broadcast %14 : f32 to vector<8x128xf32>
    %16 = arith.mulf %7, %15 : vector<8x128xf32>
    %17 = arith.addf %13, %16 : vector<8x128xf32>
    %c0_7 = arith.constant 0 : index
    %c2_8 = arith.constant 2 : index
    %18 = memref.load %arg1[%c0_7, %c2_8] : memref<16x34xf32, #tpu.memory_space<smem>>
    %19 = vector.broadcast %18 : f32 to vector<8x128xf32>
    %20 = arith.mulf %10, %19 : vector<8x128xf32>
    %21 = arith.addf %17, %20 : vector<8x128xf32>
    %c0_9 = arith.constant 0 : index
    %c3 = arith.constant 3 : index
    %22 = memref.load %arg1[%c0_9, %c3] : memref<16x34xf32, #tpu.memory_space<smem>>
    %23 = vector.broadcast %22 : f32 to vector<8x128xf32>
    %24 = arith.addf %21, %23 : vector<8x128xf32>
    %c1_10 = arith.constant 1 : index
    %c0_11 = arith.constant 0 : index
    %25 = memref.load %arg1[%c1_10, %c0_11] : memref<16x34xf32, #tpu.memory_space<smem>>
    %26 = vector.broadcast %25 : f32 to vector<8x128xf32>
    %27 = arith.mulf %4, %26 : vector<8x128xf32>
    %c1_12 = arith.constant 1 : index
    %c1_13 = arith.constant 1 : index
    %28 = memref.load %arg1[%c1_12, %c1_13] : memref<16x34xf32, #tpu.memory_space<smem>>
    %29 = vector.broadcast %28 : f32 to vector<8x128xf32>
    %30 = arith.mulf %7, %29 : vector<8x128xf32>
    %31 = arith.addf %27, %30 : vector<8x128xf32>
    %c1_14 = arith.constant 1 : index
    %c2_15 = arith.constant 2 : index
    %32 = memref.load %arg1[%c1_14, %c2_15] : memref<16x34xf32, #tpu.memory_space<smem>>
    %33 = vector.broadcast %32 : f32 to vector<8x128xf32>
    %34 = arith.mulf %10, %33 : vector<8x128xf32>
    %35 = arith.addf %31, %34 : vector<8x128xf32>
    %c1_16 = arith.constant 1 : index
    %c3_17 = arith.constant 3 : index
    %36 = memref.load %arg1[%c1_16, %c3_17] : memref<16x34xf32, #tpu.memory_space<smem>>
    %37 = vector.broadcast %36 : f32 to vector<8x128xf32>
    %38 = arith.addf %35, %37 : vector<8x128xf32>
    %c2_18 = arith.constant 2 : index
    %c0_19 = arith.constant 0 : index
    %39 = memref.load %arg1[%c2_18, %c0_19] : memref<16x34xf32, #tpu.memory_space<smem>>
    %40 = vector.broadcast %39 : f32 to vector<8x128xf32>
    %41 = arith.mulf %4, %40 : vector<8x128xf32>
    %c2_20 = arith.constant 2 : index
    %c1_21 = arith.constant 1 : index
    %42 = memref.load %arg1[%c2_20, %c1_21] : memref<16x34xf32, #tpu.memory_space<smem>>
    %43 = vector.broadcast %42 : f32 to vector<8x128xf32>
    %44 = arith.mulf %7, %43 : vector<8x128xf32>
    %45 = arith.addf %41, %44 : vector<8x128xf32>
    %c2_22 = arith.constant 2 : index
    %c2_23 = arith.constant 2 : index
    %46 = memref.load %arg1[%c2_22, %c2_23] : memref<16x34xf32, #tpu.memory_space<smem>>
    %47 = vector.broadcast %46 : f32 to vector<8x128xf32>
    %48 = arith.mulf %10, %47 : vector<8x128xf32>
    %49 = arith.addf %45, %48 : vector<8x128xf32>
    %c2_24 = arith.constant 2 : index
    %c3_25 = arith.constant 3 : index
    %50 = memref.load %arg1[%c2_24, %c3_25] : memref<16x34xf32, #tpu.memory_space<smem>>
    %51 = vector.broadcast %50 : f32 to vector<8x128xf32>
    %52 = arith.addf %49, %51 : vector<8x128xf32>
    %c3_26 = arith.constant 3 : index
    %c0_27 = arith.constant 0 : index
    %53 = memref.load %arg1[%c3_26, %c0_27] : memref<16x34xf32, #tpu.memory_space<smem>>
    %54 = vector.broadcast %53 : f32 to vector<8x128xf32>
    %55 = arith.mulf %4, %54 : vector<8x128xf32>
    %c3_28 = arith.constant 3 : index
    %c1_29 = arith.constant 1 : index
    %56 = memref.load %arg1[%c3_28, %c1_29] : memref<16x34xf32, #tpu.memory_space<smem>>
    %57 = vector.broadcast %56 : f32 to vector<8x128xf32>
    %58 = arith.mulf %7, %57 : vector<8x128xf32>
    %59 = arith.addf %55, %58 : vector<8x128xf32>
    %c3_30 = arith.constant 3 : index
    %c2_31 = arith.constant 2 : index
    %60 = memref.load %arg1[%c3_30, %c2_31] : memref<16x34xf32, #tpu.memory_space<smem>>
    %61 = vector.broadcast %60 : f32 to vector<8x128xf32>
    %62 = arith.mulf %10, %61 : vector<8x128xf32>
    %63 = arith.addf %59, %62 : vector<8x128xf32>
    %c3_32 = arith.constant 3 : index
    %c3_33 = arith.constant 3 : index
    %64 = memref.load %arg1[%c3_32, %c3_33] : memref<16x34xf32, #tpu.memory_space<smem>>
    %65 = vector.broadcast %64 : f32 to vector<8x128xf32>
    %66 = arith.addf %63, %65 : vector<8x128xf32>
    %c4 = arith.constant 4 : index
    %c0_34 = arith.constant 0 : index
    %67 = memref.load %arg1[%c4, %c0_34] : memref<16x34xf32, #tpu.memory_space<smem>>
    %68 = vector.broadcast %67 : f32 to vector<8x128xf32>
    %69 = arith.mulf %4, %68 : vector<8x128xf32>
    %c4_35 = arith.constant 4 : index
    %c1_36 = arith.constant 1 : index
    %70 = memref.load %arg1[%c4_35, %c1_36] : memref<16x34xf32, #tpu.memory_space<smem>>
    %71 = vector.broadcast %70 : f32 to vector<8x128xf32>
    %72 = arith.mulf %7, %71 : vector<8x128xf32>
    %73 = arith.addf %69, %72 : vector<8x128xf32>
    %c4_37 = arith.constant 4 : index
    %c2_38 = arith.constant 2 : index
    %74 = memref.load %arg1[%c4_37, %c2_38] : memref<16x34xf32, #tpu.memory_space<smem>>
    %75 = vector.broadcast %74 : f32 to vector<8x128xf32>
    %76 = arith.mulf %10, %75 : vector<8x128xf32>
    %77 = arith.addf %73, %76 : vector<8x128xf32>
    %c4_39 = arith.constant 4 : index
    %c3_40 = arith.constant 3 : index
    %78 = memref.load %arg1[%c4_39, %c3_40] : memref<16x34xf32, #tpu.memory_space<smem>>
    %79 = vector.broadcast %78 : f32 to vector<8x128xf32>
    %80 = arith.addf %77, %79 : vector<8x128xf32>
    %c5 = arith.constant 5 : index
    %c0_41 = arith.constant 0 : index
    %81 = memref.load %arg1[%c5, %c0_41] : memref<16x34xf32, #tpu.memory_space<smem>>
    %82 = vector.broadcast %81 : f32 to vector<8x128xf32>
    %83 = arith.mulf %4, %82 : vector<8x128xf32>
    %c5_42 = arith.constant 5 : index
    %c1_43 = arith.constant 1 : index
    %84 = memref.load %arg1[%c5_42, %c1_43] : memref<16x34xf32, #tpu.memory_space<smem>>
    %85 = vector.broadcast %84 : f32 to vector<8x128xf32>
    %86 = arith.mulf %7, %85 : vector<8x128xf32>
    %87 = arith.addf %83, %86 : vector<8x128xf32>
    %c5_44 = arith.constant 5 : index
    %c2_45 = arith.constant 2 : index
    %88 = memref.load %arg1[%c5_44, %c2_45] : memref<16x34xf32, #tpu.memory_space<smem>>
    %89 = vector.broadcast %88 : f32 to vector<8x128xf32>
    %90 = arith.mulf %10, %89 : vector<8x128xf32>
    %91 = arith.addf %87, %90 : vector<8x128xf32>
    %c5_46 = arith.constant 5 : index
    %c3_47 = arith.constant 3 : index
    %92 = memref.load %arg1[%c5_46, %c3_47] : memref<16x34xf32, #tpu.memory_space<smem>>
    %93 = vector.broadcast %92 : f32 to vector<8x128xf32>
    %94 = arith.addf %91, %93 : vector<8x128xf32>
    %c6 = arith.constant 6 : index
    %c0_48 = arith.constant 0 : index
    %95 = memref.load %arg1[%c6, %c0_48] : memref<16x34xf32, #tpu.memory_space<smem>>
    %96 = vector.broadcast %95 : f32 to vector<8x128xf32>
    %97 = arith.mulf %4, %96 : vector<8x128xf32>
    %c6_49 = arith.constant 6 : index
    %c1_50 = arith.constant 1 : index
    %98 = memref.load %arg1[%c6_49, %c1_50] : memref<16x34xf32, #tpu.memory_space<smem>>
    %99 = vector.broadcast %98 : f32 to vector<8x128xf32>
    %100 = arith.mulf %7, %99 : vector<8x128xf32>
    %101 = arith.addf %97, %100 : vector<8x128xf32>
    %c6_51 = arith.constant 6 : index
    %c2_52 = arith.constant 2 : index
    %102 = memref.load %arg1[%c6_51, %c2_52] : memref<16x34xf32, #tpu.memory_space<smem>>
    %103 = vector.broadcast %102 : f32 to vector<8x128xf32>
    %104 = arith.mulf %10, %103 : vector<8x128xf32>
    %105 = arith.addf %101, %104 : vector<8x128xf32>
    %c6_53 = arith.constant 6 : index
    %c3_54 = arith.constant 3 : index
    %106 = memref.load %arg1[%c6_53, %c3_54] : memref<16x34xf32, #tpu.memory_space<smem>>
    %107 = vector.broadcast %106 : f32 to vector<8x128xf32>
    %108 = arith.addf %105, %107 : vector<8x128xf32>
    %c7 = arith.constant 7 : index
    %c0_55 = arith.constant 0 : index
    %109 = memref.load %arg1[%c7, %c0_55] : memref<16x34xf32, #tpu.memory_space<smem>>
    %110 = vector.broadcast %109 : f32 to vector<8x128xf32>
    %111 = arith.mulf %4, %110 : vector<8x128xf32>
    %c7_56 = arith.constant 7 : index
    %c1_57 = arith.constant 1 : index
    %112 = memref.load %arg1[%c7_56, %c1_57] : memref<16x34xf32, #tpu.memory_space<smem>>
    %113 = vector.broadcast %112 : f32 to vector<8x128xf32>
    %114 = arith.mulf %7, %113 : vector<8x128xf32>
    %115 = arith.addf %111, %114 : vector<8x128xf32>
    %c7_58 = arith.constant 7 : index
    %c2_59 = arith.constant 2 : index
    %116 = memref.load %arg1[%c7_58, %c2_59] : memref<16x34xf32, #tpu.memory_space<smem>>
    %117 = vector.broadcast %116 : f32 to vector<8x128xf32>
    %118 = arith.mulf %10, %117 : vector<8x128xf32>
    %119 = arith.addf %115, %118 : vector<8x128xf32>
    %c7_60 = arith.constant 7 : index
    %c3_61 = arith.constant 3 : index
    %120 = memref.load %arg1[%c7_60, %c3_61] : memref<16x34xf32, #tpu.memory_space<smem>>
    %121 = vector.broadcast %120 : f32 to vector<8x128xf32>
    %122 = arith.addf %119, %121 : vector<8x128xf32>
    %c8 = arith.constant 8 : index
    %c0_62 = arith.constant 0 : index
    %123 = memref.load %arg1[%c8, %c0_62] : memref<16x34xf32, #tpu.memory_space<smem>>
    %124 = vector.broadcast %123 : f32 to vector<8x128xf32>
    %125 = arith.mulf %4, %124 : vector<8x128xf32>
    %c8_63 = arith.constant 8 : index
    %c1_64 = arith.constant 1 : index
    %126 = memref.load %arg1[%c8_63, %c1_64] : memref<16x34xf32, #tpu.memory_space<smem>>
    %127 = vector.broadcast %126 : f32 to vector<8x128xf32>
    %128 = arith.mulf %7, %127 : vector<8x128xf32>
    %129 = arith.addf %125, %128 : vector<8x128xf32>
    %c8_65 = arith.constant 8 : index
    %c2_66 = arith.constant 2 : index
    %130 = memref.load %arg1[%c8_65, %c2_66] : memref<16x34xf32, #tpu.memory_space<smem>>
    %131 = vector.broadcast %130 : f32 to vector<8x128xf32>
    %132 = arith.mulf %10, %131 : vector<8x128xf32>
    %133 = arith.addf %129, %132 : vector<8x128xf32>
    %c8_67 = arith.constant 8 : index
    %c3_68 = arith.constant 3 : index
    %134 = memref.load %arg1[%c8_67, %c3_68] : memref<16x34xf32, #tpu.memory_space<smem>>
    %135 = vector.broadcast %134 : f32 to vector<8x128xf32>
    %136 = arith.addf %133, %135 : vector<8x128xf32>
    %c9 = arith.constant 9 : index
    %c0_69 = arith.constant 0 : index
    %137 = memref.load %arg1[%c9, %c0_69] : memref<16x34xf32, #tpu.memory_space<smem>>
    %138 = vector.broadcast %137 : f32 to vector<8x128xf32>
    %139 = arith.mulf %4, %138 : vector<8x128xf32>
    %c9_70 = arith.constant 9 : index
    %c1_71 = arith.constant 1 : index
    %140 = memref.load %arg1[%c9_70, %c1_71] : memref<16x34xf32, #tpu.memory_space<smem>>
    %141 = vector.broadcast %140 : f32 to vector<8x128xf32>
    %142 = arith.mulf %7, %141 : vector<8x128xf32>
    %143 = arith.addf %139, %142 : vector<8x128xf32>
    %c9_72 = arith.constant 9 : index
    %c2_73 = arith.constant 2 : index
    %144 = memref.load %arg1[%c9_72, %c2_73] : memref<16x34xf32, #tpu.memory_space<smem>>
    %145 = vector.broadcast %144 : f32 to vector<8x128xf32>
    %146 = arith.mulf %10, %145 : vector<8x128xf32>
    %147 = arith.addf %143, %146 : vector<8x128xf32>
    %c9_74 = arith.constant 9 : index
    %c3_75 = arith.constant 3 : index
    %148 = memref.load %arg1[%c9_74, %c3_75] : memref<16x34xf32, #tpu.memory_space<smem>>
    %149 = vector.broadcast %148 : f32 to vector<8x128xf32>
    %150 = arith.addf %147, %149 : vector<8x128xf32>
    %c10 = arith.constant 10 : index
    %c0_76 = arith.constant 0 : index
    %151 = memref.load %arg1[%c10, %c0_76] : memref<16x34xf32, #tpu.memory_space<smem>>
    %152 = vector.broadcast %151 : f32 to vector<8x128xf32>
    %153 = arith.mulf %4, %152 : vector<8x128xf32>
    %c10_77 = arith.constant 10 : index
    %c1_78 = arith.constant 1 : index
    %154 = memref.load %arg1[%c10_77, %c1_78] : memref<16x34xf32, #tpu.memory_space<smem>>
    %155 = vector.broadcast %154 : f32 to vector<8x128xf32>
    %156 = arith.mulf %7, %155 : vector<8x128xf32>
    %157 = arith.addf %153, %156 : vector<8x128xf32>
    %c10_79 = arith.constant 10 : index
    %c2_80 = arith.constant 2 : index
    %158 = memref.load %arg1[%c10_79, %c2_80] : memref<16x34xf32, #tpu.memory_space<smem>>
    %159 = vector.broadcast %158 : f32 to vector<8x128xf32>
    %160 = arith.mulf %10, %159 : vector<8x128xf32>
    %161 = arith.addf %157, %160 : vector<8x128xf32>
    %c10_81 = arith.constant 10 : index
    %c3_82 = arith.constant 3 : index
    %162 = memref.load %arg1[%c10_81, %c3_82] : memref<16x34xf32, #tpu.memory_space<smem>>
    %163 = vector.broadcast %162 : f32 to vector<8x128xf32>
    %164 = arith.addf %161, %163 : vector<8x128xf32>
    %c11 = arith.constant 11 : index
    %c0_83 = arith.constant 0 : index
    %165 = memref.load %arg1[%c11, %c0_83] : memref<16x34xf32, #tpu.memory_space<smem>>
    %166 = vector.broadcast %165 : f32 to vector<8x128xf32>
    %167 = arith.mulf %4, %166 : vector<8x128xf32>
    %c11_84 = arith.constant 11 : index
    %c1_85 = arith.constant 1 : index
    %168 = memref.load %arg1[%c11_84, %c1_85] : memref<16x34xf32, #tpu.memory_space<smem>>
    %169 = vector.broadcast %168 : f32 to vector<8x128xf32>
    %170 = arith.mulf %7, %169 : vector<8x128xf32>
    %171 = arith.addf %167, %170 : vector<8x128xf32>
    %c11_86 = arith.constant 11 : index
    %c2_87 = arith.constant 2 : index
    %172 = memref.load %arg1[%c11_86, %c2_87] : memref<16x34xf32, #tpu.memory_space<smem>>
    %173 = vector.broadcast %172 : f32 to vector<8x128xf32>
    %174 = arith.mulf %10, %173 : vector<8x128xf32>
    %175 = arith.addf %171, %174 : vector<8x128xf32>
    %c11_88 = arith.constant 11 : index
    %c3_89 = arith.constant 3 : index
    %176 = memref.load %arg1[%c11_88, %c3_89] : memref<16x34xf32, #tpu.memory_space<smem>>
    %177 = vector.broadcast %176 : f32 to vector<8x128xf32>
    %178 = arith.addf %175, %177 : vector<8x128xf32>
    %179 = arith.negf %24 : vector<8x128xf32>
    %180 = math.exp %179 : vector<8x128xf32>
    %cst = arith.constant 1.000000e+00 : f32
    %181 = vector.broadcast %cst : f32 to vector<8x128xf32>
    %182 = arith.addf %181, %180 : vector<8x128xf32>
    %183 = arith.divf %181, %182 : vector<8x128xf32>
    %184 = arith.negf %38 : vector<8x128xf32>
    %185 = math.exp %184 : vector<8x128xf32>
    %cst_90 = arith.constant 1.000000e+00 : f32
    %186 = vector.broadcast %cst_90 : f32 to vector<8x128xf32>
    %187 = arith.addf %186, %185 : vector<8x128xf32>
    %188 = arith.divf %186, %187 : vector<8x128xf32>
    %189 = arith.negf %52 : vector<8x128xf32>
    %190 = math.exp %189 : vector<8x128xf32>
    %cst_91 = arith.constant 1.000000e+00 : f32
    %191 = vector.broadcast %cst_91 : f32 to vector<8x128xf32>
    %192 = arith.addf %191, %190 : vector<8x128xf32>
    %193 = arith.divf %191, %192 : vector<8x128xf32>
    %194 = arith.negf %66 : vector<8x128xf32>
    %195 = math.exp %194 : vector<8x128xf32>
    %cst_92 = arith.constant 1.000000e+00 : f32
    %196 = vector.broadcast %cst_92 : f32 to vector<8x128xf32>
    %197 = arith.addf %196, %195 : vector<8x128xf32>
    %198 = arith.divf %196, %197 : vector<8x128xf32>
    %199 = arith.negf %80 : vector<8x128xf32>
    %200 = math.exp %199 : vector<8x128xf32>
    %cst_93 = arith.constant 1.000000e+00 : f32
    %201 = vector.broadcast %cst_93 : f32 to vector<8x128xf32>
    %202 = arith.addf %201, %200 : vector<8x128xf32>
    %203 = arith.divf %201, %202 : vector<8x128xf32>
    %204 = arith.negf %94 : vector<8x128xf32>
    %205 = math.exp %204 : vector<8x128xf32>
    %cst_94 = arith.constant 1.000000e+00 : f32
    %206 = vector.broadcast %cst_94 : f32 to vector<8x128xf32>
    %207 = arith.addf %206, %205 : vector<8x128xf32>
    %208 = arith.divf %206, %207 : vector<8x128xf32>
    %209 = arith.negf %108 : vector<8x128xf32>
    %210 = math.exp %209 : vector<8x128xf32>
    %cst_95 = arith.constant 1.000000e+00 : f32
    %211 = vector.broadcast %cst_95 : f32 to vector<8x128xf32>
    %212 = arith.addf %211, %210 : vector<8x128xf32>
    %213 = arith.divf %211, %212 : vector<8x128xf32>
    %214 = arith.negf %122 : vector<8x128xf32>
    %215 = math.exp %214 : vector<8x128xf32>
    %cst_96 = arith.constant 1.000000e+00 : f32
    %216 = vector.broadcast %cst_96 : f32 to vector<8x128xf32>
    %217 = arith.addf %216, %215 : vector<8x128xf32>
    %218 = arith.divf %216, %217 : vector<8x128xf32>
    %219 = arith.negf %136 : vector<8x128xf32>
    %220 = math.exp %219 : vector<8x128xf32>
    %cst_97 = arith.constant 1.000000e+00 : f32
    %221 = vector.broadcast %cst_97 : f32 to vector<8x128xf32>
    %222 = arith.addf %221, %220 : vector<8x128xf32>
    %223 = arith.divf %221, %222 : vector<8x128xf32>
    %224 = arith.negf %150 : vector<8x128xf32>
    %225 = math.exp %224 : vector<8x128xf32>
    %cst_98 = arith.constant 1.000000e+00 : f32
    %226 = vector.broadcast %cst_98 : f32 to vector<8x128xf32>
    %227 = arith.addf %226, %225 : vector<8x128xf32>
    %228 = arith.divf %226, %227 : vector<8x128xf32>
    %229 = arith.negf %164 : vector<8x128xf32>
    %230 = math.exp %229 : vector<8x128xf32>
    %cst_99 = arith.constant 1.000000e+00 : f32
    %231 = vector.broadcast %cst_99 : f32 to vector<8x128xf32>
    %232 = arith.addf %231, %230 : vector<8x128xf32>
    %233 = arith.divf %231, %232 : vector<8x128xf32>
    %234 = arith.negf %178 : vector<8x128xf32>
    %235 = math.exp %234 : vector<8x128xf32>
    %cst_100 = arith.constant 1.000000e+00 : f32
    %236 = vector.broadcast %cst_100 : f32 to vector<8x128xf32>
    %237 = arith.addf %236, %235 : vector<8x128xf32>
    %238 = arith.divf %236, %237 : vector<8x128xf32>
    %c0_101 = arith.constant 0 : index
    %c4_102 = arith.constant 4 : index
    %239 = memref.load %arg1[%c0_101, %c4_102] : memref<16x34xf32, #tpu.memory_space<smem>>
    %240 = vector.broadcast %239 : f32 to vector<8x128xf32>
    %241 = arith.mulf %183, %240 : vector<8x128xf32>
    %c0_103 = arith.constant 0 : index
    %c5_104 = arith.constant 5 : index
    %242 = memref.load %arg1[%c0_103, %c5_104] : memref<16x34xf32, #tpu.memory_space<smem>>
    %243 = vector.broadcast %242 : f32 to vector<8x128xf32>
    %244 = arith.mulf %188, %243 : vector<8x128xf32>
    %245 = arith.addf %241, %244 : vector<8x128xf32>
    %c0_105 = arith.constant 0 : index
    %c6_106 = arith.constant 6 : index
    %246 = memref.load %arg1[%c0_105, %c6_106] : memref<16x34xf32, #tpu.memory_space<smem>>
    %247 = vector.broadcast %246 : f32 to vector<8x128xf32>
    %248 = arith.mulf %193, %247 : vector<8x128xf32>
    %249 = arith.addf %245, %248 : vector<8x128xf32>
    %c0_107 = arith.constant 0 : index
    %c7_108 = arith.constant 7 : index
    %250 = memref.load %arg1[%c0_107, %c7_108] : memref<16x34xf32, #tpu.memory_space<smem>>
    %251 = vector.broadcast %250 : f32 to vector<8x128xf32>
    %252 = arith.mulf %198, %251 : vector<8x128xf32>
    %253 = arith.addf %249, %252 : vector<8x128xf32>
    %c0_109 = arith.constant 0 : index
    %c8_110 = arith.constant 8 : index
    %254 = memref.load %arg1[%c0_109, %c8_110] : memref<16x34xf32, #tpu.memory_space<smem>>
    %255 = vector.broadcast %254 : f32 to vector<8x128xf32>
    %256 = arith.mulf %203, %255 : vector<8x128xf32>
    %257 = arith.addf %253, %256 : vector<8x128xf32>
    %c0_111 = arith.constant 0 : index
    %c9_112 = arith.constant 9 : index
    %258 = memref.load %arg1[%c0_111, %c9_112] : memref<16x34xf32, #tpu.memory_space<smem>>
    %259 = vector.broadcast %258 : f32 to vector<8x128xf32>
    %260 = arith.mulf %208, %259 : vector<8x128xf32>
    %261 = arith.addf %257, %260 : vector<8x128xf32>
    %c0_113 = arith.constant 0 : index
    %c10_114 = arith.constant 10 : index
    %262 = memref.load %arg1[%c0_113, %c10_114] : memref<16x34xf32, #tpu.memory_space<smem>>
    %263 = vector.broadcast %262 : f32 to vector<8x128xf32>
    %264 = arith.mulf %213, %263 : vector<8x128xf32>
    %265 = arith.addf %261, %264 : vector<8x128xf32>
    %c0_115 = arith.constant 0 : index
    %c11_116 = arith.constant 11 : index
    %266 = memref.load %arg1[%c0_115, %c11_116] : memref<16x34xf32, #tpu.memory_space<smem>>
    %267 = vector.broadcast %266 : f32 to vector<8x128xf32>
    %268 = arith.mulf %218, %267 : vector<8x128xf32>
    %269 = arith.addf %265, %268 : vector<8x128xf32>
    %c0_117 = arith.constant 0 : index
    %c12 = arith.constant 12 : index
    %270 = memref.load %arg1[%c0_117, %c12] : memref<16x34xf32, #tpu.memory_space<smem>>
    %271 = vector.broadcast %270 : f32 to vector<8x128xf32>
    %272 = arith.mulf %223, %271 : vector<8x128xf32>
    %273 = arith.addf %269, %272 : vector<8x128xf32>
    %c0_118 = arith.constant 0 : index
    %c13 = arith.constant 13 : index
    %274 = memref.load %arg1[%c0_118, %c13] : memref<16x34xf32, #tpu.memory_space<smem>>
    %275 = vector.broadcast %274 : f32 to vector<8x128xf32>
    %276 = arith.mulf %228, %275 : vector<8x128xf32>
    %277 = arith.addf %273, %276 : vector<8x128xf32>
    %c0_119 = arith.constant 0 : index
    %c14 = arith.constant 14 : index
    %278 = memref.load %arg1[%c0_119, %c14] : memref<16x34xf32, #tpu.memory_space<smem>>
    %279 = vector.broadcast %278 : f32 to vector<8x128xf32>
    %280 = arith.mulf %233, %279 : vector<8x128xf32>
    %281 = arith.addf %277, %280 : vector<8x128xf32>
    %c0_120 = arith.constant 0 : index
    %c15 = arith.constant 15 : index
    %282 = memref.load %arg1[%c0_120, %c15] : memref<16x34xf32, #tpu.memory_space<smem>>
    %283 = vector.broadcast %282 : f32 to vector<8x128xf32>
    %284 = arith.mulf %238, %283 : vector<8x128xf32>
    %285 = arith.addf %281, %284 : vector<8x128xf32>
    %c0_121 = arith.constant 0 : index
    %c16 = arith.constant 16 : index
    %286 = memref.load %arg1[%c0_121, %c16] : memref<16x34xf32, #tpu.memory_space<smem>>
    %287 = vector.broadcast %286 : f32 to vector<8x128xf32>
    %288 = arith.addf %285, %287 : vector<8x128xf32>
    %c1_122 = arith.constant 1 : index
    %c4_123 = arith.constant 4 : index
    %289 = memref.load %arg1[%c1_122, %c4_123] : memref<16x34xf32, #tpu.memory_space<smem>>
    %290 = vector.broadcast %289 : f32 to vector<8x128xf32>
    %291 = arith.mulf %183, %290 : vector<8x128xf32>
    %c1_124 = arith.constant 1 : index
    %c5_125 = arith.constant 5 : index
    %292 = memref.load %arg1[%c1_124, %c5_125] : memref<16x34xf32, #tpu.memory_space<smem>>
    %293 = vector.broadcast %292 : f32 to vector<8x128xf32>
    %294 = arith.mulf %188, %293 : vector<8x128xf32>
    %295 = arith.addf %291, %294 : vector<8x128xf32>
    %c1_126 = arith.constant 1 : index
    %c6_127 = arith.constant 6 : index
    %296 = memref.load %arg1[%c1_126, %c6_127] : memref<16x34xf32, #tpu.memory_space<smem>>
    %297 = vector.broadcast %296 : f32 to vector<8x128xf32>
    %298 = arith.mulf %193, %297 : vector<8x128xf32>
    %299 = arith.addf %295, %298 : vector<8x128xf32>
    %c1_128 = arith.constant 1 : index
    %c7_129 = arith.constant 7 : index
    %300 = memref.load %arg1[%c1_128, %c7_129] : memref<16x34xf32, #tpu.memory_space<smem>>
    %301 = vector.broadcast %300 : f32 to vector<8x128xf32>
    %302 = arith.mulf %198, %301 : vector<8x128xf32>
    %303 = arith.addf %299, %302 : vector<8x128xf32>
    %c1_130 = arith.constant 1 : index
    %c8_131 = arith.constant 8 : index
    %304 = memref.load %arg1[%c1_130, %c8_131] : memref<16x34xf32, #tpu.memory_space<smem>>
    %305 = vector.broadcast %304 : f32 to vector<8x128xf32>
    %306 = arith.mulf %203, %305 : vector<8x128xf32>
    %307 = arith.addf %303, %306 : vector<8x128xf32>
    %c1_132 = arith.constant 1 : index
    %c9_133 = arith.constant 9 : index
    %308 = memref.load %arg1[%c1_132, %c9_133] : memref<16x34xf32, #tpu.memory_space<smem>>
    %309 = vector.broadcast %308 : f32 to vector<8x128xf32>
    %310 = arith.mulf %208, %309 : vector<8x128xf32>
    %311 = arith.addf %307, %310 : vector<8x128xf32>
    %c1_134 = arith.constant 1 : index
    %c10_135 = arith.constant 10 : index
    %312 = memref.load %arg1[%c1_134, %c10_135] : memref<16x34xf32, #tpu.memory_space<smem>>
    %313 = vector.broadcast %312 : f32 to vector<8x128xf32>
    %314 = arith.mulf %213, %313 : vector<8x128xf32>
    %315 = arith.addf %311, %314 : vector<8x128xf32>
    %c1_136 = arith.constant 1 : index
    %c11_137 = arith.constant 11 : index
    %316 = memref.load %arg1[%c1_136, %c11_137] : memref<16x34xf32, #tpu.memory_space<smem>>
    %317 = vector.broadcast %316 : f32 to vector<8x128xf32>
    %318 = arith.mulf %218, %317 : vector<8x128xf32>
    %319 = arith.addf %315, %318 : vector<8x128xf32>
    %c1_138 = arith.constant 1 : index
    %c12_139 = arith.constant 12 : index
    %320 = memref.load %arg1[%c1_138, %c12_139] : memref<16x34xf32, #tpu.memory_space<smem>>
    %321 = vector.broadcast %320 : f32 to vector<8x128xf32>
    %322 = arith.mulf %223, %321 : vector<8x128xf32>
    %323 = arith.addf %319, %322 : vector<8x128xf32>
    %c1_140 = arith.constant 1 : index
    %c13_141 = arith.constant 13 : index
    %324 = memref.load %arg1[%c1_140, %c13_141] : memref<16x34xf32, #tpu.memory_space<smem>>
    %325 = vector.broadcast %324 : f32 to vector<8x128xf32>
    %326 = arith.mulf %228, %325 : vector<8x128xf32>
    %327 = arith.addf %323, %326 : vector<8x128xf32>
    %c1_142 = arith.constant 1 : index
    %c14_143 = arith.constant 14 : index
    %328 = memref.load %arg1[%c1_142, %c14_143] : memref<16x34xf32, #tpu.memory_space<smem>>
    %329 = vector.broadcast %328 : f32 to vector<8x128xf32>
    %330 = arith.mulf %233, %329 : vector<8x128xf32>
    %331 = arith.addf %327, %330 : vector<8x128xf32>
    %c1_144 = arith.constant 1 : index
    %c15_145 = arith.constant 15 : index
    %332 = memref.load %arg1[%c1_144, %c15_145] : memref<16x34xf32, #tpu.memory_space<smem>>
    %333 = vector.broadcast %332 : f32 to vector<8x128xf32>
    %334 = arith.mulf %238, %333 : vector<8x128xf32>
    %335 = arith.addf %331, %334 : vector<8x128xf32>
    %c1_146 = arith.constant 1 : index
    %c16_147 = arith.constant 16 : index
    %336 = memref.load %arg1[%c1_146, %c16_147] : memref<16x34xf32, #tpu.memory_space<smem>>
    %337 = vector.broadcast %336 : f32 to vector<8x128xf32>
    %338 = arith.addf %335, %337 : vector<8x128xf32>
    %c2_148 = arith.constant 2 : index
    %c4_149 = arith.constant 4 : index
    %339 = memref.load %arg1[%c2_148, %c4_149] : memref<16x34xf32, #tpu.memory_space<smem>>
    %340 = vector.broadcast %339 : f32 to vector<8x128xf32>
    %341 = arith.mulf %183, %340 : vector<8x128xf32>
    %c2_150 = arith.constant 2 : index
    %c5_151 = arith.constant 5 : index
    %342 = memref.load %arg1[%c2_150, %c5_151] : memref<16x34xf32, #tpu.memory_space<smem>>
    %343 = vector.broadcast %342 : f32 to vector<8x128xf32>
    %344 = arith.mulf %188, %343 : vector<8x128xf32>
    %345 = arith.addf %341, %344 : vector<8x128xf32>
    %c2_152 = arith.constant 2 : index
    %c6_153 = arith.constant 6 : index
    %346 = memref.load %arg1[%c2_152, %c6_153] : memref<16x34xf32, #tpu.memory_space<smem>>
    %347 = vector.broadcast %346 : f32 to vector<8x128xf32>
    %348 = arith.mulf %193, %347 : vector<8x128xf32>
    %349 = arith.addf %345, %348 : vector<8x128xf32>
    %c2_154 = arith.constant 2 : index
    %c7_155 = arith.constant 7 : index
    %350 = memref.load %arg1[%c2_154, %c7_155] : memref<16x34xf32, #tpu.memory_space<smem>>
    %351 = vector.broadcast %350 : f32 to vector<8x128xf32>
    %352 = arith.mulf %198, %351 : vector<8x128xf32>
    %353 = arith.addf %349, %352 : vector<8x128xf32>
    %c2_156 = arith.constant 2 : index
    %c8_157 = arith.constant 8 : index
    %354 = memref.load %arg1[%c2_156, %c8_157] : memref<16x34xf32, #tpu.memory_space<smem>>
    %355 = vector.broadcast %354 : f32 to vector<8x128xf32>
    %356 = arith.mulf %203, %355 : vector<8x128xf32>
    %357 = arith.addf %353, %356 : vector<8x128xf32>
    %c2_158 = arith.constant 2 : index
    %c9_159 = arith.constant 9 : index
    %358 = memref.load %arg1[%c2_158, %c9_159] : memref<16x34xf32, #tpu.memory_space<smem>>
    %359 = vector.broadcast %358 : f32 to vector<8x128xf32>
    %360 = arith.mulf %208, %359 : vector<8x128xf32>
    %361 = arith.addf %357, %360 : vector<8x128xf32>
    %c2_160 = arith.constant 2 : index
    %c10_161 = arith.constant 10 : index
    %362 = memref.load %arg1[%c2_160, %c10_161] : memref<16x34xf32, #tpu.memory_space<smem>>
    %363 = vector.broadcast %362 : f32 to vector<8x128xf32>
    %364 = arith.mulf %213, %363 : vector<8x128xf32>
    %365 = arith.addf %361, %364 : vector<8x128xf32>
    %c2_162 = arith.constant 2 : index
    %c11_163 = arith.constant 11 : index
    %366 = memref.load %arg1[%c2_162, %c11_163] : memref<16x34xf32, #tpu.memory_space<smem>>
    %367 = vector.broadcast %366 : f32 to vector<8x128xf32>
    %368 = arith.mulf %218, %367 : vector<8x128xf32>
    %369 = arith.addf %365, %368 : vector<8x128xf32>
    %c2_164 = arith.constant 2 : index
    %c12_165 = arith.constant 12 : index
    %370 = memref.load %arg1[%c2_164, %c12_165] : memref<16x34xf32, #tpu.memory_space<smem>>
    %371 = vector.broadcast %370 : f32 to vector<8x128xf32>
    %372 = arith.mulf %223, %371 : vector<8x128xf32>
    %373 = arith.addf %369, %372 : vector<8x128xf32>
    %c2_166 = arith.constant 2 : index
    %c13_167 = arith.constant 13 : index
    %374 = memref.load %arg1[%c2_166, %c13_167] : memref<16x34xf32, #tpu.memory_space<smem>>
    %375 = vector.broadcast %374 : f32 to vector<8x128xf32>
    %376 = arith.mulf %228, %375 : vector<8x128xf32>
    %377 = arith.addf %373, %376 : vector<8x128xf32>
    %c2_168 = arith.constant 2 : index
    %c14_169 = arith.constant 14 : index
    %378 = memref.load %arg1[%c2_168, %c14_169] : memref<16x34xf32, #tpu.memory_space<smem>>
    %379 = vector.broadcast %378 : f32 to vector<8x128xf32>
    %380 = arith.mulf %233, %379 : vector<8x128xf32>
    %381 = arith.addf %377, %380 : vector<8x128xf32>
    %c2_170 = arith.constant 2 : index
    %c15_171 = arith.constant 15 : index
    %382 = memref.load %arg1[%c2_170, %c15_171] : memref<16x34xf32, #tpu.memory_space<smem>>
    %383 = vector.broadcast %382 : f32 to vector<8x128xf32>
    %384 = arith.mulf %238, %383 : vector<8x128xf32>
    %385 = arith.addf %381, %384 : vector<8x128xf32>
    %c2_172 = arith.constant 2 : index
    %c16_173 = arith.constant 16 : index
    %386 = memref.load %arg1[%c2_172, %c16_173] : memref<16x34xf32, #tpu.memory_space<smem>>
    %387 = vector.broadcast %386 : f32 to vector<8x128xf32>
    %388 = arith.addf %385, %387 : vector<8x128xf32>
    %c3_174 = arith.constant 3 : index
    %c4_175 = arith.constant 4 : index
    %389 = memref.load %arg1[%c3_174, %c4_175] : memref<16x34xf32, #tpu.memory_space<smem>>
    %390 = vector.broadcast %389 : f32 to vector<8x128xf32>
    %391 = arith.mulf %183, %390 : vector<8x128xf32>
    %c3_176 = arith.constant 3 : index
    %c5_177 = arith.constant 5 : index
    %392 = memref.load %arg1[%c3_176, %c5_177] : memref<16x34xf32, #tpu.memory_space<smem>>
    %393 = vector.broadcast %392 : f32 to vector<8x128xf32>
    %394 = arith.mulf %188, %393 : vector<8x128xf32>
    %395 = arith.addf %391, %394 : vector<8x128xf32>
    %c3_178 = arith.constant 3 : index
    %c6_179 = arith.constant 6 : index
    %396 = memref.load %arg1[%c3_178, %c6_179] : memref<16x34xf32, #tpu.memory_space<smem>>
    %397 = vector.broadcast %396 : f32 to vector<8x128xf32>
    %398 = arith.mulf %193, %397 : vector<8x128xf32>
    %399 = arith.addf %395, %398 : vector<8x128xf32>
    %c3_180 = arith.constant 3 : index
    %c7_181 = arith.constant 7 : index
    %400 = memref.load %arg1[%c3_180, %c7_181] : memref<16x34xf32, #tpu.memory_space<smem>>
    %401 = vector.broadcast %400 : f32 to vector<8x128xf32>
    %402 = arith.mulf %198, %401 : vector<8x128xf32>
    %403 = arith.addf %399, %402 : vector<8x128xf32>
    %c3_182 = arith.constant 3 : index
    %c8_183 = arith.constant 8 : index
    %404 = memref.load %arg1[%c3_182, %c8_183] : memref<16x34xf32, #tpu.memory_space<smem>>
    %405 = vector.broadcast %404 : f32 to vector<8x128xf32>
    %406 = arith.mulf %203, %405 : vector<8x128xf32>
    %407 = arith.addf %403, %406 : vector<8x128xf32>
    %c3_184 = arith.constant 3 : index
    %c9_185 = arith.constant 9 : index
    %408 = memref.load %arg1[%c3_184, %c9_185] : memref<16x34xf32, #tpu.memory_space<smem>>
    %409 = vector.broadcast %408 : f32 to vector<8x128xf32>
    %410 = arith.mulf %208, %409 : vector<8x128xf32>
    %411 = arith.addf %407, %410 : vector<8x128xf32>
    %c3_186 = arith.constant 3 : index
    %c10_187 = arith.constant 10 : index
    %412 = memref.load %arg1[%c3_186, %c10_187] : memref<16x34xf32, #tpu.memory_space<smem>>
    %413 = vector.broadcast %412 : f32 to vector<8x128xf32>
    %414 = arith.mulf %213, %413 : vector<8x128xf32>
    %415 = arith.addf %411, %414 : vector<8x128xf32>
    %c3_188 = arith.constant 3 : index
    %c11_189 = arith.constant 11 : index
    %416 = memref.load %arg1[%c3_188, %c11_189] : memref<16x34xf32, #tpu.memory_space<smem>>
    %417 = vector.broadcast %416 : f32 to vector<8x128xf32>
    %418 = arith.mulf %218, %417 : vector<8x128xf32>
    %419 = arith.addf %415, %418 : vector<8x128xf32>
    %c3_190 = arith.constant 3 : index
    %c12_191 = arith.constant 12 : index
    %420 = memref.load %arg1[%c3_190, %c12_191] : memref<16x34xf32, #tpu.memory_space<smem>>
    %421 = vector.broadcast %420 : f32 to vector<8x128xf32>
    %422 = arith.mulf %223, %421 : vector<8x128xf32>
    %423 = arith.addf %419, %422 : vector<8x128xf32>
    %c3_192 = arith.constant 3 : index
    %c13_193 = arith.constant 13 : index
    %424 = memref.load %arg1[%c3_192, %c13_193] : memref<16x34xf32, #tpu.memory_space<smem>>
    %425 = vector.broadcast %424 : f32 to vector<8x128xf32>
    %426 = arith.mulf %228, %425 : vector<8x128xf32>
    %427 = arith.addf %423, %426 : vector<8x128xf32>
    %c3_194 = arith.constant 3 : index
    %c14_195 = arith.constant 14 : index
    %428 = memref.load %arg1[%c3_194, %c14_195] : memref<16x34xf32, #tpu.memory_space<smem>>
    %429 = vector.broadcast %428 : f32 to vector<8x128xf32>
    %430 = arith.mulf %233, %429 : vector<8x128xf32>
    %431 = arith.addf %427, %430 : vector<8x128xf32>
    %c3_196 = arith.constant 3 : index
    %c15_197 = arith.constant 15 : index
    %432 = memref.load %arg1[%c3_196, %c15_197] : memref<16x34xf32, #tpu.memory_space<smem>>
    %433 = vector.broadcast %432 : f32 to vector<8x128xf32>
    %434 = arith.mulf %238, %433 : vector<8x128xf32>
    %435 = arith.addf %431, %434 : vector<8x128xf32>
    %c3_198 = arith.constant 3 : index
    %c16_199 = arith.constant 16 : index
    %436 = memref.load %arg1[%c3_198, %c16_199] : memref<16x34xf32, #tpu.memory_space<smem>>
    %437 = vector.broadcast %436 : f32 to vector<8x128xf32>
    %438 = arith.addf %435, %437 : vector<8x128xf32>
    %c4_200 = arith.constant 4 : index
    %c4_201 = arith.constant 4 : index
    %439 = memref.load %arg1[%c4_200, %c4_201] : memref<16x34xf32, #tpu.memory_space<smem>>
    %440 = vector.broadcast %439 : f32 to vector<8x128xf32>
    %441 = arith.mulf %183, %440 : vector<8x128xf32>
    %c4_202 = arith.constant 4 : index
    %c5_203 = arith.constant 5 : index
    %442 = memref.load %arg1[%c4_202, %c5_203] : memref<16x34xf32, #tpu.memory_space<smem>>
    %443 = vector.broadcast %442 : f32 to vector<8x128xf32>
    %444 = arith.mulf %188, %443 : vector<8x128xf32>
    %445 = arith.addf %441, %444 : vector<8x128xf32>
    %c4_204 = arith.constant 4 : index
    %c6_205 = arith.constant 6 : index
    %446 = memref.load %arg1[%c4_204, %c6_205] : memref<16x34xf32, #tpu.memory_space<smem>>
    %447 = vector.broadcast %446 : f32 to vector<8x128xf32>
    %448 = arith.mulf %193, %447 : vector<8x128xf32>
    %449 = arith.addf %445, %448 : vector<8x128xf32>
    %c4_206 = arith.constant 4 : index
    %c7_207 = arith.constant 7 : index
    %450 = memref.load %arg1[%c4_206, %c7_207] : memref<16x34xf32, #tpu.memory_space<smem>>
    %451 = vector.broadcast %450 : f32 to vector<8x128xf32>
    %452 = arith.mulf %198, %451 : vector<8x128xf32>
    %453 = arith.addf %449, %452 : vector<8x128xf32>
    %c4_208 = arith.constant 4 : index
    %c8_209 = arith.constant 8 : index
    %454 = memref.load %arg1[%c4_208, %c8_209] : memref<16x34xf32, #tpu.memory_space<smem>>
    %455 = vector.broadcast %454 : f32 to vector<8x128xf32>
    %456 = arith.mulf %203, %455 : vector<8x128xf32>
    %457 = arith.addf %453, %456 : vector<8x128xf32>
    %c4_210 = arith.constant 4 : index
    %c9_211 = arith.constant 9 : index
    %458 = memref.load %arg1[%c4_210, %c9_211] : memref<16x34xf32, #tpu.memory_space<smem>>
    %459 = vector.broadcast %458 : f32 to vector<8x128xf32>
    %460 = arith.mulf %208, %459 : vector<8x128xf32>
    %461 = arith.addf %457, %460 : vector<8x128xf32>
    %c4_212 = arith.constant 4 : index
    %c10_213 = arith.constant 10 : index
    %462 = memref.load %arg1[%c4_212, %c10_213] : memref<16x34xf32, #tpu.memory_space<smem>>
    %463 = vector.broadcast %462 : f32 to vector<8x128xf32>
    %464 = arith.mulf %213, %463 : vector<8x128xf32>
    %465 = arith.addf %461, %464 : vector<8x128xf32>
    %c4_214 = arith.constant 4 : index
    %c11_215 = arith.constant 11 : index
    %466 = memref.load %arg1[%c4_214, %c11_215] : memref<16x34xf32, #tpu.memory_space<smem>>
    %467 = vector.broadcast %466 : f32 to vector<8x128xf32>
    %468 = arith.mulf %218, %467 : vector<8x128xf32>
    %469 = arith.addf %465, %468 : vector<8x128xf32>
    %c4_216 = arith.constant 4 : index
    %c12_217 = arith.constant 12 : index
    %470 = memref.load %arg1[%c4_216, %c12_217] : memref<16x34xf32, #tpu.memory_space<smem>>
    %471 = vector.broadcast %470 : f32 to vector<8x128xf32>
    %472 = arith.mulf %223, %471 : vector<8x128xf32>
    %473 = arith.addf %469, %472 : vector<8x128xf32>
    %c4_218 = arith.constant 4 : index
    %c13_219 = arith.constant 13 : index
    %474 = memref.load %arg1[%c4_218, %c13_219] : memref<16x34xf32, #tpu.memory_space<smem>>
    %475 = vector.broadcast %474 : f32 to vector<8x128xf32>
    %476 = arith.mulf %228, %475 : vector<8x128xf32>
    %477 = arith.addf %473, %476 : vector<8x128xf32>
    %c4_220 = arith.constant 4 : index
    %c14_221 = arith.constant 14 : index
    %478 = memref.load %arg1[%c4_220, %c14_221] : memref<16x34xf32, #tpu.memory_space<smem>>
    %479 = vector.broadcast %478 : f32 to vector<8x128xf32>
    %480 = arith.mulf %233, %479 : vector<8x128xf32>
    %481 = arith.addf %477, %480 : vector<8x128xf32>
    %c4_222 = arith.constant 4 : index
    %c15_223 = arith.constant 15 : index
    %482 = memref.load %arg1[%c4_222, %c15_223] : memref<16x34xf32, #tpu.memory_space<smem>>
    %483 = vector.broadcast %482 : f32 to vector<8x128xf32>
    %484 = arith.mulf %238, %483 : vector<8x128xf32>
    %485 = arith.addf %481, %484 : vector<8x128xf32>
    %c4_224 = arith.constant 4 : index
    %c16_225 = arith.constant 16 : index
    %486 = memref.load %arg1[%c4_224, %c16_225] : memref<16x34xf32, #tpu.memory_space<smem>>
    %487 = vector.broadcast %486 : f32 to vector<8x128xf32>
    %488 = arith.addf %485, %487 : vector<8x128xf32>
    %c5_226 = arith.constant 5 : index
    %c4_227 = arith.constant 4 : index
    %489 = memref.load %arg1[%c5_226, %c4_227] : memref<16x34xf32, #tpu.memory_space<smem>>
    %490 = vector.broadcast %489 : f32 to vector<8x128xf32>
    %491 = arith.mulf %183, %490 : vector<8x128xf32>
    %c5_228 = arith.constant 5 : index
    %c5_229 = arith.constant 5 : index
    %492 = memref.load %arg1[%c5_228, %c5_229] : memref<16x34xf32, #tpu.memory_space<smem>>
    %493 = vector.broadcast %492 : f32 to vector<8x128xf32>
    %494 = arith.mulf %188, %493 : vector<8x128xf32>
    %495 = arith.addf %491, %494 : vector<8x128xf32>
    %c5_230 = arith.constant 5 : index
    %c6_231 = arith.constant 6 : index
    %496 = memref.load %arg1[%c5_230, %c6_231] : memref<16x34xf32, #tpu.memory_space<smem>>
    %497 = vector.broadcast %496 : f32 to vector<8x128xf32>
    %498 = arith.mulf %193, %497 : vector<8x128xf32>
    %499 = arith.addf %495, %498 : vector<8x128xf32>
    %c5_232 = arith.constant 5 : index
    %c7_233 = arith.constant 7 : index
    %500 = memref.load %arg1[%c5_232, %c7_233] : memref<16x34xf32, #tpu.memory_space<smem>>
    %501 = vector.broadcast %500 : f32 to vector<8x128xf32>
    %502 = arith.mulf %198, %501 : vector<8x128xf32>
    %503 = arith.addf %499, %502 : vector<8x128xf32>
    %c5_234 = arith.constant 5 : index
    %c8_235 = arith.constant 8 : index
    %504 = memref.load %arg1[%c5_234, %c8_235] : memref<16x34xf32, #tpu.memory_space<smem>>
    %505 = vector.broadcast %504 : f32 to vector<8x128xf32>
    %506 = arith.mulf %203, %505 : vector<8x128xf32>
    %507 = arith.addf %503, %506 : vector<8x128xf32>
    %c5_236 = arith.constant 5 : index
    %c9_237 = arith.constant 9 : index
    %508 = memref.load %arg1[%c5_236, %c9_237] : memref<16x34xf32, #tpu.memory_space<smem>>
    %509 = vector.broadcast %508 : f32 to vector<8x128xf32>
    %510 = arith.mulf %208, %509 : vector<8x128xf32>
    %511 = arith.addf %507, %510 : vector<8x128xf32>
    %c5_238 = arith.constant 5 : index
    %c10_239 = arith.constant 10 : index
    %512 = memref.load %arg1[%c5_238, %c10_239] : memref<16x34xf32, #tpu.memory_space<smem>>
    %513 = vector.broadcast %512 : f32 to vector<8x128xf32>
    %514 = arith.mulf %213, %513 : vector<8x128xf32>
    %515 = arith.addf %511, %514 : vector<8x128xf32>
    %c5_240 = arith.constant 5 : index
    %c11_241 = arith.constant 11 : index
    %516 = memref.load %arg1[%c5_240, %c11_241] : memref<16x34xf32, #tpu.memory_space<smem>>
    %517 = vector.broadcast %516 : f32 to vector<8x128xf32>
    %518 = arith.mulf %218, %517 : vector<8x128xf32>
    %519 = arith.addf %515, %518 : vector<8x128xf32>
    %c5_242 = arith.constant 5 : index
    %c12_243 = arith.constant 12 : index
    %520 = memref.load %arg1[%c5_242, %c12_243] : memref<16x34xf32, #tpu.memory_space<smem>>
    %521 = vector.broadcast %520 : f32 to vector<8x128xf32>
    %522 = arith.mulf %223, %521 : vector<8x128xf32>
    %523 = arith.addf %519, %522 : vector<8x128xf32>
    %c5_244 = arith.constant 5 : index
    %c13_245 = arith.constant 13 : index
    %524 = memref.load %arg1[%c5_244, %c13_245] : memref<16x34xf32, #tpu.memory_space<smem>>
    %525 = vector.broadcast %524 : f32 to vector<8x128xf32>
    %526 = arith.mulf %228, %525 : vector<8x128xf32>
    %527 = arith.addf %523, %526 : vector<8x128xf32>
    %c5_246 = arith.constant 5 : index
    %c14_247 = arith.constant 14 : index
    %528 = memref.load %arg1[%c5_246, %c14_247] : memref<16x34xf32, #tpu.memory_space<smem>>
    %529 = vector.broadcast %528 : f32 to vector<8x128xf32>
    %530 = arith.mulf %233, %529 : vector<8x128xf32>
    %531 = arith.addf %527, %530 : vector<8x128xf32>
    %c5_248 = arith.constant 5 : index
    %c15_249 = arith.constant 15 : index
    %532 = memref.load %arg1[%c5_248, %c15_249] : memref<16x34xf32, #tpu.memory_space<smem>>
    %533 = vector.broadcast %532 : f32 to vector<8x128xf32>
    %534 = arith.mulf %238, %533 : vector<8x128xf32>
    %535 = arith.addf %531, %534 : vector<8x128xf32>
    %c5_250 = arith.constant 5 : index
    %c16_251 = arith.constant 16 : index
    %536 = memref.load %arg1[%c5_250, %c16_251] : memref<16x34xf32, #tpu.memory_space<smem>>
    %537 = vector.broadcast %536 : f32 to vector<8x128xf32>
    %538 = arith.addf %535, %537 : vector<8x128xf32>
    %c6_252 = arith.constant 6 : index
    %c4_253 = arith.constant 4 : index
    %539 = memref.load %arg1[%c6_252, %c4_253] : memref<16x34xf32, #tpu.memory_space<smem>>
    %540 = vector.broadcast %539 : f32 to vector<8x128xf32>
    %541 = arith.mulf %183, %540 : vector<8x128xf32>
    %c6_254 = arith.constant 6 : index
    %c5_255 = arith.constant 5 : index
    %542 = memref.load %arg1[%c6_254, %c5_255] : memref<16x34xf32, #tpu.memory_space<smem>>
    %543 = vector.broadcast %542 : f32 to vector<8x128xf32>
    %544 = arith.mulf %188, %543 : vector<8x128xf32>
    %545 = arith.addf %541, %544 : vector<8x128xf32>
    %c6_256 = arith.constant 6 : index
    %c6_257 = arith.constant 6 : index
    %546 = memref.load %arg1[%c6_256, %c6_257] : memref<16x34xf32, #tpu.memory_space<smem>>
    %547 = vector.broadcast %546 : f32 to vector<8x128xf32>
    %548 = arith.mulf %193, %547 : vector<8x128xf32>
    %549 = arith.addf %545, %548 : vector<8x128xf32>
    %c6_258 = arith.constant 6 : index
    %c7_259 = arith.constant 7 : index
    %550 = memref.load %arg1[%c6_258, %c7_259] : memref<16x34xf32, #tpu.memory_space<smem>>
    %551 = vector.broadcast %550 : f32 to vector<8x128xf32>
    %552 = arith.mulf %198, %551 : vector<8x128xf32>
    %553 = arith.addf %549, %552 : vector<8x128xf32>
    %c6_260 = arith.constant 6 : index
    %c8_261 = arith.constant 8 : index
    %554 = memref.load %arg1[%c6_260, %c8_261] : memref<16x34xf32, #tpu.memory_space<smem>>
    %555 = vector.broadcast %554 : f32 to vector<8x128xf32>
    %556 = arith.mulf %203, %555 : vector<8x128xf32>
    %557 = arith.addf %553, %556 : vector<8x128xf32>
    %c6_262 = arith.constant 6 : index
    %c9_263 = arith.constant 9 : index
    %558 = memref.load %arg1[%c6_262, %c9_263] : memref<16x34xf32, #tpu.memory_space<smem>>
    %559 = vector.broadcast %558 : f32 to vector<8x128xf32>
    %560 = arith.mulf %208, %559 : vector<8x128xf32>
    %561 = arith.addf %557, %560 : vector<8x128xf32>
    %c6_264 = arith.constant 6 : index
    %c10_265 = arith.constant 10 : index
    %562 = memref.load %arg1[%c6_264, %c10_265] : memref<16x34xf32, #tpu.memory_space<smem>>
    %563 = vector.broadcast %562 : f32 to vector<8x128xf32>
    %564 = arith.mulf %213, %563 : vector<8x128xf32>
    %565 = arith.addf %561, %564 : vector<8x128xf32>
    %c6_266 = arith.constant 6 : index
    %c11_267 = arith.constant 11 : index
    %566 = memref.load %arg1[%c6_266, %c11_267] : memref<16x34xf32, #tpu.memory_space<smem>>
    %567 = vector.broadcast %566 : f32 to vector<8x128xf32>
    %568 = arith.mulf %218, %567 : vector<8x128xf32>
    %569 = arith.addf %565, %568 : vector<8x128xf32>
    %c6_268 = arith.constant 6 : index
    %c12_269 = arith.constant 12 : index
    %570 = memref.load %arg1[%c6_268, %c12_269] : memref<16x34xf32, #tpu.memory_space<smem>>
    %571 = vector.broadcast %570 : f32 to vector<8x128xf32>
    %572 = arith.mulf %223, %571 : vector<8x128xf32>
    %573 = arith.addf %569, %572 : vector<8x128xf32>
    %c6_270 = arith.constant 6 : index
    %c13_271 = arith.constant 13 : index
    %574 = memref.load %arg1[%c6_270, %c13_271] : memref<16x34xf32, #tpu.memory_space<smem>>
    %575 = vector.broadcast %574 : f32 to vector<8x128xf32>
    %576 = arith.mulf %228, %575 : vector<8x128xf32>
    %577 = arith.addf %573, %576 : vector<8x128xf32>
    %c6_272 = arith.constant 6 : index
    %c14_273 = arith.constant 14 : index
    %578 = memref.load %arg1[%c6_272, %c14_273] : memref<16x34xf32, #tpu.memory_space<smem>>
    %579 = vector.broadcast %578 : f32 to vector<8x128xf32>
    %580 = arith.mulf %233, %579 : vector<8x128xf32>
    %581 = arith.addf %577, %580 : vector<8x128xf32>
    %c6_274 = arith.constant 6 : index
    %c15_275 = arith.constant 15 : index
    %582 = memref.load %arg1[%c6_274, %c15_275] : memref<16x34xf32, #tpu.memory_space<smem>>
    %583 = vector.broadcast %582 : f32 to vector<8x128xf32>
    %584 = arith.mulf %238, %583 : vector<8x128xf32>
    %585 = arith.addf %581, %584 : vector<8x128xf32>
    %c6_276 = arith.constant 6 : index
    %c16_277 = arith.constant 16 : index
    %586 = memref.load %arg1[%c6_276, %c16_277] : memref<16x34xf32, #tpu.memory_space<smem>>
    %587 = vector.broadcast %586 : f32 to vector<8x128xf32>
    %588 = arith.addf %585, %587 : vector<8x128xf32>
    %c7_278 = arith.constant 7 : index
    %c4_279 = arith.constant 4 : index
    %589 = memref.load %arg1[%c7_278, %c4_279] : memref<16x34xf32, #tpu.memory_space<smem>>
    %590 = vector.broadcast %589 : f32 to vector<8x128xf32>
    %591 = arith.mulf %183, %590 : vector<8x128xf32>
    %c7_280 = arith.constant 7 : index
    %c5_281 = arith.constant 5 : index
    %592 = memref.load %arg1[%c7_280, %c5_281] : memref<16x34xf32, #tpu.memory_space<smem>>
    %593 = vector.broadcast %592 : f32 to vector<8x128xf32>
    %594 = arith.mulf %188, %593 : vector<8x128xf32>
    %595 = arith.addf %591, %594 : vector<8x128xf32>
    %c7_282 = arith.constant 7 : index
    %c6_283 = arith.constant 6 : index
    %596 = memref.load %arg1[%c7_282, %c6_283] : memref<16x34xf32, #tpu.memory_space<smem>>
    %597 = vector.broadcast %596 : f32 to vector<8x128xf32>
    %598 = arith.mulf %193, %597 : vector<8x128xf32>
    %599 = arith.addf %595, %598 : vector<8x128xf32>
    %c7_284 = arith.constant 7 : index
    %c7_285 = arith.constant 7 : index
    %600 = memref.load %arg1[%c7_284, %c7_285] : memref<16x34xf32, #tpu.memory_space<smem>>
    %601 = vector.broadcast %600 : f32 to vector<8x128xf32>
    %602 = arith.mulf %198, %601 : vector<8x128xf32>
    %603 = arith.addf %599, %602 : vector<8x128xf32>
    %c7_286 = arith.constant 7 : index
    %c8_287 = arith.constant 8 : index
    %604 = memref.load %arg1[%c7_286, %c8_287] : memref<16x34xf32, #tpu.memory_space<smem>>
    %605 = vector.broadcast %604 : f32 to vector<8x128xf32>
    %606 = arith.mulf %203, %605 : vector<8x128xf32>
    %607 = arith.addf %603, %606 : vector<8x128xf32>
    %c7_288 = arith.constant 7 : index
    %c9_289 = arith.constant 9 : index
    %608 = memref.load %arg1[%c7_288, %c9_289] : memref<16x34xf32, #tpu.memory_space<smem>>
    %609 = vector.broadcast %608 : f32 to vector<8x128xf32>
    %610 = arith.mulf %208, %609 : vector<8x128xf32>
    %611 = arith.addf %607, %610 : vector<8x128xf32>
    %c7_290 = arith.constant 7 : index
    %c10_291 = arith.constant 10 : index
    %612 = memref.load %arg1[%c7_290, %c10_291] : memref<16x34xf32, #tpu.memory_space<smem>>
    %613 = vector.broadcast %612 : f32 to vector<8x128xf32>
    %614 = arith.mulf %213, %613 : vector<8x128xf32>
    %615 = arith.addf %611, %614 : vector<8x128xf32>
    %c7_292 = arith.constant 7 : index
    %c11_293 = arith.constant 11 : index
    %616 = memref.load %arg1[%c7_292, %c11_293] : memref<16x34xf32, #tpu.memory_space<smem>>
    %617 = vector.broadcast %616 : f32 to vector<8x128xf32>
    %618 = arith.mulf %218, %617 : vector<8x128xf32>
    %619 = arith.addf %615, %618 : vector<8x128xf32>
    %c7_294 = arith.constant 7 : index
    %c12_295 = arith.constant 12 : index
    %620 = memref.load %arg1[%c7_294, %c12_295] : memref<16x34xf32, #tpu.memory_space<smem>>
    %621 = vector.broadcast %620 : f32 to vector<8x128xf32>
    %622 = arith.mulf %223, %621 : vector<8x128xf32>
    %623 = arith.addf %619, %622 : vector<8x128xf32>
    %c7_296 = arith.constant 7 : index
    %c13_297 = arith.constant 13 : index
    %624 = memref.load %arg1[%c7_296, %c13_297] : memref<16x34xf32, #tpu.memory_space<smem>>
    %625 = vector.broadcast %624 : f32 to vector<8x128xf32>
    %626 = arith.mulf %228, %625 : vector<8x128xf32>
    %627 = arith.addf %623, %626 : vector<8x128xf32>
    %c7_298 = arith.constant 7 : index
    %c14_299 = arith.constant 14 : index
    %628 = memref.load %arg1[%c7_298, %c14_299] : memref<16x34xf32, #tpu.memory_space<smem>>
    %629 = vector.broadcast %628 : f32 to vector<8x128xf32>
    %630 = arith.mulf %233, %629 : vector<8x128xf32>
    %631 = arith.addf %627, %630 : vector<8x128xf32>
    %c7_300 = arith.constant 7 : index
    %c15_301 = arith.constant 15 : index
    %632 = memref.load %arg1[%c7_300, %c15_301] : memref<16x34xf32, #tpu.memory_space<smem>>
    %633 = vector.broadcast %632 : f32 to vector<8x128xf32>
    %634 = arith.mulf %238, %633 : vector<8x128xf32>
    %635 = arith.addf %631, %634 : vector<8x128xf32>
    %c7_302 = arith.constant 7 : index
    %c16_303 = arith.constant 16 : index
    %636 = memref.load %arg1[%c7_302, %c16_303] : memref<16x34xf32, #tpu.memory_space<smem>>
    %637 = vector.broadcast %636 : f32 to vector<8x128xf32>
    %638 = arith.addf %635, %637 : vector<8x128xf32>
    %c8_304 = arith.constant 8 : index
    %c4_305 = arith.constant 4 : index
    %639 = memref.load %arg1[%c8_304, %c4_305] : memref<16x34xf32, #tpu.memory_space<smem>>
    %640 = vector.broadcast %639 : f32 to vector<8x128xf32>
    %641 = arith.mulf %183, %640 : vector<8x128xf32>
    %c8_306 = arith.constant 8 : index
    %c5_307 = arith.constant 5 : index
    %642 = memref.load %arg1[%c8_306, %c5_307] : memref<16x34xf32, #tpu.memory_space<smem>>
    %643 = vector.broadcast %642 : f32 to vector<8x128xf32>
    %644 = arith.mulf %188, %643 : vector<8x128xf32>
    %645 = arith.addf %641, %644 : vector<8x128xf32>
    %c8_308 = arith.constant 8 : index
    %c6_309 = arith.constant 6 : index
    %646 = memref.load %arg1[%c8_308, %c6_309] : memref<16x34xf32, #tpu.memory_space<smem>>
    %647 = vector.broadcast %646 : f32 to vector<8x128xf32>
    %648 = arith.mulf %193, %647 : vector<8x128xf32>
    %649 = arith.addf %645, %648 : vector<8x128xf32>
    %c8_310 = arith.constant 8 : index
    %c7_311 = arith.constant 7 : index
    %650 = memref.load %arg1[%c8_310, %c7_311] : memref<16x34xf32, #tpu.memory_space<smem>>
    %651 = vector.broadcast %650 : f32 to vector<8x128xf32>
    %652 = arith.mulf %198, %651 : vector<8x128xf32>
    %653 = arith.addf %649, %652 : vector<8x128xf32>
    %c8_312 = arith.constant 8 : index
    %c8_313 = arith.constant 8 : index
    %654 = memref.load %arg1[%c8_312, %c8_313] : memref<16x34xf32, #tpu.memory_space<smem>>
    %655 = vector.broadcast %654 : f32 to vector<8x128xf32>
    %656 = arith.mulf %203, %655 : vector<8x128xf32>
    %657 = arith.addf %653, %656 : vector<8x128xf32>
    %c8_314 = arith.constant 8 : index
    %c9_315 = arith.constant 9 : index
    %658 = memref.load %arg1[%c8_314, %c9_315] : memref<16x34xf32, #tpu.memory_space<smem>>
    %659 = vector.broadcast %658 : f32 to vector<8x128xf32>
    %660 = arith.mulf %208, %659 : vector<8x128xf32>
    %661 = arith.addf %657, %660 : vector<8x128xf32>
    %c8_316 = arith.constant 8 : index
    %c10_317 = arith.constant 10 : index
    %662 = memref.load %arg1[%c8_316, %c10_317] : memref<16x34xf32, #tpu.memory_space<smem>>
    %663 = vector.broadcast %662 : f32 to vector<8x128xf32>
    %664 = arith.mulf %213, %663 : vector<8x128xf32>
    %665 = arith.addf %661, %664 : vector<8x128xf32>
    %c8_318 = arith.constant 8 : index
    %c11_319 = arith.constant 11 : index
    %666 = memref.load %arg1[%c8_318, %c11_319] : memref<16x34xf32, #tpu.memory_space<smem>>
    %667 = vector.broadcast %666 : f32 to vector<8x128xf32>
    %668 = arith.mulf %218, %667 : vector<8x128xf32>
    %669 = arith.addf %665, %668 : vector<8x128xf32>
    %c8_320 = arith.constant 8 : index
    %c12_321 = arith.constant 12 : index
    %670 = memref.load %arg1[%c8_320, %c12_321] : memref<16x34xf32, #tpu.memory_space<smem>>
    %671 = vector.broadcast %670 : f32 to vector<8x128xf32>
    %672 = arith.mulf %223, %671 : vector<8x128xf32>
    %673 = arith.addf %669, %672 : vector<8x128xf32>
    %c8_322 = arith.constant 8 : index
    %c13_323 = arith.constant 13 : index
    %674 = memref.load %arg1[%c8_322, %c13_323] : memref<16x34xf32, #tpu.memory_space<smem>>
    %675 = vector.broadcast %674 : f32 to vector<8x128xf32>
    %676 = arith.mulf %228, %675 : vector<8x128xf32>
    %677 = arith.addf %673, %676 : vector<8x128xf32>
    %c8_324 = arith.constant 8 : index
    %c14_325 = arith.constant 14 : index
    %678 = memref.load %arg1[%c8_324, %c14_325] : memref<16x34xf32, #tpu.memory_space<smem>>
    %679 = vector.broadcast %678 : f32 to vector<8x128xf32>
    %680 = arith.mulf %233, %679 : vector<8x128xf32>
    %681 = arith.addf %677, %680 : vector<8x128xf32>
    %c8_326 = arith.constant 8 : index
    %c15_327 = arith.constant 15 : index
    %682 = memref.load %arg1[%c8_326, %c15_327] : memref<16x34xf32, #tpu.memory_space<smem>>
    %683 = vector.broadcast %682 : f32 to vector<8x128xf32>
    %684 = arith.mulf %238, %683 : vector<8x128xf32>
    %685 = arith.addf %681, %684 : vector<8x128xf32>
    %c8_328 = arith.constant 8 : index
    %c16_329 = arith.constant 16 : index
    %686 = memref.load %arg1[%c8_328, %c16_329] : memref<16x34xf32, #tpu.memory_space<smem>>
    %687 = vector.broadcast %686 : f32 to vector<8x128xf32>
    %688 = arith.addf %685, %687 : vector<8x128xf32>
    %689 = arith.negf %288 : vector<8x128xf32>
    %690 = math.exp %689 : vector<8x128xf32>
    %cst_330 = arith.constant 1.000000e+00 : f32
    %691 = vector.broadcast %cst_330 : f32 to vector<8x128xf32>
    %692 = arith.addf %691, %690 : vector<8x128xf32>
    %693 = arith.divf %691, %692 : vector<8x128xf32>
    %694 = arith.negf %338 : vector<8x128xf32>
    %695 = math.exp %694 : vector<8x128xf32>
    %cst_331 = arith.constant 1.000000e+00 : f32
    %696 = vector.broadcast %cst_331 : f32 to vector<8x128xf32>
    %697 = arith.addf %696, %695 : vector<8x128xf32>
    %698 = arith.divf %696, %697 : vector<8x128xf32>
    %699 = arith.negf %388 : vector<8x128xf32>
    %700 = math.exp %699 : vector<8x128xf32>
    %cst_332 = arith.constant 1.000000e+00 : f32
    %701 = vector.broadcast %cst_332 : f32 to vector<8x128xf32>
    %702 = arith.addf %701, %700 : vector<8x128xf32>
    %703 = arith.divf %701, %702 : vector<8x128xf32>
    %704 = arith.negf %438 : vector<8x128xf32>
    %705 = math.exp %704 : vector<8x128xf32>
    %cst_333 = arith.constant 1.000000e+00 : f32
    %706 = vector.broadcast %cst_333 : f32 to vector<8x128xf32>
    %707 = arith.addf %706, %705 : vector<8x128xf32>
    %708 = arith.divf %706, %707 : vector<8x128xf32>
    %709 = arith.negf %488 : vector<8x128xf32>
    %710 = math.exp %709 : vector<8x128xf32>
    %cst_334 = arith.constant 1.000000e+00 : f32
    %711 = vector.broadcast %cst_334 : f32 to vector<8x128xf32>
    %712 = arith.addf %711, %710 : vector<8x128xf32>
    %713 = arith.divf %711, %712 : vector<8x128xf32>
    %714 = arith.negf %538 : vector<8x128xf32>
    %715 = math.exp %714 : vector<8x128xf32>
    %cst_335 = arith.constant 1.000000e+00 : f32
    %716 = vector.broadcast %cst_335 : f32 to vector<8x128xf32>
    %717 = arith.addf %716, %715 : vector<8x128xf32>
    %718 = arith.divf %716, %717 : vector<8x128xf32>
    %719 = arith.negf %588 : vector<8x128xf32>
    %720 = math.exp %719 : vector<8x128xf32>
    %cst_336 = arith.constant 1.000000e+00 : f32
    %721 = vector.broadcast %cst_336 : f32 to vector<8x128xf32>
    %722 = arith.addf %721, %720 : vector<8x128xf32>
    %723 = arith.divf %721, %722 : vector<8x128xf32>
    %724 = arith.negf %638 : vector<8x128xf32>
    %725 = math.exp %724 : vector<8x128xf32>
    %cst_337 = arith.constant 1.000000e+00 : f32
    %726 = vector.broadcast %cst_337 : f32 to vector<8x128xf32>
    %727 = arith.addf %726, %725 : vector<8x128xf32>
    %728 = arith.divf %726, %727 : vector<8x128xf32>
    %729 = arith.negf %688 : vector<8x128xf32>
    %730 = math.exp %729 : vector<8x128xf32>
    %cst_338 = arith.constant 1.000000e+00 : f32
    %731 = vector.broadcast %cst_338 : f32 to vector<8x128xf32>
    %732 = arith.addf %731, %730 : vector<8x128xf32>
    %733 = arith.divf %731, %732 : vector<8x128xf32>
    %c0_339 = arith.constant 0 : index
    %c17 = arith.constant 17 : index
    %734 = memref.load %arg1[%c0_339, %c17] : memref<16x34xf32, #tpu.memory_space<smem>>
    %735 = vector.broadcast %734 : f32 to vector<8x128xf32>
    %736 = arith.mulf %693, %735 : vector<8x128xf32>
    %c0_340 = arith.constant 0 : index
    %c18 = arith.constant 18 : index
    %737 = memref.load %arg1[%c0_340, %c18] : memref<16x34xf32, #tpu.memory_space<smem>>
    %738 = vector.broadcast %737 : f32 to vector<8x128xf32>
    %739 = arith.mulf %698, %738 : vector<8x128xf32>
    %740 = arith.addf %736, %739 : vector<8x128xf32>
    %c0_341 = arith.constant 0 : index
    %c19 = arith.constant 19 : index
    %741 = memref.load %arg1[%c0_341, %c19] : memref<16x34xf32, #tpu.memory_space<smem>>
    %742 = vector.broadcast %741 : f32 to vector<8x128xf32>
    %743 = arith.mulf %703, %742 : vector<8x128xf32>
    %744 = arith.addf %740, %743 : vector<8x128xf32>
    %c0_342 = arith.constant 0 : index
    %c20 = arith.constant 20 : index
    %745 = memref.load %arg1[%c0_342, %c20] : memref<16x34xf32, #tpu.memory_space<smem>>
    %746 = vector.broadcast %745 : f32 to vector<8x128xf32>
    %747 = arith.mulf %708, %746 : vector<8x128xf32>
    %748 = arith.addf %744, %747 : vector<8x128xf32>
    %c0_343 = arith.constant 0 : index
    %c21 = arith.constant 21 : index
    %749 = memref.load %arg1[%c0_343, %c21] : memref<16x34xf32, #tpu.memory_space<smem>>
    %750 = vector.broadcast %749 : f32 to vector<8x128xf32>
    %751 = arith.mulf %713, %750 : vector<8x128xf32>
    %752 = arith.addf %748, %751 : vector<8x128xf32>
    %c0_344 = arith.constant 0 : index
    %c22 = arith.constant 22 : index
    %753 = memref.load %arg1[%c0_344, %c22] : memref<16x34xf32, #tpu.memory_space<smem>>
    %754 = vector.broadcast %753 : f32 to vector<8x128xf32>
    %755 = arith.mulf %718, %754 : vector<8x128xf32>
    %756 = arith.addf %752, %755 : vector<8x128xf32>
    %c0_345 = arith.constant 0 : index
    %c23 = arith.constant 23 : index
    %757 = memref.load %arg1[%c0_345, %c23] : memref<16x34xf32, #tpu.memory_space<smem>>
    %758 = vector.broadcast %757 : f32 to vector<8x128xf32>
    %759 = arith.mulf %723, %758 : vector<8x128xf32>
    %760 = arith.addf %756, %759 : vector<8x128xf32>
    %c0_346 = arith.constant 0 : index
    %c24 = arith.constant 24 : index
    %761 = memref.load %arg1[%c0_346, %c24] : memref<16x34xf32, #tpu.memory_space<smem>>
    %762 = vector.broadcast %761 : f32 to vector<8x128xf32>
    %763 = arith.mulf %728, %762 : vector<8x128xf32>
    %764 = arith.addf %760, %763 : vector<8x128xf32>
    %c0_347 = arith.constant 0 : index
    %c25 = arith.constant 25 : index
    %765 = memref.load %arg1[%c0_347, %c25] : memref<16x34xf32, #tpu.memory_space<smem>>
    %766 = vector.broadcast %765 : f32 to vector<8x128xf32>
    %767 = arith.mulf %733, %766 : vector<8x128xf32>
    %768 = arith.addf %764, %767 : vector<8x128xf32>
    %c0_348 = arith.constant 0 : index
    %c26 = arith.constant 26 : index
    %769 = memref.load %arg1[%c0_348, %c26] : memref<16x34xf32, #tpu.memory_space<smem>>
    %770 = vector.broadcast %769 : f32 to vector<8x128xf32>
    %771 = arith.addf %768, %770 : vector<8x128xf32>
    %c1_349 = arith.constant 1 : index
    %c17_350 = arith.constant 17 : index
    %772 = memref.load %arg1[%c1_349, %c17_350] : memref<16x34xf32, #tpu.memory_space<smem>>
    %773 = vector.broadcast %772 : f32 to vector<8x128xf32>
    %774 = arith.mulf %693, %773 : vector<8x128xf32>
    %c1_351 = arith.constant 1 : index
    %c18_352 = arith.constant 18 : index
    %775 = memref.load %arg1[%c1_351, %c18_352] : memref<16x34xf32, #tpu.memory_space<smem>>
    %776 = vector.broadcast %775 : f32 to vector<8x128xf32>
    %777 = arith.mulf %698, %776 : vector<8x128xf32>
    %778 = arith.addf %774, %777 : vector<8x128xf32>
    %c1_353 = arith.constant 1 : index
    %c19_354 = arith.constant 19 : index
    %779 = memref.load %arg1[%c1_353, %c19_354] : memref<16x34xf32, #tpu.memory_space<smem>>
    %780 = vector.broadcast %779 : f32 to vector<8x128xf32>
    %781 = arith.mulf %703, %780 : vector<8x128xf32>
    %782 = arith.addf %778, %781 : vector<8x128xf32>
    %c1_355 = arith.constant 1 : index
    %c20_356 = arith.constant 20 : index
    %783 = memref.load %arg1[%c1_355, %c20_356] : memref<16x34xf32, #tpu.memory_space<smem>>
    %784 = vector.broadcast %783 : f32 to vector<8x128xf32>
    %785 = arith.mulf %708, %784 : vector<8x128xf32>
    %786 = arith.addf %782, %785 : vector<8x128xf32>
    %c1_357 = arith.constant 1 : index
    %c21_358 = arith.constant 21 : index
    %787 = memref.load %arg1[%c1_357, %c21_358] : memref<16x34xf32, #tpu.memory_space<smem>>
    %788 = vector.broadcast %787 : f32 to vector<8x128xf32>
    %789 = arith.mulf %713, %788 : vector<8x128xf32>
    %790 = arith.addf %786, %789 : vector<8x128xf32>
    %c1_359 = arith.constant 1 : index
    %c22_360 = arith.constant 22 : index
    %791 = memref.load %arg1[%c1_359, %c22_360] : memref<16x34xf32, #tpu.memory_space<smem>>
    %792 = vector.broadcast %791 : f32 to vector<8x128xf32>
    %793 = arith.mulf %718, %792 : vector<8x128xf32>
    %794 = arith.addf %790, %793 : vector<8x128xf32>
    %c1_361 = arith.constant 1 : index
    %c23_362 = arith.constant 23 : index
    %795 = memref.load %arg1[%c1_361, %c23_362] : memref<16x34xf32, #tpu.memory_space<smem>>
    %796 = vector.broadcast %795 : f32 to vector<8x128xf32>
    %797 = arith.mulf %723, %796 : vector<8x128xf32>
    %798 = arith.addf %794, %797 : vector<8x128xf32>
    %c1_363 = arith.constant 1 : index
    %c24_364 = arith.constant 24 : index
    %799 = memref.load %arg1[%c1_363, %c24_364] : memref<16x34xf32, #tpu.memory_space<smem>>
    %800 = vector.broadcast %799 : f32 to vector<8x128xf32>
    %801 = arith.mulf %728, %800 : vector<8x128xf32>
    %802 = arith.addf %798, %801 : vector<8x128xf32>
    %c1_365 = arith.constant 1 : index
    %c25_366 = arith.constant 25 : index
    %803 = memref.load %arg1[%c1_365, %c25_366] : memref<16x34xf32, #tpu.memory_space<smem>>
    %804 = vector.broadcast %803 : f32 to vector<8x128xf32>
    %805 = arith.mulf %733, %804 : vector<8x128xf32>
    %806 = arith.addf %802, %805 : vector<8x128xf32>
    %c1_367 = arith.constant 1 : index
    %c26_368 = arith.constant 26 : index
    %807 = memref.load %arg1[%c1_367, %c26_368] : memref<16x34xf32, #tpu.memory_space<smem>>
    %808 = vector.broadcast %807 : f32 to vector<8x128xf32>
    %809 = arith.addf %806, %808 : vector<8x128xf32>
    %c2_369 = arith.constant 2 : index
    %c17_370 = arith.constant 17 : index
    %810 = memref.load %arg1[%c2_369, %c17_370] : memref<16x34xf32, #tpu.memory_space<smem>>
    %811 = vector.broadcast %810 : f32 to vector<8x128xf32>
    %812 = arith.mulf %693, %811 : vector<8x128xf32>
    %c2_371 = arith.constant 2 : index
    %c18_372 = arith.constant 18 : index
    %813 = memref.load %arg1[%c2_371, %c18_372] : memref<16x34xf32, #tpu.memory_space<smem>>
    %814 = vector.broadcast %813 : f32 to vector<8x128xf32>
    %815 = arith.mulf %698, %814 : vector<8x128xf32>
    %816 = arith.addf %812, %815 : vector<8x128xf32>
    %c2_373 = arith.constant 2 : index
    %c19_374 = arith.constant 19 : index
    %817 = memref.load %arg1[%c2_373, %c19_374] : memref<16x34xf32, #tpu.memory_space<smem>>
    %818 = vector.broadcast %817 : f32 to vector<8x128xf32>
    %819 = arith.mulf %703, %818 : vector<8x128xf32>
    %820 = arith.addf %816, %819 : vector<8x128xf32>
    %c2_375 = arith.constant 2 : index
    %c20_376 = arith.constant 20 : index
    %821 = memref.load %arg1[%c2_375, %c20_376] : memref<16x34xf32, #tpu.memory_space<smem>>
    %822 = vector.broadcast %821 : f32 to vector<8x128xf32>
    %823 = arith.mulf %708, %822 : vector<8x128xf32>
    %824 = arith.addf %820, %823 : vector<8x128xf32>
    %c2_377 = arith.constant 2 : index
    %c21_378 = arith.constant 21 : index
    %825 = memref.load %arg1[%c2_377, %c21_378] : memref<16x34xf32, #tpu.memory_space<smem>>
    %826 = vector.broadcast %825 : f32 to vector<8x128xf32>
    %827 = arith.mulf %713, %826 : vector<8x128xf32>
    %828 = arith.addf %824, %827 : vector<8x128xf32>
    %c2_379 = arith.constant 2 : index
    %c22_380 = arith.constant 22 : index
    %829 = memref.load %arg1[%c2_379, %c22_380] : memref<16x34xf32, #tpu.memory_space<smem>>
    %830 = vector.broadcast %829 : f32 to vector<8x128xf32>
    %831 = arith.mulf %718, %830 : vector<8x128xf32>
    %832 = arith.addf %828, %831 : vector<8x128xf32>
    %c2_381 = arith.constant 2 : index
    %c23_382 = arith.constant 23 : index
    %833 = memref.load %arg1[%c2_381, %c23_382] : memref<16x34xf32, #tpu.memory_space<smem>>
    %834 = vector.broadcast %833 : f32 to vector<8x128xf32>
    %835 = arith.mulf %723, %834 : vector<8x128xf32>
    %836 = arith.addf %832, %835 : vector<8x128xf32>
    %c2_383 = arith.constant 2 : index
    %c24_384 = arith.constant 24 : index
    %837 = memref.load %arg1[%c2_383, %c24_384] : memref<16x34xf32, #tpu.memory_space<smem>>
    %838 = vector.broadcast %837 : f32 to vector<8x128xf32>
    %839 = arith.mulf %728, %838 : vector<8x128xf32>
    %840 = arith.addf %836, %839 : vector<8x128xf32>
    %c2_385 = arith.constant 2 : index
    %c25_386 = arith.constant 25 : index
    %841 = memref.load %arg1[%c2_385, %c25_386] : memref<16x34xf32, #tpu.memory_space<smem>>
    %842 = vector.broadcast %841 : f32 to vector<8x128xf32>
    %843 = arith.mulf %733, %842 : vector<8x128xf32>
    %844 = arith.addf %840, %843 : vector<8x128xf32>
    %c2_387 = arith.constant 2 : index
    %c26_388 = arith.constant 26 : index
    %845 = memref.load %arg1[%c2_387, %c26_388] : memref<16x34xf32, #tpu.memory_space<smem>>
    %846 = vector.broadcast %845 : f32 to vector<8x128xf32>
    %847 = arith.addf %844, %846 : vector<8x128xf32>
    %c3_389 = arith.constant 3 : index
    %c17_390 = arith.constant 17 : index
    %848 = memref.load %arg1[%c3_389, %c17_390] : memref<16x34xf32, #tpu.memory_space<smem>>
    %849 = vector.broadcast %848 : f32 to vector<8x128xf32>
    %850 = arith.mulf %693, %849 : vector<8x128xf32>
    %c3_391 = arith.constant 3 : index
    %c18_392 = arith.constant 18 : index
    %851 = memref.load %arg1[%c3_391, %c18_392] : memref<16x34xf32, #tpu.memory_space<smem>>
    %852 = vector.broadcast %851 : f32 to vector<8x128xf32>
    %853 = arith.mulf %698, %852 : vector<8x128xf32>
    %854 = arith.addf %850, %853 : vector<8x128xf32>
    %c3_393 = arith.constant 3 : index
    %c19_394 = arith.constant 19 : index
    %855 = memref.load %arg1[%c3_393, %c19_394] : memref<16x34xf32, #tpu.memory_space<smem>>
    %856 = vector.broadcast %855 : f32 to vector<8x128xf32>
    %857 = arith.mulf %703, %856 : vector<8x128xf32>
    %858 = arith.addf %854, %857 : vector<8x128xf32>
    %c3_395 = arith.constant 3 : index
    %c20_396 = arith.constant 20 : index
    %859 = memref.load %arg1[%c3_395, %c20_396] : memref<16x34xf32, #tpu.memory_space<smem>>
    %860 = vector.broadcast %859 : f32 to vector<8x128xf32>
    %861 = arith.mulf %708, %860 : vector<8x128xf32>
    %862 = arith.addf %858, %861 : vector<8x128xf32>
    %c3_397 = arith.constant 3 : index
    %c21_398 = arith.constant 21 : index
    %863 = memref.load %arg1[%c3_397, %c21_398] : memref<16x34xf32, #tpu.memory_space<smem>>
    %864 = vector.broadcast %863 : f32 to vector<8x128xf32>
    %865 = arith.mulf %713, %864 : vector<8x128xf32>
    %866 = arith.addf %862, %865 : vector<8x128xf32>
    %c3_399 = arith.constant 3 : index
    %c22_400 = arith.constant 22 : index
    %867 = memref.load %arg1[%c3_399, %c22_400] : memref<16x34xf32, #tpu.memory_space<smem>>
    %868 = vector.broadcast %867 : f32 to vector<8x128xf32>
    %869 = arith.mulf %718, %868 : vector<8x128xf32>
    %870 = arith.addf %866, %869 : vector<8x128xf32>
    %c3_401 = arith.constant 3 : index
    %c23_402 = arith.constant 23 : index
    %871 = memref.load %arg1[%c3_401, %c23_402] : memref<16x34xf32, #tpu.memory_space<smem>>
    %872 = vector.broadcast %871 : f32 to vector<8x128xf32>
    %873 = arith.mulf %723, %872 : vector<8x128xf32>
    %874 = arith.addf %870, %873 : vector<8x128xf32>
    %c3_403 = arith.constant 3 : index
    %c24_404 = arith.constant 24 : index
    %875 = memref.load %arg1[%c3_403, %c24_404] : memref<16x34xf32, #tpu.memory_space<smem>>
    %876 = vector.broadcast %875 : f32 to vector<8x128xf32>
    %877 = arith.mulf %728, %876 : vector<8x128xf32>
    %878 = arith.addf %874, %877 : vector<8x128xf32>
    %c3_405 = arith.constant 3 : index
    %c25_406 = arith.constant 25 : index
    %879 = memref.load %arg1[%c3_405, %c25_406] : memref<16x34xf32, #tpu.memory_space<smem>>
    %880 = vector.broadcast %879 : f32 to vector<8x128xf32>
    %881 = arith.mulf %733, %880 : vector<8x128xf32>
    %882 = arith.addf %878, %881 : vector<8x128xf32>
    %c3_407 = arith.constant 3 : index
    %c26_408 = arith.constant 26 : index
    %883 = memref.load %arg1[%c3_407, %c26_408] : memref<16x34xf32, #tpu.memory_space<smem>>
    %884 = vector.broadcast %883 : f32 to vector<8x128xf32>
    %885 = arith.addf %882, %884 : vector<8x128xf32>
    %c4_409 = arith.constant 4 : index
    %c17_410 = arith.constant 17 : index
    %886 = memref.load %arg1[%c4_409, %c17_410] : memref<16x34xf32, #tpu.memory_space<smem>>
    %887 = vector.broadcast %886 : f32 to vector<8x128xf32>
    %888 = arith.mulf %693, %887 : vector<8x128xf32>
    %c4_411 = arith.constant 4 : index
    %c18_412 = arith.constant 18 : index
    %889 = memref.load %arg1[%c4_411, %c18_412] : memref<16x34xf32, #tpu.memory_space<smem>>
    %890 = vector.broadcast %889 : f32 to vector<8x128xf32>
    %891 = arith.mulf %698, %890 : vector<8x128xf32>
    %892 = arith.addf %888, %891 : vector<8x128xf32>
    %c4_413 = arith.constant 4 : index
    %c19_414 = arith.constant 19 : index
    %893 = memref.load %arg1[%c4_413, %c19_414] : memref<16x34xf32, #tpu.memory_space<smem>>
    %894 = vector.broadcast %893 : f32 to vector<8x128xf32>
    %895 = arith.mulf %703, %894 : vector<8x128xf32>
    %896 = arith.addf %892, %895 : vector<8x128xf32>
    %c4_415 = arith.constant 4 : index
    %c20_416 = arith.constant 20 : index
    %897 = memref.load %arg1[%c4_415, %c20_416] : memref<16x34xf32, #tpu.memory_space<smem>>
    %898 = vector.broadcast %897 : f32 to vector<8x128xf32>
    %899 = arith.mulf %708, %898 : vector<8x128xf32>
    %900 = arith.addf %896, %899 : vector<8x128xf32>
    %c4_417 = arith.constant 4 : index
    %c21_418 = arith.constant 21 : index
    %901 = memref.load %arg1[%c4_417, %c21_418] : memref<16x34xf32, #tpu.memory_space<smem>>
    %902 = vector.broadcast %901 : f32 to vector<8x128xf32>
    %903 = arith.mulf %713, %902 : vector<8x128xf32>
    %904 = arith.addf %900, %903 : vector<8x128xf32>
    %c4_419 = arith.constant 4 : index
    %c22_420 = arith.constant 22 : index
    %905 = memref.load %arg1[%c4_419, %c22_420] : memref<16x34xf32, #tpu.memory_space<smem>>
    %906 = vector.broadcast %905 : f32 to vector<8x128xf32>
    %907 = arith.mulf %718, %906 : vector<8x128xf32>
    %908 = arith.addf %904, %907 : vector<8x128xf32>
    %c4_421 = arith.constant 4 : index
    %c23_422 = arith.constant 23 : index
    %909 = memref.load %arg1[%c4_421, %c23_422] : memref<16x34xf32, #tpu.memory_space<smem>>
    %910 = vector.broadcast %909 : f32 to vector<8x128xf32>
    %911 = arith.mulf %723, %910 : vector<8x128xf32>
    %912 = arith.addf %908, %911 : vector<8x128xf32>
    %c4_423 = arith.constant 4 : index
    %c24_424 = arith.constant 24 : index
    %913 = memref.load %arg1[%c4_423, %c24_424] : memref<16x34xf32, #tpu.memory_space<smem>>
    %914 = vector.broadcast %913 : f32 to vector<8x128xf32>
    %915 = arith.mulf %728, %914 : vector<8x128xf32>
    %916 = arith.addf %912, %915 : vector<8x128xf32>
    %c4_425 = arith.constant 4 : index
    %c25_426 = arith.constant 25 : index
    %917 = memref.load %arg1[%c4_425, %c25_426] : memref<16x34xf32, #tpu.memory_space<smem>>
    %918 = vector.broadcast %917 : f32 to vector<8x128xf32>
    %919 = arith.mulf %733, %918 : vector<8x128xf32>
    %920 = arith.addf %916, %919 : vector<8x128xf32>
    %c4_427 = arith.constant 4 : index
    %c26_428 = arith.constant 26 : index
    %921 = memref.load %arg1[%c4_427, %c26_428] : memref<16x34xf32, #tpu.memory_space<smem>>
    %922 = vector.broadcast %921 : f32 to vector<8x128xf32>
    %923 = arith.addf %920, %922 : vector<8x128xf32>
    %c5_429 = arith.constant 5 : index
    %c17_430 = arith.constant 17 : index
    %924 = memref.load %arg1[%c5_429, %c17_430] : memref<16x34xf32, #tpu.memory_space<smem>>
    %925 = vector.broadcast %924 : f32 to vector<8x128xf32>
    %926 = arith.mulf %693, %925 : vector<8x128xf32>
    %c5_431 = arith.constant 5 : index
    %c18_432 = arith.constant 18 : index
    %927 = memref.load %arg1[%c5_431, %c18_432] : memref<16x34xf32, #tpu.memory_space<smem>>
    %928 = vector.broadcast %927 : f32 to vector<8x128xf32>
    %929 = arith.mulf %698, %928 : vector<8x128xf32>
    %930 = arith.addf %926, %929 : vector<8x128xf32>
    %c5_433 = arith.constant 5 : index
    %c19_434 = arith.constant 19 : index
    %931 = memref.load %arg1[%c5_433, %c19_434] : memref<16x34xf32, #tpu.memory_space<smem>>
    %932 = vector.broadcast %931 : f32 to vector<8x128xf32>
    %933 = arith.mulf %703, %932 : vector<8x128xf32>
    %934 = arith.addf %930, %933 : vector<8x128xf32>
    %c5_435 = arith.constant 5 : index
    %c20_436 = arith.constant 20 : index
    %935 = memref.load %arg1[%c5_435, %c20_436] : memref<16x34xf32, #tpu.memory_space<smem>>
    %936 = vector.broadcast %935 : f32 to vector<8x128xf32>
    %937 = arith.mulf %708, %936 : vector<8x128xf32>
    %938 = arith.addf %934, %937 : vector<8x128xf32>
    %c5_437 = arith.constant 5 : index
    %c21_438 = arith.constant 21 : index
    %939 = memref.load %arg1[%c5_437, %c21_438] : memref<16x34xf32, #tpu.memory_space<smem>>
    %940 = vector.broadcast %939 : f32 to vector<8x128xf32>
    %941 = arith.mulf %713, %940 : vector<8x128xf32>
    %942 = arith.addf %938, %941 : vector<8x128xf32>
    %c5_439 = arith.constant 5 : index
    %c22_440 = arith.constant 22 : index
    %943 = memref.load %arg1[%c5_439, %c22_440] : memref<16x34xf32, #tpu.memory_space<smem>>
    %944 = vector.broadcast %943 : f32 to vector<8x128xf32>
    %945 = arith.mulf %718, %944 : vector<8x128xf32>
    %946 = arith.addf %942, %945 : vector<8x128xf32>
    %c5_441 = arith.constant 5 : index
    %c23_442 = arith.constant 23 : index
    %947 = memref.load %arg1[%c5_441, %c23_442] : memref<16x34xf32, #tpu.memory_space<smem>>
    %948 = vector.broadcast %947 : f32 to vector<8x128xf32>
    %949 = arith.mulf %723, %948 : vector<8x128xf32>
    %950 = arith.addf %946, %949 : vector<8x128xf32>
    %c5_443 = arith.constant 5 : index
    %c24_444 = arith.constant 24 : index
    %951 = memref.load %arg1[%c5_443, %c24_444] : memref<16x34xf32, #tpu.memory_space<smem>>
    %952 = vector.broadcast %951 : f32 to vector<8x128xf32>
    %953 = arith.mulf %728, %952 : vector<8x128xf32>
    %954 = arith.addf %950, %953 : vector<8x128xf32>
    %c5_445 = arith.constant 5 : index
    %c25_446 = arith.constant 25 : index
    %955 = memref.load %arg1[%c5_445, %c25_446] : memref<16x34xf32, #tpu.memory_space<smem>>
    %956 = vector.broadcast %955 : f32 to vector<8x128xf32>
    %957 = arith.mulf %733, %956 : vector<8x128xf32>
    %958 = arith.addf %954, %957 : vector<8x128xf32>
    %c5_447 = arith.constant 5 : index
    %c26_448 = arith.constant 26 : index
    %959 = memref.load %arg1[%c5_447, %c26_448] : memref<16x34xf32, #tpu.memory_space<smem>>
    %960 = vector.broadcast %959 : f32 to vector<8x128xf32>
    %961 = arith.addf %958, %960 : vector<8x128xf32>
    %cst_449 = arith.constant 0.000000e+00 : f32
    %962 = vector.broadcast %cst_449 : f32 to vector<8x128xf32>
    %963 = arith.maximumf %771, %962 : vector<8x128xf32>
    %cst_450 = arith.constant 0.000000e+00 : f32
    %964 = vector.broadcast %cst_450 : f32 to vector<8x128xf32>
    %965 = arith.maximumf %809, %964 : vector<8x128xf32>
    %cst_451 = arith.constant 0.000000e+00 : f32
    %966 = vector.broadcast %cst_451 : f32 to vector<8x128xf32>
    %967 = arith.maximumf %847, %966 : vector<8x128xf32>
    %cst_452 = arith.constant 0.000000e+00 : f32
    %968 = vector.broadcast %cst_452 : f32 to vector<8x128xf32>
    %969 = arith.maximumf %885, %968 : vector<8x128xf32>
    %cst_453 = arith.constant 0.000000e+00 : f32
    %970 = vector.broadcast %cst_453 : f32 to vector<8x128xf32>
    %971 = arith.maximumf %923, %970 : vector<8x128xf32>
    %cst_454 = arith.constant 0.000000e+00 : f32
    %972 = vector.broadcast %cst_454 : f32 to vector<8x128xf32>
    %973 = arith.maximumf %961, %972 : vector<8x128xf32>
    %c0_455 = arith.constant 0 : index
    %c27 = arith.constant 27 : index
    %974 = memref.load %arg1[%c0_455, %c27] : memref<16x34xf32, #tpu.memory_space<smem>>
    %975 = vector.broadcast %974 : f32 to vector<8x128xf32>
    %976 = arith.mulf %963, %975 : vector<8x128xf32>
    %c0_456 = arith.constant 0 : index
    %c28 = arith.constant 28 : index
    %977 = memref.load %arg1[%c0_456, %c28] : memref<16x34xf32, #tpu.memory_space<smem>>
    %978 = vector.broadcast %977 : f32 to vector<8x128xf32>
    %979 = arith.mulf %965, %978 : vector<8x128xf32>
    %980 = arith.addf %976, %979 : vector<8x128xf32>
    %c0_457 = arith.constant 0 : index
    %c29 = arith.constant 29 : index
    %981 = memref.load %arg1[%c0_457, %c29] : memref<16x34xf32, #tpu.memory_space<smem>>
    %982 = vector.broadcast %981 : f32 to vector<8x128xf32>
    %983 = arith.mulf %967, %982 : vector<8x128xf32>
    %984 = arith.addf %980, %983 : vector<8x128xf32>
    %c0_458 = arith.constant 0 : index
    %c30 = arith.constant 30 : index
    %985 = memref.load %arg1[%c0_458, %c30] : memref<16x34xf32, #tpu.memory_space<smem>>
    %986 = vector.broadcast %985 : f32 to vector<8x128xf32>
    %987 = arith.mulf %969, %986 : vector<8x128xf32>
    %988 = arith.addf %984, %987 : vector<8x128xf32>
    %c0_459 = arith.constant 0 : index
    %c31 = arith.constant 31 : index
    %989 = memref.load %arg1[%c0_459, %c31] : memref<16x34xf32, #tpu.memory_space<smem>>
    %990 = vector.broadcast %989 : f32 to vector<8x128xf32>
    %991 = arith.mulf %971, %990 : vector<8x128xf32>
    %992 = arith.addf %988, %991 : vector<8x128xf32>
    %c0_460 = arith.constant 0 : index
    %c32 = arith.constant 32 : index
    %993 = memref.load %arg1[%c0_460, %c32] : memref<16x34xf32, #tpu.memory_space<smem>>
    %994 = vector.broadcast %993 : f32 to vector<8x128xf32>
    %995 = arith.mulf %973, %994 : vector<8x128xf32>
    %996 = arith.addf %992, %995 : vector<8x128xf32>
    %c0_461 = arith.constant 0 : index
    %c33 = arith.constant 33 : index
    %997 = memref.load %arg1[%c0_461, %c33] : memref<16x34xf32, #tpu.memory_space<smem>>
    %998 = vector.broadcast %997 : f32 to vector<8x128xf32>
    %999 = arith.addf %996, %998 : vector<8x128xf32>
    %c0_462 = arith.constant 0 : index
    %1000 = arith.index_cast %1 : i32 to index
    %1001 = vector.load %arg3[%c0_462, %1000] : memref<8x128xf32, #tpu.memory_space<vmem>>, vector<8x128xf32>
    tpu.vector_store %arg3[%c0_462, %1000], %999 {strides = array<i32>} : memref<8x128xf32, #tpu.memory_space<vmem>>, vector<8x128xf32>,
    %c1_i32 = arith.constant 1 : i32
    return
  }
  func.func @transform_0(%arg0: i32) -> (i32, i32) {
    %c0_i32 = arith.constant 0 : i32
    %c0_i32_0 = arith.constant 0 : i32
    %c0_i32_1 = arith.constant 0 : i32
    return %c0_i32, %c0_i32_0 : i32, i32
  }
  func.func @transform_1(%arg0: i32) -> (i32, i32, i32) {
    %c0_i32 = arith.constant 0 : i32
    %c0_i32_0 = arith.constant 0 : i32
    %c0_i32_1 = arith.constant 0 : i32
    return %c0_i32, %c0_i32_0, %arg0 : i32, i32, i32
  }
  func.func @transform_2(%arg0: i32) -> (i32, i32) {
    %c0_i32 = arith.constant 0 : i32
    %c0_i32_0 = arith.constant 0 : i32
    return %c0_i32, %arg0 : i32, i32
  }
}

</mosaic_0001>

<bundles_post_ra>
// kernel: tpu_custom_call.1
= control target key start
LH: loop header
LB: loop body
LE: loop exit
PB: predicated region body
PF: predicated region fallthrough
CT: control target
= control target key end

     0   :  { %s3306_s0 = inlined_call_operand.hbm [shape: f32[16,34], index: 0, kind: input, shape index: {}]   ;;  %s3307_s1 = inlined_call_operand.hbm [shape: f32[3,8,128], index: 1, kind: input, shape index: {}]   ;;  %s3308_s2 = inlined_call_operand.hbm [shape: f32[8,128], index: 2, kind: output, shape index: {}]  }
   0x1   :  { %3309 = sst [smem:[#allocation18_spill]] %s3308_s2 }
   0x2   :  { %7 = vsyncpa [#allocation5], 0 }
   0x3   :  { %8 = vsyncpa [#allocation3], 0 }
   0x4   :  { %9 = vsyncpa [#allocation4], 0  ;;  %s14_s11 = sshll.u32 %s3306_s0, 4  ;;  %s25_s14 = sshll.u32 %s3307_s1, 4  ;;  %s15_s11 = int_to_ptr.hbm [resolvable:$true] %s14_s11  ;;  %s26_s14 = int_to_ptr.hbm [resolvable:$true] %s25_s14 }
   0x5   :  { %s1755_s15 = smov [#allocation2]   ;;  %s1756_s16 = smov 128  }
   0x6   :  { %s1757_s17 = smov 8   ;;  %s1758_s18 = smov [#allocation6]  }
   0x7   :  { %20 = dma.hbm_to_smem %s15_s11, 256, %s1755_s15, [#allocation5], %s1756_s16, %s1756_s16, %s1757_s17  }
   0x8   :  { %s27_s19 = sshll.u32 %s1758_s18, 4  ;;  %s28_s19 = int_to_ptr.vmem [resolvable:$true] %s27_s19 }
   0x9   :  { %33 = dma.hbm_to_vmem [thread:$0]  %s26_s14, 384, %s28_s19, [#allocation3], %s1756_s16, %s1756_s16, %s1757_s17  }
   0xa   :  { %1749 = dma.done.wait [#allocation5], 256  }
   0xb   :  { %1750 = vsyncadd [#allocation5], 4294967040 }
   0xc   :  { %1751 = dma.done.wait [#allocation3], 384  }
   0xd   :  { %1752 = vsyncadd [#allocation3], 4294966912 }
   0xe   :  { %42 = sfence }
   0xf   :  { %s50_s0 = sld [smem:[#allocation2]]  ;;  %v1781_v0 = vld [vmem:[#allocation6] sm:$0xff]  ;;  %v1783_v1 = vld [vmem:[#allocation6 + $0x8] sm:$0xff]  ;;  %v1785_v2 = vld [vmem:[#allocation6 + $0x10] sm:$0xff] }
  0x10   :  { %s1348_s20 = sld [smem:[#allocation2 + $0x1]] }
  0x11   :  { %s1349_s21 = sld [smem:[#allocation2 + $0x2]] }
  0x12   :  { %s1350_s22 = sld [smem:[#allocation2 + $0x3]] }
  0x13   :  { %s1351_s1 = sld [smem:[#allocation2 + $0x80]] }
  0x14   :  { %s1352_s23 = sld [smem:[#allocation2 + $0x81]] }
  0x15   :  { %v51_v3 = vstv %s50_s0  ;;  %s1353_s24 = sld [smem:[#allocation2 + $0x82]] }
  0x16   :  { %v52_v4 = vmul.f32 %v51_v3, %v1781_v0  ;;  %v54_v5 = vstv %s1348_s20  ;;  %s1788_s25 = sld [smem:[#allocation2 + $0x83]] }
  0x17   :  { %v55_v6 = vmul.f32 %v54_v5, %v1783_v1  ;;  %v58_v7 = vstv %s1349_s21  ;;  %s1355_s26 = sld [smem:[#allocation2 + $0x100]] }
  0x18   :  { %v59_v8 = vmul.f32 %v58_v7, %v1785_v2  ;;  %s1356_s27 = sld [smem:[#allocation2 + $0x101]]  ;;  %v62_v11 = vstv %s1350_s22 }
  0x19   :  { %v56_v9 = vadd.f32 %v55_v6, %v52_v4  ;;  %v65_v10 = vstv %s1351_s1  ;;  %s1357_s28 = sld [smem:[#allocation2 + $0x102]] }
  0x1a   :  { %v66_v12 = vmul.f32 %v65_v10, %v1781_v0  ;;  %v68_v13 = vstv %s1352_s23  ;;  %s1793_s29 = sld [smem:[#allocation2 + $0x103]] }
  0x1b   :  { %v60_v14 = vadd.f32 %v59_v8, %v56_v9  ;;  %v69_v15 = vmul.f32 %v68_v13, %v1783_v1  ;;  %v72_v16 = vstv %s1353_s24  ;;  %s1359_s30 = sld [smem:[#allocation2 + $0x180]] }
  0x1c   :  { %v73_v17 = vmul.f32 %v72_v16, %v1785_v2  ;;  %s1360_s3 = sld [smem:[#allocation2 + $0x181]]  ;;  %v76_v21 = vstv %s1788_s25 }
  0x1d   :  { %v63_v18 = vadd.f32 %v62_v11, %v60_v14  ;;  %v70_v19 = vadd.f32 %v69_v15, %v66_v12  ;;  %v79_v20 = vstv %s1355_s26  ;;  %s1797_s4 = sld [smem:[#allocation2 + $0x182]] }
  0x1e   :  { %v80_v22 = vmul.f32 %v79_v20, %v1781_v0  ;;  %v82_v23 = vstv %s1356_s27  ;;  %s1801_s5 = sld [smem:[#allocation2 + $0x183]] }
  0x1f   :  { %v74_v24 = vadd.f32 %v73_v17, %v70_v19  ;;  %v83_v25 = vmul.f32 %v82_v23, %v1783_v1  ;;  %v86_v26 = vstv %s1357_s28  ;;  %s1363_s6 = sld [smem:[#allocation2 + $0x200]]  ;;  %v1395_v27 = vmul.f32 -1.442695, %v63_v18 }
  0x20   :  { %v87_v28 = vmul.f32 %v86_v26, %v1785_v2  ;;  %s1364_s7 = sld [smem:[#allocation2 + $0x201]]  ;;  %v90_v32 = vstv %s1793_s29 }
  0x21   :  { %v77_v29 = vadd.f32 %v76_v21, %v74_v24  ;;  %v84_v30 = vadd.f32 %v83_v25, %v80_v22  ;;  %v93_v31 = vstv %s1359_s30  ;;  %s1365_s8 = sld [smem:[#allocation2 + $0x202]]  ;;  %1605 = vpow2.f32 %v1395_v27 }
  0x22   :  { %v94_v33 = vmul.f32 %v93_v31, %v1781_v0  ;;  %v96_v34 = vstv %s1360_s3  ;;  %s1807_s9 = sld [smem:[#allocation2 + $0x203]] }
  0x23   :  { %v88_v35 = vadd.f32 %v87_v28, %v84_v30  ;;  %v97_v36 = vmul.f32 %v96_v34, %v1783_v1  ;;  %v100_v37 = vstv %s1797_s4  ;;  %s1367_s10 = sld [smem:[#allocation2 + $0x280]]  ;;  %v1396_v38 = vmul.f32 -1.442695, %v77_v29 }
  0x24   :  { %s1368_s11 = sld [smem:[#allocation2 + $0x281]]  ;;  %v101_v42 = vmul.f32 %v100_v37, %v1785_v2  ;;  %v104_v57 = vstv %s1801_s5 }
  0x25   :  { %v91_v39 = vadd.f32 %v90_v32, %v88_v35  ;;  %v107_v40 = vstv %s1363_s6  ;;  %s1369_s12 = sld [smem:[#allocation2 + $0x282]]  ;;  %1607 = vpow2.f32 %v1396_v38  ;;  %v98_v41 = vadd.f32 %v97_v36, %v94_v33 }
  0x26   :  { %v108_v43 = vmul.f32 %v107_v40, %v1781_v0  ;;  %v110_v44 = vstv %s1364_s7  ;;  %s1813_s13 = sld [smem:[#allocation2 + $0x283]] }
  0x27   :  { %v1606_v45 = vpop.eup %1605  ;;  %v111_v46 = vmul.f32 %v110_v44, %v1783_v1  ;;  %v114_v47 = vstv %s1365_s8  ;;  %s1371_s14 = sld [smem:[#allocation2 + $0x300]]  ;;  %v1397_v48 = vmul.f32 -1.442695, %v91_v39  ;;  %v102_v53 = vadd.f32 %v101_v42, %v98_v41 }
  0x28   :  { %v115_v49 = vmul.f32 %v114_v47, %v1785_v2  ;;  %s1372_s15 = sld [smem:[#allocation2 + $0x301]]  ;;  %v1817_v50 = vadd.f32 1.0, %v1606_v45  ;;  %v118_v3 = vstv %s1807_s9 }
  0x29   :  { %v112_v51 = vadd.f32 %v111_v46, %v108_v43  ;;  %v121_v52 = vstv %s1367_s10  ;;  %s1819_s16 = sld [smem:[#allocation2 + $0x302]]  ;;  %v1838_v6 = vadd.f32 %v104_v57, %v102_v53 }
  0x2a   :  { %v122_v54 = vmul.f32 %v121_v52, %v1781_v0  ;;  %v124_v55 = vstv %s1368_s11  ;;  %s1822_s17 = sld [smem:[#allocation2 + $0x303]]  ;;  %1609 = vrcp.f32 %v1817_v50  ;;  %v233_v62 = vand.u32 2147483648, %v1817_v50 }
  0x2b   :  { %v1608_v56 = vpop.eup %1607  ;;  %v125_v58 = vmul.f32 %v124_v55, %v1783_v1  ;;  %v128_v59 = vstv %s1369_s12  ;;  %s1827_s18 = sld [smem:[#allocation2 + $0x380]]  ;;  %1611 = vpow2.f32 %v1397_v48  ;;  %v116_v60 = vadd.f32 %v115_v49, %v112_v51 }
  0x2c   :  { %v129_v61 = vmul.f32 %v128_v59, %v1785_v2  ;;  %s1830_s19 = sld [smem:[#allocation2 + $0x381]]  ;;  %v1833_v63 = vadd.f32 1.0, %v1608_v56  ;;  %vm227_vm0 = vweird.f32 %v1817_v50  ;;  %v231_v11 = vand.u32 2147483647, %v1817_v50 }
  0x2d   :  { %v126_v4 = vadd.f32 %v125_v58, %v122_v54  ;;  %v135_v5 = vstv %s1371_s14  ;;  %s1836_s0 = sld [smem:[#allocation2 + $0x382]]  ;;  %v1852_v13 = vadd.f32 %v118_v3, %v116_v60  ;;  %v132_v15 = vstv %s1813_s13 }
  0x2e   :  { %v136_v7 = vmul.f32 %v135_v5, %v1781_v0  ;;  %v138_v8 = vstv %s1372_s15  ;;  %s1841_s20 = sld [smem:[#allocation2 + $0x383]]  ;;  %1613 = vrcp.f32 %v1833_v63  ;;  %v1857_v16 = vor.u32 1.1754944e-38, %v233_v62 }
  0x2f   :  { %v139_v9 = vmul.f32 %v138_v8, %v1783_v1  ;;  %v142_v10 = vstv %s1819_s16  ;;  %s1846_s21 = sld [smem:[#allocation2 + $0x400]]  ;;  %v130_v14 = vadd.f32 %v129_v61, %v126_v4  ;;  %vm246_vm1 = vweird.f32 %v1833_v63 }
  0x30   :  { %v1850_v12 = vpop.eup %1609  ;;  %s1855_s22 = sld [smem:[#allocation2 + $0x401]]  ;;  %v143_v19 = vmul.f32 %v142_v10, %v1785_v2  ;;  %v146_v22 = vstv %s1822_s17  ;;  %v250_v28 = vand.u32 2147483647, %v1833_v63  ;;  %v252_v32 = vand.u32 2147483648, %v1833_v63 }
  0x31   :  { %v1612_v17 = vpop.eup %1611  ;;  %v140_v18 = vadd.f32 %v139_v9, %v136_v7  ;;  %v149_v20 = vstv %s1827_s18  ;;  %s1861_s1 = sld [smem:[#allocation2 + $0x402]]  ;;  %v223_v21 = vmul.f32 %v1850_v12, %v1817_v50  ;;  %v1878_v30 = vadd.f32 %v132_v15, %v130_v14 }
  0x32   :  { %v150_v23 = vmul.f32 %v149_v20, %v1781_v0  ;;  %v152_v24 = vstv %s1830_s19  ;;  %s1868_s23 = sld [smem:[#allocation2 + $0x403]]  ;;  %v1884_v33 = vadd.f32 1.0, %v1612_v17  ;;  %vm228_vm2 = vweird.f32 %v1850_v12 }
  0x33   :  { %v153_v25 = vmul.f32 %v152_v24, %v1783_v1  ;;  %v156_v26 = vstv %s1836_s0  ;;  %s1873_s24 = sld [smem:[#allocation2 + $0x480]]  ;;  %v224_v27 = vsub.f32 1.0, %v223_v21  ;;  %v144_v34 = vadd.f32 %v143_v19, %v140_v18  ;;  %vm1918_vm3 = vmor %vm227_vm0, %vm228_vm2 }
  0x34   :  { %v1876_v29 = vpop.eup %1613  ;;  %v157_v31 = vmul.f32 %v156_v26, %v1785_v2  ;;  %s1881_s25 = sld [smem:[#allocation2 + $0x481]]  ;;  %v160_v42 = vstv %s1841_s20  ;;  %1615 = vrcp.f32 %v1884_v33  ;;  %v1922_v53 = vor.u32 1.1754944e-38, %v252_v32 }
  0x35   :  { %v154_v35 = vadd.f32 %v153_v25, %v150_v23  ;;  %v163_v36 = vstv %s1846_s21  ;;  %s1887_s26 = sld [smem:[#allocation2 + $0x482]]  ;;  %v225_v37 = vmul.f32 %v1850_v12, %v224_v27  ;;  %v242_v40 = vmul.f32 %v1876_v29, %v1833_v63 }
  0x36   :  { %v164_v38 = vmul.f32 %v163_v36, %v1781_v0  ;;  %v166_v39 = vstv %s1855_s22  ;;  %s1892_s27 = sld [smem:[#allocation2 + $0x483]]  ;;  %v1909_v48 = vadd.f32 %v146_v22, %v144_v34  ;;  %vm247_vm4 = vweird.f32 %v1876_v29 }
  0x37   :  { %v158_v41 = vadd.f32 %v157_v31, %v154_v35  ;;  %v167_v43 = vmul.f32 %v166_v39, %v1783_v1  ;;  %v170_v44 = vstv %s1861_s1  ;;  %s1900_s28 = sld [smem:[#allocation2 + $0x500]]  ;;  %v1906_v46 = vadd.f32 %v1850_v12, %v225_v37  ;;  %vm1957_vm6 = vmor %vm246_vm1, %vm247_vm4 }
  0x38   :  { %v171_v45 = vmul.f32 %v170_v44, %v1785_v2  ;;  %s1903_s29 = sld [smem:[#allocation2 + $0x501]]  ;;  %v243_v47 = vsub.f32 1.0, %v242_v40  ;;  %v174_v58 = vstv %s1868_s23  ;;  %vm1944_vm5 = vcmp.eq.f32.partialorder %v231_v11, 8.507059e+37 }
  0x39   :  { %v168_v49 = vadd.f32 %v167_v43, %v164_v38  ;;  %v177_v51 = vstv %s1873_s24  ;;  %s1912_s30 = sld [smem:[#allocation2 + $0x502]]  ;;  %v161_v61 = vadd.f32 %v160_v42, %v158_v41  ;;  %v230_v3 = vsel %vm1918_vm3, %v1850_v12, %v1906_v46 }
  0x3a   :  { %v178_v54 = vmul.f32 %v177_v51, %v1781_v0  ;;  %v180_v55 = vstv %s1881_s25  ;;  %s1926_s3 = sld [smem:[#allocation2 + $0x503]]  ;;  %v244_v56 = vmul.f32 %v1876_v29, %v243_v47  ;;  %vm1961_vm7 = vcmp.eq.f32.partialorder %v250_v28, 8.507059e+37  ;;  %v1966_v11 = vpop.eup %1615 }
  0x3b   :  { %v172_v57 = vadd.f32 %v171_v45, %v168_v49  ;;  %v181_v59 = vmul.f32 %v180_v55, %v1783_v1  ;;  %v184_v60 = vstv %s1887_s26  ;;  %s1933_s4 = sld [smem:[#allocation2 + $0x580]]  ;;  %vm265_vm8 = vweird.f32 %v1884_v33 }
  0x3c   :  { %v185_v62 = vmul.f32 %v184_v60, %v1785_v2  ;;  %s1936_s5 = sld [smem:[#allocation2 + $0x581]]  ;;  %v245_v5 = vadd.f32 %v1876_v29, %v244_v56  ;;  %v188_v8 = vstv %s1892_s27  ;;  %v269_v63 = vand.u32 2147483647, %v1884_v33 }
  0x3d   :  { %v182_v7 = vadd.f32 %v181_v59, %v178_v54  ;;  %v191_v9 = vstv %s1900_s28  ;;  %s1951_s6 = sld [smem:[#allocation2 + $0x582]]  ;;  %v175_v12 = vadd.f32 %v174_v58, %v172_v57  ;;  %v271_v20 = vand.u32 2147483648, %v1884_v33 }
  0x3e   :  { %v192_v14 = vmul.f32 %v191_v9, %v1781_v0  ;;  %v194_v15 = vstv %s1903_s29  ;;  %s1970_s7 = sld [smem:[#allocation2 + $0x583]]  ;;  %v249_v23 = vsel %vm1957_vm6, %v1876_v29, %v245_v5  ;;  %v261_v24 = vmul.f32 %v1966_v11, %v1884_v33 }
  0x3f   :  { %v186_v17 = vadd.f32 %v185_v62, %v182_v7  ;;  %v195_v18 = vmul.f32 %v194_v15, %v1783_v1  ;;  %v198_v19 = vstv %s1912_s30  ;;  %s1983_s8 = sld [smem:[#allocation2 + $0x4]]  ;;  %vm266_vm9 = vweird.f32 %v1966_v11 }
  0x40   :  { %v199_v21 = vmul.f32 %v198_v19, %v1785_v2  ;;  %v202_v22 = vstv %s1926_s3  ;;  %s1987_s9 = sld [smem:[#allocation2 + $0x5]]  ;;  %v262_v32 = vsub.f32 1.0, %v261_v24  ;;  %v1398_v34 = vmul.f32 -1.442695, %v1838_v6  ;;  %vm2016_vm10 = vmor %vm265_vm8, %vm266_vm9 }
  0x41   :  { %v189_v25 = vadd.f32 %v188_v8, %v186_v17  ;;  %v196_v26 = vadd.f32 %v195_v18, %v192_v14  ;;  %v205_v27 = vstv %s1933_s4  ;;  %v1399_v37 = vmul.f32 -1.442695, %v1852_v13  ;;  %s1995_s10 = sld [smem:[#allocation2 + $0x6]] }
  0x42   :  { %v206_v28 = vmul.f32 %v205_v27, %v1781_v0  ;;  %v208_v31 = vstv %s1936_s5  ;;  %v263_v40 = vmul.f32 %v1966_v11, %v262_v32  ;;  %1617 = vpow2.f32 %v1398_v34  ;;  %s2000_s11 = sld [smem:[#allocation2 + $0x7]] }
  0x43   :  { %v200_v29 = vadd.f32 %v199_v21, %v196_v26  ;;  %v209_v35 = vmul.f32 %v208_v31, %v1783_v1  ;;  %v212_v36 = vstv %s1951_s6  ;;  %1619 = vpow2.f32 %v1399_v37  ;;  %s2003_s12 = sld [smem:[#allocation2 + $0x8]] }
  0x44   :  { %v213_v38 = vmul.f32 %v212_v36, %v1785_v2  ;;  %v216_v39 = vstv %s1970_s7  ;;  %v1400_v6 = vmul.f32 -1.442695, %v1878_v30  ;;  %v264_v1 = vadd.f32 %v1966_v11, %v263_v40  ;;  %s2020_s13 = sld [smem:[#allocation2 + $0x9]] }
  0x45   :  { %v203_v0 = vadd.f32 %v202_v22, %v200_v29  ;;  %v210_v41 = vadd.f32 %v209_v35, %v206_v28  ;;  %v1401_v13 = vmul.f32 -1.442695, %v1909_v48  ;;  %v1402_v42 = vmul.f32 -1.442695, %v161_v61  ;;  %s2028_s14 = sld [smem:[#allocation2 + $0xa]] }
  0x46   :  { %v1403_v2 = vmul.f32 -1.442695, %v175_v12  ;;  %v2010_v44 = vsel %vm1944_vm5, %v1857_v16, %v230_v3  ;;  %1621 = vpow2.f32 %v1400_v6  ;;  %v1404_v45 = vmul.f32 -1.442695, %v189_v25  ;;  %s2031_s15 = sld [smem:[#allocation2 + $0xb]] }
  0x47   :  { %v214_v43 = vadd.f32 %v213_v38, %v210_v41  ;;  %v2025_v46 = vsel %vm1961_vm7, %v1922_v53, %v249_v23  ;;  %1623 = vpow2.f32 %v1401_v13  ;;  %v1405_v16 = vmul.f32 -1.442695, %v203_v0  ;;  %s2036_s16 = sld [smem:[#allocation2 + $0xc]] }
  0x48   :  { %v447_v47 = vstv %s1983_s8  ;;  %v272_v33 = vor.u32 1.1754944e-38, %v271_v20  ;;  %1625 = vpow2.f32 %v1402_v42  ;;  %v450_v49 = vstv %s1987_s9  ;;  %v1618_v51 = vpop.eup %1617  ;;  %s2041_s17 = sld [smem:[#allocation2 + $0xd]] }
  0x49   :  { %v217_v48 = vadd.f32 %v216_v39, %v214_v43  ;;  %v268_v52 = vsel %vm2016_vm10, %v1966_v11, %v264_v1  ;;  %vm270_vm11 = vcmp.eq.f32.partialorder %v269_v63, 8.507059e+37  ;;  %1627 = vpow2.f32 %v1403_v2  ;;  %v1620_v53 = vpop.eup %1619  ;;  %s2046_s18 = sld [smem:[#allocation2 + $0xe]] }
  0x4a   :  { %v2038_v54 = vadd.f32 1.0, %v1618_v51  ;;  %1629 = vpow2.f32 %v1404_v45  ;;  %v448_v55 = vmul.f32 %v447_v47, %v2010_v44  ;;  %v2043_v56 = vadd.f32 1.0, %v1620_v53  ;;  %s2052_s19 = sld [smem:[#allocation2 + $0xf]] }
  0x4b   :  { %1631 = vpow2.f32 %v1405_v16  ;;  %v1406_v57 = vmul.f32 -1.442695, %v217_v48  ;;  %v451_v58 = vmul.f32 %v450_v49, %v2025_v46  ;;  %v2048_v60 = vsel %vm270_vm11, %v272_v33, %v268_v52  ;;  %s2057_s0 = sld [smem:[#allocation2 + $0x10]] }
  0x4c   :  { %v1622_v59 = vpop.eup %1621  ;;  %1633 = vrcp.f32 %v2038_v54  ;;  %v454_v61 = vstv %s1995_s10  ;;  %v288_v3 = vand.u32 2147483647, %v2038_v54  ;;  %v458_v4 = vstv %s2000_s11  ;;  %s2065_s20 = sld [smem:[#allocation2 + $0x84]] }
  0x4d   :  { %v1624_v62 = vpop.eup %1623  ;;  %1635 = vrcp.f32 %v2043_v56  ;;  %v290_v7 = vand.u32 2147483648, %v2038_v54  ;;  %v309_v8 = vand.u32 2147483648, %v2043_v56  ;;  %v2061_v9 = vadd.f32 1.0, %v1622_v59  ;;  %s2074_s21 = sld [smem:[#allocation2 + $0x85]] }
  0x4e   :  { %v1626_v5 = vpop.eup %1625  ;;  %v2063_v10 = vadd.f32 1.0, %v1624_v62  ;;  %1637 = vpow2.f32 %v1406_v57  ;;  %v2069_v12 = vadd.f32 %v451_v58, %v448_v55  ;;  %v2072_v14 = vmul.f32 %v454_v61, %v2048_v60  ;;  %s2080_s22 = sld [smem:[#allocation2 + $0x86]] }
  0x4f   :  { %v1628_v50 = vpop.eup %1627  ;;  %v2067_v11 = vadd.f32 1.0, %v1626_v5  ;;  %vm284_vm12 = vweird.f32 %v2038_v54  ;;  %1639 = vrcp.f32 %v2061_v9  ;;  %v328_v63 = vand.u32 2147483648, %v2061_v9  ;;  %s2086_s1 = sld [smem:[#allocation2 + $0x87]] }
  0x50   :  { %v1630_v15 = vpop.eup %1629  ;;  %v462_v17 = vstv %s2003_s12  ;;  %vm303_vm13 = vweird.f32 %v2043_v56  ;;  %v307_v19 = vand.u32 2147483647, %v2043_v56  ;;  %1641 = vrcp.f32 %v2063_v10  ;;  %s2100_s23 = sld [smem:[#allocation2 + $0x88]] }
  0x51   :  { %v1632_v18 = vpop.eup %1631  ;;  %v347_v20 = vand.u32 2147483648, %v2063_v10  ;;  %vm2090_vm14 = vcmp.eq.f32.partialorder %v288_v3, 8.507059e+37  ;;  %v2094_v23 = vor.u32 1.1754944e-38, %v290_v7  ;;  %v2096_v24 = vor.u32 1.1754944e-38, %v309_v8  ;;  %s2109_s24 = sld [smem:[#allocation2 + $0x89]] }
  0x52   :  { %v2088_v21 = vpop.eup %1633  ;;  %vm322_vm15 = vweird.f32 %v2061_v9  ;;  %1643 = vrcp.f32 %v2067_v11  ;;  %v326_v27 = vand.u32 2147483647, %v2061_v9  ;;  %vm341_vm0 = vweird.f32 %v2063_v10  ;;  %s2117_s25 = sld [smem:[#allocation2 + $0x8a]] }
  0x53   :  { %v2102_v25 = vpop.eup %1635  ;;  %v280_v26 = vmul.f32 %v2088_v21, %v2038_v54  ;;  %v345_v28 = vand.u32 2147483647, %v2063_v10  ;;  %v2113_v32 = vor.u32 1.1754944e-38, %v328_v63  ;;  %vm360_vm1 = vweird.f32 %v2067_v11  ;;  %s2124_s26 = sld [smem:[#allocation2 + $0x8b]] }
  0x54   :  { %v299_v31 = vmul.f32 %v2102_v25, %v2043_v56  ;;  %v364_v34 = vand.u32 2147483647, %v2067_v11  ;;  %v1638_v29 = vpop.eup %1637  ;;  %vm285_vm2 = vweird.f32 %v2088_v21  ;;  %v2120_v36 = vor.u32 1.1754944e-38, %v347_v20  ;;  %s2136_s27 = sld [smem:[#allocation2 + $0x8c]] }
  0x55   :  { %v281_v35 = vsub.f32 1.0, %v280_v26  ;;  %v2122_v37 = vadd.f32 1.0, %v1628_v50  ;;  %v2126_v38 = vpop.eup %1639  ;;  %vm304_vm3 = vweird.f32 %v2102_v25  ;;  %vm2129_vm4 = vcmp.eq.f32.partialorder %v307_v19, 8.507059e+37  ;;  %s2154_s28 = sld [smem:[#allocation2 + $0x8d]]  ;;  %vm2162_vm7 = vmor %vm284_vm12, %vm285_vm2 }
  0x56   :  { %v300_v39 = vsub.f32 1.0, %v299_v31  ;;  %v366_v0 = vand.u32 2147483648, %v2067_v11  ;;  %v2134_v41 = vadd.f32 1.0, %v1630_v15  ;;  %v2138_v6 = vpop.eup %1641  ;;  %v318_v13 = vmul.f32 %v2126_v38, %v2061_v9  ;;  %s2174_s29 = sld [smem:[#allocation2 + $0x8e]]  ;;  %vm2194_vm12 = vmor %vm303_vm13, %vm304_vm3 }
  0x57   :  { %v282_v1 = vmul.f32 %v2088_v21, %v281_v35  ;;  %vm2143_vm5 = vcmp.eq.f32.partialorder %v326_v27, 8.507059e+37  ;;  %vm2147_vm6 = vcmp.eq.f32.partialorder %v345_v28, 8.507059e+37  ;;  %1645 = vrcp.f32 %v2122_v37  ;;  %s2180_s30 = sld [smem:[#allocation2 + $0x8f]] }
  0x58   :  { %v2152_v43 = vadd.f32 1.0, %v1632_v18  ;;  %v2156_v30 = vpop.eup %1643  ;;  %v301_v16 = vmul.f32 %v2102_v25, %v300_v39  ;;  %vm323_vm8 = vweird.f32 %v2126_v38  ;;  %v337_v47 = vmul.f32 %v2138_v6, %v2063_v10  ;;  %s2185_s3 = sld [smem:[#allocation2 + $0x90]] }
  0x59   :  { %vm2170_vm9 = vcmp.eq.f32.partialorder %v364_v34, 8.507059e+37  ;;  %v283_v33 = vadd.f32 %v2088_v21, %v282_v1  ;;  %v319_v49 = vsub.f32 1.0, %v318_v13  ;;  %vm342_vm10 = vweird.f32 %v2138_v6  ;;  %s2200_s4 = sld [smem:[#allocation2 + $0x104]]  ;;  %vm2206_vm2 = vmor %vm322_vm15, %vm323_vm8 }
  0x5a   :  { %v356_v51 = vmul.f32 %v2156_v30, %v2067_v11  ;;  %v302_v52 = vadd.f32 %v2102_v25, %v301_v16  ;;  %v338_v53 = vsub.f32 1.0, %v337_v47  ;;  %vm361_vm11 = vweird.f32 %v2156_v30  ;;  %s2214_s5 = sld [smem:[#allocation2 + $0x105]]  ;;  %vm2226_vm15 = vmor %vm341_vm0, %vm342_vm10 }
  0x5b   :  { %v383_v54 = vand.u32 2147483647, %v2122_v37  ;;  %v287_v55 = vsel %vm2162_vm7, %v2088_v21, %v283_v33  ;;  %v320_v58 = vmul.f32 %v2126_v38, %v319_v49  ;;  %1647 = vrcp.f32 %v2134_v41  ;;  %s2232_s6 = sld [smem:[#allocation2 + $0x106]] }
  0x5c   :  { %v357_v59 = vsub.f32 1.0, %v356_v51  ;;  %v339_v56 = vmul.f32 %v2138_v6, %v338_v53  ;;  %v367_v62 = vor.u32 1.1754944e-38, %v366_v0  ;;  %vm379_vm13 = vweird.f32 %v2122_v37  ;;  %s2251_s7 = sld [smem:[#allocation2 + $0x107]] }
  0x5d   :  { %3332 = sst [smem:[#allocation11_spill]] %s2180_s30  ;;  %v2212_v3 = vadd.f32 1.0, %v1638_v29  ;;  %v1646_v5 = vpop.eup %1645  ;;  %v2219_v7 = vsel %vm2090_vm14, %v2094_v23, %v287_v55  ;;  %v321_v8 = vadd.f32 %v2126_v38, %v320_v58  ;;  %v385_v15 = vand.u32 2147483648, %v2122_v37  ;;  %vm2242_vm14 = vmor %vm360_vm1, %vm361_vm11 }
  0x5e   :  { %3333 = sst [smem:[#allocation12_spill]] %s2185_s3  ;;  %v358_v50 = vmul.f32 %v2156_v30, %v357_v59  ;;  %v306_v63 = vsel %vm2194_vm12, %v2102_v25, %v302_v52  ;;  %v340_v18 = vadd.f32 %v2138_v6, %v339_v56  ;;  %v375_v19 = vmul.f32 %v1646_v5, %v2122_v37 }
  0x5f   :  { %vm2247_vm0 = vcmp.eq.f32.partialorder %v383_v54, 8.507059e+37  ;;  %v325_v21 = vsel %vm2206_vm2, %v2126_v38, %v321_v8  ;;  %v402_v11 = vand.u32 2147483647, %v2134_v41  ;;  %v404_v23 = vand.u32 2147483648, %v2134_v41  ;;  %s2259_s8 = sld [smem:[#allocation2 + $0x108]] }
  0x60   :  { %v359_v22 = vadd.f32 %v2156_v30, %v358_v50  ;;  %v344_v25 = vsel %vm2226_vm15, %v2138_v6, %v340_v18  ;;  %v376_v26 = vsub.f32 1.0, %v375_v19  ;;  %vm380_vm1 = vweird.f32 %v1646_v5  ;;  %s2265_s9 = sld [smem:[#allocation2 + $0x109]] }
  0x61   :  { %1649 = vrcp.f32 %v2152_v43  ;;  %v1648_v27 = vpop.eup %1647  ;;  %v2270_v28 = vsel %vm2129_vm4, %v2096_v24, %v306_v63  ;;  %v386_v34 = vor.u32 1.1754944e-38, %v385_v15  ;;  %vm398_vm3 = vweird.f32 %v2134_v41  ;;  %s2276_s10 = sld [smem:[#allocation2 + $0x10a]]  ;;  %vm2298_vm4 = vmor %vm379_vm13, %vm380_vm1 }
  0x62   :  { %v363_v31 = vsel %vm2242_vm14, %v2156_v30, %v359_v22  ;;  %v2281_v29 = vsel %vm2143_vm5, %v2113_v32, %v325_v21  ;;  %v2286_v35 = vsel %vm2147_vm6, %v2120_v36, %v344_v25  ;;  %v377_v24 = vmul.f32 %v1646_v5, %v376_v26  ;;  %s2289_s2 = sld [smem:[#allocation2 + $0x10b]] }
  0x63   :  { %v394_v38 = vmul.f32 %v1648_v27, %v2134_v41  ;;  %v2293_v39 = vsel %vm2170_vm9, %v367_v62, %v363_v31  ;;  %vm2302_vm5 = vcmp.eq.f32.partialorder %v402_v11, 8.507059e+37  ;;  %v405_v36 = vor.u32 1.1754944e-38, %v404_v23  ;;  %s2307_s3 = sld [smem:[#allocation2 + $0x10c]] }
  0x64   :  { %1651 = vrcp.f32 %v2212_v3  ;;  %v378_v0 = vadd.f32 %v1646_v5, %v377_v24  ;;  %vm399_vm6 = vweird.f32 %v1648_v27  ;;  %vm417_vm7 = vweird.f32 %v2152_v43  ;;  %s2310_s30 = sld [smem:[#allocation2 + $0x10d]] }
  0x65   :  { %v395_v6 = vsub.f32 1.0, %v394_v38  ;;  %v421_v37 = vand.u32 2147483647, %v2152_v43  ;;  %v423_v1 = vand.u32 2147483648, %v2152_v43  ;;  %vm436_vm8 = vweird.f32 %v2212_v3  ;;  %vm2334_vm9 = vmor %vm398_vm3, %vm399_vm6  ;;  %s2340_s11 = sld [smem:[#allocation2 + $0x110]] }
  0x66   :  { %v456_v13 = vadd.f32 %v2072_v14, %v2069_v12  ;;  %v382_v2 = vsel %vm2298_vm4, %v1646_v5, %v378_v0  ;;  %v440_v45 = vand.u32 2147483647, %v2212_v3  ;;  %v459_v16 = vmul.f32 %v458_v4, %v2219_v7  ;;  %s2360_s12 = sld [smem:[#allocation2 + $0x186]] }
  0x67   :  { %v1650_v42 = vpop.eup %1649  ;;  %v396_v30 = vmul.f32 %v1648_v27, %v395_v6  ;;  %v2329_v12 = vsel %vm2247_vm0, %v386_v34, %v382_v2  ;;  %v442_v4 = vand.u32 2147483648, %v2212_v3  ;;  %v463_v49 = vmul.f32 %v462_v17, %v2270_v28 }
  0x68   :  { %3344 = sst [smem:[#allocation13_spill]] %s2289_s2  ;;  %v413_v47 = vmul.f32 %v1650_v42, %v2152_v43  ;;  %vm418_vm10 = vweird.f32 %v1650_v42  ;;  %v460_v33 = vadd.f32 %v459_v16, %v456_v13  ;;  %v466_v51 = vstv %s2020_s13 }
  0x69   :  { %s2317_s2 = sld [smem:[#allocation2 + $0x10e]]  ;;  %v397_v48 = vadd.f32 %v1648_v27, %v396_v30  ;;  %v467_v53 = vmul.f32 %v466_v51, %v2281_v29  ;;  %v470_v54 = vstv %s2028_s14  ;;  %v474_v55 = vstv %s2031_s15  ;;  %vm2373_vm12 = vmor %vm417_vm7, %vm418_vm10 }
  0x6a   :  { %3349 = sst [smem:[#allocation14_spill]] %s2310_s30  ;;  %v2348_v41 = vpop.eup %1651  ;;  %v414_v52 = vsub.f32 1.0, %v413_v47  ;;  %v464_v58 = vadd.f32 %v463_v49, %v460_v33  ;;  %v471_v56 = vmul.f32 %v470_v54, %v2286_v35  ;;  %v475_v62 = vmul.f32 %v474_v55, %v2293_v39 }
  0x6b   :  { %s2325_s30 = sld [smem:[#allocation2 + $0x10f]]  ;;  %v401_v57 = vsel %vm2334_vm9, %v1648_v27, %v397_v48  ;;  %v432_v17 = vmul.f32 %v2348_v41, %v2212_v3  ;;  %vm437_vm11 = vweird.f32 %v2348_v41  ;;  %v478_v50 = vstv %s2036_s16 }
  0x6c   :  { %3354 = sst [smem:[#allocation17_spill]] %s2340_s11  ;;  %v2364_v59 = vsel %vm2302_vm5, %v405_v36, %v401_v57  ;;  %v415_v61 = vmul.f32 %v1650_v42, %v414_v52  ;;  %v468_v9 = vadd.f32 %v467_v53, %v464_v58  ;;  %v482_v15 = vstv %s2041_s17  ;;  %vm2398_vm13 = vmor %vm436_vm8, %vm437_vm11 }
  0x6d   :  { %s2368_s13 = sld [smem:[#allocation2 + $0x187]]  ;;  %v433_v8 = vsub.f32 1.0, %v432_v17  ;;  %vm2381_vm2 = vcmp.eq.f32.partialorder %v421_v37, 8.507059e+37  ;;  %v424_v10 = vor.u32 1.1754944e-38, %v423_v1  ;;  %v443_v43 = vor.u32 1.1754944e-38, %v442_v4 }
  0x6e   :  { %s2379_s14 = sld [smem:[#allocation2 + $0x188]]  ;;  %v416_v63 = vadd.f32 %v1650_v42, %v415_v61  ;;  %v472_v20 = vadd.f32 %v471_v56, %v468_v9  ;;  %v479_v21 = vmul.f32 %v478_v50, %v2329_v12  ;;  %v483_v22 = vmul.f32 %v482_v15, %v2364_v59 }
  0x6f   :  { %3350 = sst [smem:[#allocation15_spill]] %s2317_s2  ;;  %v434_v19 = vmul.f32 %v2348_v41, %v433_v8  ;;  %v497_v25 = vstv %s2065_s20  ;;  %v500_v26 = vstv %s2074_s21  ;;  %v504_v27 = vstv %s2080_s22 }
  0x70   :  { %s2353_s2 = sld [smem:[#allocation2 + $0x185]]  ;;  %v420_v11 = vsel %vm2373_vm12, %v1650_v42, %v416_v63  ;;  %v476_v34 = vadd.f32 %v475_v62, %v472_v20  ;;  %v486_v24 = vstv %s2046_s18  ;;  %v498_v38 = vmul.f32 %v497_v25, %v2010_v44 }
  0x71   :  { %3351 = sst [smem:[#allocation16_spill]] %s2325_s30  ;;  %v435_v31 = vadd.f32 %v2348_v41, %v434_v19  ;;  %v2414_v32 = vsel %vm2381_vm2, %v424_v10, %v420_v11  ;;  %v501_v40 = vmul.f32 %v500_v26, %v2025_v46  ;;  %v505_v36 = vmul.f32 %v504_v27, %v2048_v60 }
  0x72   :  { %s2346_s30 = sld [smem:[#allocation2 + $0x184]]  ;;  %v508_v0 = vstv %s2086_s1  ;;  %vm441_vm15 = vcmp.eq.f32.partialorder %v440_v45, 8.507059e+37  ;;  %v480_v37 = vadd.f32 %v479_v21, %v476_v34  ;;  %v512_v1 = vstv %s2100_s23 }
  0x73   :  { %s2385_s15 = sld [smem:[#allocation2 + $0x189]]  ;;  %v439_v6 = vsel %vm2398_vm13, %v2348_v41, %v435_v31  ;;  %v502_v13 = vadd.f32 %v501_v40, %v498_v38  ;;  %v509_v42 = vmul.f32 %v508_v0, %v2219_v7  ;;  %v487_v30 = vmul.f32 %v486_v24, %v2414_v32 }
  0x74   :  { %s2390_s16 = sld [smem:[#allocation2 + $0x18a]]  ;;  %v484_v2 = vadd.f32 %v483_v22, %v480_v37  ;;  %v490_v16 = vstv %s2052_s19  ;;  %v516_v14 = vstv %s2109_s24  ;;  %v2437_v3 = vsel %vm441_vm15, %v443_v43, %v439_v6 }
  0x75   :  { %s2405_s17 = sld [smem:[#allocation2 + $0x18b]]  ;;  %v506_v45 = vadd.f32 %v505_v36, %v502_v13  ;;  %v513_v47 = vmul.f32 %v512_v1, %v2270_v28  ;;  %v520_v4 = vstv %s2117_s25  ;;  %v517_v33 = vmul.f32 %v516_v14, %v2281_v29 }
  0x76   :  { %s2410_s11 = sld [smem:[#allocation2 + $0x18c]]  ;;  %v524_v49 = vstv %s2124_s26  ;;  %v488_v51 = vadd.f32 %v487_v30, %v484_v2  ;;  %v491_v41 = vmul.f32 %v490_v16, %v2437_v3  ;;  %v521_v52 = vmul.f32 %v520_v4, %v2286_v35 }
  0x77   :  { %s2419_s20 = sld [smem:[#allocation2 + $0x18d]]  ;;  %v510_v48 = vadd.f32 %v509_v42, %v506_v45  ;;  %v528_v53 = vstv %s2136_s27  ;;  %v547_v55 = vstv %s2200_s4  ;;  %v550_v57 = vstv %s2214_s5 }
  0x78   :  { %s2427_s18 = sld [smem:[#allocation2 + $0x18e]]  ;;  %v554_v17 = vstv %s2232_s6  ;;  %v525_v58 = vmul.f32 %v524_v49, %v2293_v39  ;;  %v548_v61 = vmul.f32 %v547_v55, %v2010_v44  ;;  %v551_v56 = vmul.f32 %v550_v57, %v2025_v46 }
  0x79   :  { %s2430_s21 = sld [smem:[#allocation2 + $0x18f]]  ;;  %v514_v54 = vadd.f32 %v513_v47, %v510_v48  ;;  %v555_v62 = vmul.f32 %v554_v17, %v2048_v60  ;;  %v532_v8 = vstv %s2154_s28  ;;  %v558_v9 = vstv %s2251_s7 }
  0x7a   :  { %s2435_s22 = sld [smem:[#allocation2 + $0x190]]  ;;  %v562_v50 = vstv %s2259_s8  ;;  %v494_v15 = vstv %s2057_s0  ;;  %v536_v63 = vstv %s2174_s29  ;;  %v552_v18 = vadd.f32 %v551_v56, %v548_v61 }
  0x7b   :  { %s2441_s1 = sld [smem:[#allocation2 + $0x204]]  ;;  %v518_v5 = vadd.f32 %v517_v33, %v514_v54  ;;  %v559_v10 = vmul.f32 %v558_v9, %v2219_v7  ;;  %v529_v19 = vmul.f32 %v528_v53, %v2329_v12  ;;  %v566_v20 = vstv %s2265_s9 }
  0x7c   :  { %s2443_s23 = sld [smem:[#allocation2 + $0x205]]  ;;  %v570_v21 = vstv %s2276_s10  ;;  %v533_v22 = vmul.f32 %v532_v8, %v2364_v59  ;;  %v556_v11 = vadd.f32 %v555_v62, %v552_v18  ;;  %v563_v23 = vmul.f32 %v562_v50, %v2270_v28 }
  0x7d   :  { %s2447_s19 = sld [smem:[#allocation2 + $0x206]]  ;;  %v522_v43 = vadd.f32 %v521_v52, %v518_v5  ;;  %v492_v26 = vadd.f32 %v491_v41, %v488_v51  ;;  %v537_v31 = vmul.f32 %v536_v63, %v2414_v32  ;;  %v567_v38 = vmul.f32 %v566_v20, %v2281_v29 }
  0x7e   :  { %s2452_s24 = sld [smem:[#allocation2 + $0x207]]  ;;  %v560_v24 = vadd.f32 %v559_v10, %v556_v11  ;;  %v571_v40 = vmul.f32 %v570_v21, %v2286_v35  ;;  %v578_v36 = vstv %s2307_s3  ;;  %v597_v37 = vstv %s2346_s30 }
  0x7f   :  { %s2457_s25 = sld [smem:[#allocation2 + $0x208]]  ;;  %v526_v27 = vadd.f32 %v525_v58, %v522_v43  ;;  %v600_v1 = vstv %s2353_s2  ;;  %v598_v42 = vmul.f32 %v597_v37, %v2010_v44  ;;  %v604_v30 = vstv %s2360_s12 }
  0x80   :  { %s2463_s26 = sld [smem:[#allocation2 + $0x209]]  ;;  %v564_v13 = vadd.f32 %v563_v23, %v560_v24  ;;  %v601_v2 = vmul.f32 %v600_v1, %v2025_v46  ;;  %v579_v16 = vmul.f32 %v578_v36, %v2329_v12  ;;  %v605_v14 = vmul.f32 %v604_v30, %v2048_v60 }
  0x81   :  { %s3361_s27 = sld [smem:[#allocation13_spill]]  ;;  %v530_v0 = vadd.f32 %v529_v19, %v526_v27  ;;  %v608_v45 = vstv %s2368_s13  ;;  %v612_v47 = vstv %s2379_s14  ;;  %v616_v53 = vstv %s2385_s15 }
  0x82   :  { %s2468_s4 = sld [smem:[#allocation2 + $0x20a]]  ;;  %v568_v4 = vadd.f32 %v567_v38, %v564_v13  ;;  %v602_v33 = vadd.f32 %v601_v2, %v598_v42  ;;  %v609_v49 = vmul.f32 %v608_v45, %v2219_v7  ;;  %v613_v52 = vmul.f32 %v612_v47, %v2270_v28 }
  0x83   :  { %s3362_s5 = sld [smem:[#allocation11_spill]]  ;;  %v534_v51 = vadd.f32 %v533_v22, %v530_v0  ;;  %v620_v57 = vstv %s2390_s16  ;;  %v624_v17 = vstv %s2405_s17  ;;  %v2523_v58 = vadd.f32 %v494_v15, %v492_v26 }
  0x84   :  { %s2473_s6 = sld [smem:[#allocation2 + $0x20b]]  ;;  %v572_v54 = vadd.f32 %v571_v40, %v568_v4  ;;  %v606_v55 = vadd.f32 %v605_v14, %v602_v33  ;;  %v617_v50 = vmul.f32 %v616_v53, %v2281_v29  ;;  %v621_v18 = vmul.f32 %v620_v57, %v2286_v35 }
  0x85   :  { %s2478_s28 = sld [smem:[#allocation2 + $0x20c]]  ;;  %v538_v15 = vadd.f32 %v537_v31, %v534_v51  ;;  %v625_v10 = vmul.f32 %v624_v17, %v2293_v39  ;;  %v628_v20 = vstv %s2410_s11  ;;  %v632_v21 = vstv %s2419_s20 }
  0x86   :  { %s2483_s0 = sld [smem:[#allocation2 + $0x20d]]  ;;  %v610_v9 = vadd.f32 %v609_v49, %v606_v55  ;;  %v647_v22 = vstv %s2441_s1  ;;  %v650_v11 = vstv %s2443_s23  ;;  %v654_v23 = vstv %s2447_s19 }
  0x87   :  { %v574_v25 = vstv %s3361_s27  ;;  %s2487_s29 = sld [smem:[#allocation2 + $0x20e]]  ;;  %v648_v31 = vmul.f32 %v647_v22, %v2010_v44  ;;  %v655_v40 = vmul.f32 %v654_v23, %v2048_v60  ;;  %v662_v36 = vstv %s2457_s25 }
  0x88   :  { %s2492_s7 = sld [smem:[#allocation2 + $0x20f]]  ;;  %v575_v6 = vmul.f32 %v574_v25, %v2293_v39  ;;  %v614_v19 = vadd.f32 %v613_v52, %v610_v9  ;;  %v658_v25 = vstv %s2452_s24  ;;  %v633_v2 = vmul.f32 %v632_v21, %v2364_v59 }
  0x89   :  { %v540_v34 = vstv %s3362_s5  ;;  %s3363_s8 = sld [smem:[#allocation14_spill]]  ;;  %v659_v1 = vmul.f32 %v658_v25, %v2219_v7  ;;  %v666_v30 = vstv %s2463_s26  ;;  %v636_v14 = vstv %s2427_s18 }
  0x8a   :  { %s2497_s9 = sld [smem:[#allocation2 + $0x210]]  ;;  %v541_v61 = vmul.f32 %v540_v34, %v2437_v3  ;;  %v576_v5 = vadd.f32 %v575_v6, %v572_v54  ;;  %v618_v27 = vadd.f32 %v617_v50, %v614_v19  ;;  %v651_v34 = vmul.f32 %v650_v11, %v2025_v46 }
  0x8b   :  { %s3364_s10 = sld [smem:[#allocation15_spill]]  ;;  %v629_v6 = vmul.f32 %v628_v20, %v2329_v12  ;;  %v663_v47 = vmul.f32 %v662_v36, %v2270_v28  ;;  %v644_v33 = vstv %s2435_s22  ;;  %v670_v49 = vstv %s2468_s4 }
  0x8c   :  { %s2502_s27 = sld [smem:[#allocation2 + $0x284]]  ;;  %v580_v43 = vadd.f32 %v579_v16, %v576_v5  ;;  %v542_v24 = vadd.f32 %v541_v61, %v538_v15  ;;  %v622_v0 = vadd.f32 %v621_v18, %v618_v27  ;;  %v652_v37 = vadd.f32 %v651_v34, %v648_v31 }
  0x8d   :  { %s2508_s2 = sld [smem:[#allocation2 + $0x285]]  ;;  %v667_v52 = vmul.f32 %v666_v30, %v2281_v29  ;;  %v674_v53 = vstv %s2473_s6  ;;  %v637_v55 = vmul.f32 %v636_v14, %v2414_v32  ;;  %v678_v57 = vstv %s2478_s28 }
  0x8e   :  { %s3365_s30 = sld [smem:[#allocation12_spill]]  ;;  %v626_v16 = vadd.f32 %v625_v10, %v622_v0  ;;  %v656_v45 = vadd.f32 %v655_v40, %v652_v37  ;;  %v682_v18 = vstv %s2483_s0  ;;  %v686_v21 = vstv %s2487_s29 }
  0x8f   :  { %v582_v48 = vstv %s3363_s8  ;;  %s3366_s3 = sld [smem:[#allocation16_spill]]  ;;  %v679_v31 = vmul.f32 %v678_v57, %v2329_v12  ;;  %v683_v34 = vmul.f32 %v682_v18, %v2364_v59  ;;  %v687_v40 = vmul.f32 %v686_v21, %v2414_v32 }
  0x90   :  { %s2512_s12 = sld [smem:[#allocation2 + $0x286]]  ;;  %v583_v8 = vmul.f32 %v582_v48, %v2364_v59  ;;  %v640_v48 = vstv %s2430_s21  ;;  %v630_v51 = vadd.f32 %v629_v6, %v626_v16  ;;  %v690_v37 = vstv %s2492_s7 }
  0x91   :  { %v586_v41 = vstv %s3364_s10  ;;  %s2517_s5 = sld [smem:[#allocation2 + $0x287]]  ;;  %v641_v20 = vmul.f32 %v640_v48, %v2437_v3 }
  0x92   :  { %s2521_s13 = sld [smem:[#allocation2 + $0x288]]  ;;  %v587_v63 = vmul.f32 %v586_v41, %v2414_v32  ;;  %v584_v26 = vadd.f32 %v583_v8, %v580_v43  ;;  %v660_v41 = vadd.f32 %v659_v1, %v656_v45  ;;  %v697_v17 = vstv %s2502_s27 }
  0x93   :  { %s2528_s14 = sld [smem:[#allocation2 + $0x289]]  ;;  %v634_v61 = vadd.f32 %v633_v2, %v630_v51  ;;  %v698_v5 = vmul.f32 %v697_v17, %v2010_v44  ;;  %v675_v8 = vmul.f32 %v674_v53, %v2293_v39  ;;  %v700_v9 = vstv %s2508_s2 }
  0x94   :  { %v544_v56 = vstv %s3365_s30  ;;  %s2532_s15 = sld [smem:[#allocation2 + $0x28a]]  ;;  %v588_v13 = vadd.f32 %v587_v63, %v584_v26  ;;  %v701_v10 = vmul.f32 %v700_v9, %v2025_v46 }
  0x95   :  { %v590_v62 = vstv %s3366_s3  ;;  %s2537_s16 = sld [smem:[#allocation2 + $0x28b]]  ;;  %v2571_v4 = vadd.f32 %v544_v56, %v542_v24  ;;  %v664_v56 = vadd.f32 %v663_v47, %v660_v41  ;;  %v638_v19 = vadd.f32 %v637_v55, %v634_v61 }
  0x96   :  { %s2541_s17 = sld [smem:[#allocation2 + $0x28c]]  ;;  %v591_v38 = vmul.f32 %v590_v62, %v2437_v3  ;;  %v671_v62 = vmul.f32 %v670_v49, %v2286_v35  ;;  %v704_v50 = vstv %s2512_s12  ;;  %v702_v23 = vadd.f32 %v701_v10, %v698_v5 }
  0x97   :  { %s2547_s8 = sld [smem:[#allocation2 + $0x28d]]  ;;  %v708_v15 = vstv %s2517_s5  ;;  %v668_v63 = vadd.f32 %v667_v52, %v664_v56  ;;  %v705_v43 = vmul.f32 %v704_v50, %v2048_v60  ;;  %v642_v6 = vadd.f32 %v641_v20, %v638_v19 }
  0x98   :  { %s3367_s10 = sld [smem:[#allocation17_spill]]  ;;  %v592_v54 = vadd.f32 %v591_v38, %v588_v13  ;;  %v712_v22 = vstv %s2521_s13  ;;  %v709_v25 = vmul.f32 %v708_v15, %v2219_v7  ;;  %v691_v19 = vmul.f32 %v690_v37, %v2437_v3 }
  0x99   :  { %s2551_s30 = sld [smem:[#allocation2 + $0x28e]]  ;;  %v672_v11 = vadd.f32 %v671_v62, %v668_v63  ;;  %v716_v26 = vstv %s2528_s14  ;;  %v706_v36 = vadd.f32 %v705_v43, %v702_v23  ;;  %v713_v0 = vmul.f32 %v712_v22, %v2270_v28 }
  0x9a   :  { %s2556_s11 = sld [smem:[#allocation2 + $0x28f]]  ;;  %v720_v24 = vstv %s2532_s15  ;;  %v717_v1 = vmul.f32 %v716_v26, %v2281_v29  ;;  %v2663_v43 = vadd.f32 %v644_v33, %v642_v6  ;;  %v694_v20 = vstv %s2497_s9 }
  0x9b   :  { %s2560_s20 = sld [smem:[#allocation2 + $0x290]]  ;;  %v676_v38 = vadd.f32 %v675_v8, %v672_v11  ;;  %v724_v13 = vstv %s2537_s16  ;;  %v721_v2 = vmul.f32 %v720_v24, %v2286_v35 }
  0x9c   :  { %s2565_s1 = sld [smem:[#allocation2 + $0x304]]  ;;  %v728_v30 = vstv %s2541_s17  ;;  %v725_v51 = vmul.f32 %v724_v13, %v2293_v39 }
  0x9d   :  { %s2569_s23 = sld [smem:[#allocation2 + $0x305]]  ;;  %v732_v16 = vstv %s2547_s8  ;;  %v680_v14 = vadd.f32 %v679_v31, %v676_v38  ;;  %v729_v53 = vmul.f32 %v728_v30, %v2329_v12 }
  0x9e   :  { %v594_v42 = vstv %s3367_s10  ;;  %s2576_s19 = sld [smem:[#allocation2 + $0x306]]  ;;  %v733_v21 = vmul.f32 %v732_v16, %v2364_v59 }
  0x9f   :  { %s2580_s18 = sld [smem:[#allocation2 + $0x307]]  ;;  %v2611_v27 = vadd.f32 %v594_v42, %v592_v54  ;;  %v710_v42 = vadd.f32 %v709_v25, %v706_v36  ;;  %v736_v61 = vstv %s2551_s30  ;;  %v684_v5 = vadd.f32 %v683_v34, %v680_v14 }
  0xa0   :  { %s2585_s21 = sld [smem:[#allocation2 + $0x308]]  ;;  %v740_v8 = vstv %s2556_s11  ;;  %v737_v11 = vmul.f32 %v736_v61, %v2414_v32 }
  0xa1   :  { %s2589_s24 = sld [smem:[#allocation2 + $0x309]]  ;;  %v714_v49 = vadd.f32 %v713_v0, %v710_v42  ;;  %v688_v33 = vadd.f32 %v687_v40, %v684_v5  ;;  %v2675_v26 = vmul.f32 %v740_v8, %v2437_v3 }
  0xa2   :  { %s2595_s25 = sld [smem:[#allocation2 + $0x30a]]  ;;  %v747_v45 = vstv %s2565_s1 }
  0xa3   :  { %s2600_s26 = sld [smem:[#allocation2 + $0x30b]]  ;;  %v750_v47 = vstv %s2569_s23  ;;  %v748_v41 = vmul.f32 %v747_v45, %v2010_v44  ;;  %v718_v17 = vadd.f32 %v717_v1, %v714_v49  ;;  %v692_v16 = vadd.f32 %v691_v19, %v688_v33 }
  0xa4   :  { %s2605_s4 = sld [smem:[#allocation2 + $0x30c]]  ;;  %v754_v48 = vstv %s2576_s19  ;;  %v751_v52 = vmul.f32 %v750_v47, %v2025_v46 }
  0xa5   :  { %s2609_s6 = sld [smem:[#allocation2 + $0x30d]]  ;;  %v755_v54 = vmul.f32 %v754_v48, %v2048_v60  ;;  %v758_v55 = vstv %s2580_s18  ;;  %v722_v15 = vadd.f32 %v721_v2, %v718_v17 }
  0xa6   :  { %s2616_s28 = sld [smem:[#allocation2 + $0x30e]]  ;;  %v762_v57 = vstv %s2585_s21  ;;  %v752_v56 = vadd.f32 %v751_v52, %v748_v41  ;;  %v759_v62 = vmul.f32 %v758_v55, %v2219_v7 }
  0xa7   :  { %s2620_s0 = sld [smem:[#allocation2 + $0x30f]]  ;;  %v763_v9 = vmul.f32 %v762_v57, %v2270_v28  ;;  %v766_v50 = vstv %s2589_s24  ;;  %v726_v22 = vadd.f32 %v725_v51, %v722_v15 }
  0xa8   :  { %s2625_s29 = sld [smem:[#allocation2 + $0x310]]  ;;  %v756_v63 = vadd.f32 %v755_v54, %v752_v56  ;;  %v770_v18 = vstv %s2595_s25  ;;  %v767_v25 = vmul.f32 %v766_v50, %v2281_v29 }
  0xa9   :  { %s2630_s27 = sld [smem:[#allocation2 + $0x384]]  ;;  %v774_v10 = vstv %s2600_s26  ;;  %v771_v31 = vmul.f32 %v770_v18, %v2286_v35  ;;  %v730_v24 = vadd.f32 %v729_v53, %v726_v22  ;;  %v744_v53 = vstv %s2560_s20 }
  0xaa   :  { %s2635_s7 = sld [smem:[#allocation2 + $0x385]]  ;;  %v760_v23 = vadd.f32 %v759_v62, %v756_v63  ;;  %v775_v34 = vmul.f32 %v774_v10, %v2293_v39  ;;  %v778_v36 = vstv %s2605_s4  ;;  %v2714_v62 = vadd.f32 %v694_v20, %v692_v16 }
  0xab   :  { %s2640_s2 = sld [smem:[#allocation2 + $0x386]]  ;;  %v782_v42 = vstv %s2609_s6  ;;  %v779_v14 = vmul.f32 %v778_v36, %v2329_v12  ;;  %v734_v52 = vadd.f32 %v733_v21, %v730_v24 }
  0xac   :  { %s2646_s3 = sld [smem:[#allocation2 + $0x387]]  ;;  %v764_v38 = vadd.f32 %v763_v9, %v760_v23  ;;  %v786_v45 = vstv %s2616_s28  ;;  %v783_v54 = vmul.f32 %v782_v42, %v2364_v59 }
  0xad   :  { %s2650_s12 = sld [smem:[#allocation2 + $0x388]]  ;;  %v790_v49 = vstv %s2620_s0  ;;  %v787_v5 = vmul.f32 %v786_v45, %v2414_v32  ;;  %v738_v10 = vadd.f32 %v737_v11, %v734_v52 }
  0xae   :  { %s2655_s5 = sld [smem:[#allocation2 + $0x389]]  ;;  %v768_v13 = vadd.f32 %v767_v25, %v764_v38  ;;  %v791_v8 = vmul.f32 %v790_v49, %v2437_v3  ;;  %v794_v9 = vstv %s2625_s29 }
  0xaf   :  { %s2659_s13 = sld [smem:[#allocation2 + $0x38a]]  ;;  %v797_v0 = vstv %s2630_s27 }
  0xb0   :  { %s2668_s14 = sld [smem:[#allocation2 + $0x38b]]  ;;  %v798_v40 = vmul.f32 %v797_v0, %v2010_v44  ;;  %v800_v6 = vstv %s2635_s7  ;;  %v772_v48 = vadd.f32 %v771_v31, %v768_v13 }
  0xb1   :  { %s2672_s22 = sld [smem:[#allocation2 + $0x38c]]  ;;  %v804_v37 = vstv %s2640_s2  ;;  %v801_v2 = vmul.f32 %v800_v6, %v2025_v46 }
  0xb2   :  { %s2679_s9 = sld [smem:[#allocation2 + $0x38d]]  ;;  %v808_v1 = vstv %s2646_s3  ;;  %v805_v30 = vmul.f32 %v804_v37, %v2048_v60  ;;  %v776_v57 = vadd.f32 %v775_v34, %v772_v48 }
  0xb3   :  { %s2683_s15 = sld [smem:[#allocation2 + $0x38e]]  ;;  %v812_v47 = vstv %s2650_s12  ;;  %v802_v51 = vadd.f32 %v801_v2, %v798_v40  ;;  %v809_v41 = vmul.f32 %v808_v1, %v2219_v7 }
  0xb4   :  { %s2689_s16 = sld [smem:[#allocation2 + $0x404]]  ;;  %v816_v55 = vstv %s2655_s5  ;;  %v813_v61 = vmul.f32 %v812_v47, %v2270_v28  ;;  %v780_v50 = vadd.f32 %v779_v14, %v776_v57 }
  0xb5   :  { %s2694_s17 = sld [smem:[#allocation2 + $0x405]]  ;;  %v806_v17 = vadd.f32 %v805_v30, %v802_v51  ;;  %v820_v56 = vstv %s2659_s13  ;;  %v817_v63 = vmul.f32 %v816_v55, %v2281_v29 }
  0xb6   :  { %s2699_s8 = sld [smem:[#allocation2 + $0x406]]  ;;  %v824_v18 = vstv %s2668_s14  ;;  %v821_v19 = vmul.f32 %v820_v56, %v2286_v35  ;;  %v784_v22 = vadd.f32 %v783_v54, %v780_v50  ;;  %v1527_v56 = vmul.f32 -1.442695, %v2663_v43 }
  0xb7   :  { %s2703_s10 = sld [smem:[#allocation2 + $0x407]]  ;;  %v810_v15 = vadd.f32 %v809_v41, %v806_v17  ;;  %v828_v20 = vstv %s2672_s22  ;;  %v825_v31 = vmul.f32 %v824_v18, %v2293_v39  ;;  %v1525_v17 = vmul.f32 -1.442695, %v2571_v4 }
  0xb8   :  { %s2708_s30 = sld [smem:[#allocation2 + $0x408]]  ;;  %v788_v38 = vadd.f32 %v787_v5, %v784_v22  ;;  %v832_v6 = vstv %s2679_s9  ;;  %v1528_v50 = vmul.f32 -1.442695, %v2714_v62 }
  0xb9   :  { %s2712_s11 = sld [smem:[#allocation2 + $0x409]]  ;;  %v814_v23 = vadd.f32 %v813_v61, %v810_v15  ;;  %v836_v42 = vstv %s2683_s15 }
  0xba   :  { %s2719_s20 = sld [smem:[#allocation2 + $0x38f]]  ;;  %v847_v21 = vstv %s2689_s16  ;;  %v792_v14 = vadd.f32 %v791_v8, %v788_v38  ;;  %v837_v52 = vmul.f32 %v836_v42, %v2414_v32 }
  0xbb   :  { %s2723_s1 = sld [smem:[#allocation2 + $0x40a]]  ;;  %v848_v25 = vmul.f32 %v847_v21, %v2010_v44  ;;  %v850_v33 = vstv %s2694_s17  ;;  %v818_v36 = vadd.f32 %v817_v63, %v814_v23  ;;  %v742_v44 = vadd.f32 %v2675_v26, %v738_v10 }
  0xbc   :  { %s2730_s23 = sld [smem:[#allocation2 + $0x40b]]  ;;  %v851_v34 = vmul.f32 %v850_v33, %v2025_v46  ;;  %v854_v11 = vstv %s2699_s8  ;;  %v829_v46 = vmul.f32 %v828_v20, %v2329_v12  ;;  %v1524_v26 = vmul.f32 -1.442695, %v2523_v58 }
  0xbd   :  { %v858_v24 = vstv %s2703_s10  ;;  %s2736_s19 = sld [smem:[#allocation2 + $0x40c]]  ;;  %v855_v0 = vmul.f32 %v854_v11, %v2048_v60  ;;  %v822_v13 = vadd.f32 %v821_v19, %v818_v36  ;;  %v745_v48 = vadd.f32 %v744_v53, %v742_v44 }
  0xbe   :  { %v862_v40 = vstv %s2708_s30  ;;  %v852_v37 = vadd.f32 %v851_v34, %v848_v25  ;;  %v859_v1 = vmul.f32 %v858_v24, %v2219_v7  ;;  %s2746_s18 = sld [smem:[#allocation2 + $0x40d]]  ;;  %v833_v7 = vmul.f32 %v832_v6, %v2364_v59 }
  0xbf   :  { %v866_v2 = vstv %s2712_s11  ;;  %s2749_s21 = sld [smem:[#allocation2 + $0x390]]  ;;  %v863_v16 = vmul.f32 %v862_v40, %v2270_v28  ;;  %v826_v45 = vadd.f32 %v825_v31, %v822_v13  ;;  %1653 = vpow2.f32 %v1524_v26 }
  0xc0   :  { %v840_v30 = vstv %s2719_s20  ;;  %v856_v60 = vadd.f32 %v855_v0, %v852_v37  ;;  %s2755_s24 = sld [smem:[#allocation2 + $0x40e]]  ;;  %v867_v51 = vmul.f32 %v866_v2, %v2281_v29  ;;  %v795_v53 = vadd.f32 %v794_v9, %v792_v14 }
  0xc1   :  { %v870_v47 = vstv %s2723_s1  ;;  %v830_v41 = vadd.f32 %v829_v46, %v826_v45  ;;  %v841_v28 = vmul.f32 %v840_v30, %v2437_v3  ;;  %s2763_s25 = sld [smem:[#allocation2 + $0x40f]]  ;;  %v1526_v29 = vmul.f32 -1.442695, %v2611_v27 }
  0xc2   :  { %v860_v49 = vadd.f32 %v859_v1, %v856_v60  ;;  %v874_v58 = vstv %s2730_s23  ;;  %v871_v55 = vmul.f32 %v870_v47, %v2286_v35  ;;  %1655 = vpow2.f32 %v1525_v17  ;;  %s2771_s26 = sld [smem:[#allocation2 + $0x410]] }
  0xc3   :  { %v878_v57 = vstv %s2736_s19  ;;  %v834_v61 = vadd.f32 %v833_v7, %v830_v41  ;;  %v875_v8 = vmul.f32 %v874_v58, %v2293_v39  ;;  %1657 = vpow2.f32 %v1526_v29  ;;  %s2804_s4 = sld [smem:[#allocation2 + $0x11]] }
  0xc4   :  { %v864_v54 = vadd.f32 %v863_v16, %v860_v49  ;;  %v882_v15 = vstv %s2746_s18  ;;  %v879_v27 = vmul.f32 %v878_v57, %v2329_v12  ;;  %1659 = vpow2.f32 %v1527_v56  ;;  %s2809_s6 = sld [smem:[#allocation2 + $0x12]] }
  0xc5   :  { %v838_v35 = vadd.f32 %v837_v52, %v834_v61  ;;  %v1654_v4 = vpop.eup %1653  ;;  %v1529_v63 = vmul.f32 -1.442695, %v745_v48  ;;  %v844_v18 = vstv %s2749_s21  ;;  %v883_v62 = vmul.f32 %v882_v15, %v2364_v59  ;;  %s2814_s28 = sld [smem:[#allocation2 + $0x13]] }
  0xc6   :  { %v868_v5 = vadd.f32 %v867_v51, %v864_v54  ;;  %v886_v10 = vstv %s2755_s24  ;;  %v2776_v19 = vadd.f32 1.0, %v1654_v4  ;;  %1661 = vpow2.f32 %v1528_v50  ;;  %s2824_s0 = sld [smem:[#allocation2 + $0x14]] }
  0xc7   :  { %v842_v43 = vadd.f32 %v841_v28, %v838_v35  ;;  %v1530_v20 = vmul.f32 -1.442695, %v795_v53  ;;  %v887_v23 = vmul.f32 %v886_v10, %v2414_v32  ;;  %v890_v12 = vstv %s2763_s25  ;;  %s2836_s29 = sld [smem:[#allocation2 + $0x15]] }
  0xc8   :  { %v872_v9 = vadd.f32 %v871_v55, %v868_v5  ;;  %1663 = vrcp.f32 %v2776_v19  ;;  %v1656_v21 = vpop.eup %1655  ;;  %v909_v31 = vand.u32 2147483647, %v2776_v19  ;;  %v911_v59 = vand.u32 2147483648, %v2776_v19  ;;  %s2853_s27 = sld [smem:[#allocation2 + $0x16]] }
  0xc9   :  { %1665 = vpow2.f32 %v1529_v63  ;;  %v1658_v25 = vpop.eup %1657  ;;  %v845_v33 = vadd.f32 %v844_v18, %v842_v43  ;;  %v2783_v34 = vadd.f32 1.0, %v1656_v21  ;;  %v891_v36 = vmul.f32 %v890_v12, %v2437_v3  ;;  %s2862_s7 = sld [smem:[#allocation2 + $0x17]] }
  0xca   :  { %v876_v39 = vadd.f32 %v875_v8, %v872_v9  ;;  %v1660_v11 = vpop.eup %1659  ;;  %v2786_v38 = vadd.f32 1.0, %v1658_v25  ;;  %1667 = vpow2.f32 %v1530_v20  ;;  %v894_v0 = vstv %s2771_s26  ;;  %s2873_s2 = sld [smem:[#allocation2 + $0x18]] }
  0xcb   :  { %1669 = vrcp.f32 %v2783_v34  ;;  %vm905_vm14 = vweird.f32 %v2776_v19  ;;  %v928_v44 = vand.u32 2147483647, %v2783_v34  ;;  %vm2796_vm0 = vcmp.eq.f32.partialorder %v909_v31, 8.507059e+37  ;;  %s2881_s3 = sld [smem:[#allocation2 + $0x19]] }
  0xcc   :  { %v880_v22 = vadd.f32 %v879_v27, %v876_v39  ;;  %v1662_v32 = vpop.eup %1661  ;;  %1671 = vrcp.f32 %v2786_v38  ;;  %v930_v1 = vand.u32 2147483648, %v2783_v34  ;;  %v949_v3 = vand.u32 2147483648, %v2786_v38  ;;  %s2894_s12 = sld [smem:[#allocation2 + $0x1a]] }
  0xcd   :  { %v2802_v13 = vadd.f32 1.0, %v1660_v11  ;;  %v912_v2 = vor.u32 1.1754944e-38, %v911_v59  ;;  %vm924_vm1 = vweird.f32 %v2783_v34  ;;  %v1531_v30 = vmul.f32 -1.442695, %v845_v33  ;;  %s2901_s5 = sld [smem:[#allocation2 + $0x91]] }
  0xce   :  { %v884_v24 = vadd.f32 %v883_v62, %v880_v22  ;;  %v2794_v6 = vpop.eup %1663  ;;  %vm943_vm3 = vweird.f32 %v2786_v38  ;;  %v947_v16 = vand.u32 2147483647, %v2786_v38  ;;  %vm2817_vm5 = vcmp.eq.f32.partialorder %v928_v44, 8.507059e+37  ;;  %s2917_s13 = sld [smem:[#allocation2 + $0x92]] }
  0xcf   :  { %v1666_v46 = vpop.eup %1665  ;;  %v901_v42 = vmul.f32 %v2794_v6, %v2776_v19  ;;  %1673 = vrcp.f32 %v2802_v13  ;;  %vm906_vm4 = vweird.f32 %v2794_v6  ;;  %v968_v7 = vand.u32 2147483648, %v2802_v13  ;;  %s2924_s14 = sld [smem:[#allocation2 + $0x93]] }
  0xd0   :  { %v888_v40 = vadd.f32 %v887_v23, %v884_v24  ;;  %v1668_v26 = vpop.eup %1667  ;;  %v2822_v47 = vadd.f32 1.0, %v1662_v32  ;;  %v931_v49 = vor.u32 1.1754944e-38, %v930_v1  ;;  %v2826_v51 = vor.u32 1.1754944e-38, %v949_v3  ;;  %vm2844_vm7 = vmor %vm905_vm14, %vm906_vm4  ;;  %s2946_s22 = sld [smem:[#allocation2 + $0x94]] }
  0xd1   :  { %v902_v14 = vsub.f32 1.0, %v901_v42  ;;  %v1670_v48 = vpop.eup %1669  ;;  %v966_v41 = vand.u32 2147483647, %v2802_v13  ;;  %v2829_v52 = vadd.f32 1.0, %v1666_v46  ;;  %vm962_vm6 = vweird.f32 %v2802_v13  ;;  %s2954_s9 = sld [smem:[#allocation2 + $0x95]] }
  0xd2   :  { %v892_v60 = vadd.f32 %v891_v36, %v888_v40  ;;  %v2831_v28 = vpop.eup %1671  ;;  %v920_v54 = vmul.f32 %v1670_v48, %v2783_v34  ;;  %1675 = vpow2.f32 %v1531_v30  ;;  %v2851_v53 = vadd.f32 1.0, %v1668_v26  ;;  %s2961_s15 = sld [smem:[#allocation2 + $0x96]] }
  0xd3   :  { %v903_v58 = vmul.f32 %v2794_v6, %v902_v14  ;;  %v939_v17 = vmul.f32 %v2831_v28, %v2786_v38  ;;  %1677 = vrcp.f32 %v2822_v47  ;;  %vm925_vm8 = vweird.f32 %v1670_v48  ;;  %s2967_s16 = sld [smem:[#allocation2 + $0x97]] }
  0xd4   :  { %v2838_v55 = vadd.f32 %v894_v0, %v892_v60  ;;  %v921_v29 = vsub.f32 1.0, %v920_v54  ;;  %vm2856_vm9 = vcmp.eq.f32.partialorder %v947_v16, 8.507059e+37  ;;  %v2860_v5 = vor.u32 1.1754944e-38, %v968_v7  ;;  %vm2886_vm12 = vmor %vm924_vm1, %vm925_vm8  ;;  %s2988_s17 = sld [smem:[#allocation2 + $0x98]] }
  0xd5   :  { %v904_v61 = vadd.f32 %v2794_v6, %v903_v58  ;;  %v2864_v8 = vpop.eup %1673  ;;  %v940_v50 = vsub.f32 1.0, %v939_v17  ;;  %vm2866_vm10 = vcmp.eq.f32.partialorder %v966_v41, 8.507059e+37  ;;  %v985_v15 = vand.u32 2147483647, %v2822_v47  ;;  %s2998_s8 = sld [smem:[#allocation2 + $0x99]] }
  0xd6   :  { %v987_v4 = vand.u32 2147483648, %v2822_v47  ;;  %1679 = vrcp.f32 %v2829_v52  ;;  %v922_v27 = vmul.f32 %v1670_v48, %v921_v29  ;;  %vm944_vm11 = vweird.f32 %v2831_v28  ;;  %s3010_s10 = sld [smem:[#allocation2 + $0x9a]] }
  0xd7   :  { %v908_v9 = vsel %vm2844_vm7, %v2794_v6, %v904_v61  ;;  %v958_v63 = vmul.f32 %v2864_v8, %v2802_v13  ;;  %v941_v18 = vmul.f32 %v2831_v28, %v940_v50  ;;  %vm981_vm2 = vweird.f32 %v2822_v47  ;;  %vm2908_vm14 = vmor %vm943_vm3, %vm944_vm11  ;;  %s3016_s30 = sld [smem:[#allocation2 + $0x111]] }
  0xd8   :  { %vm1000_vm13 = vweird.f32 %v2829_v52  ;;  %v1004_v10 = vand.u32 2147483647, %v2829_v52  ;;  %v1676_v19 = vpop.eup %1675  ;;  %v2898_v39 = vsel %vm2796_vm0, %v912_v2, %v908_v9  ;;  %v923_v62 = vadd.f32 %v1670_v48, %v922_v27  ;;  %s3025_s11 = sld [smem:[#allocation2 + $0x112]] }
  0xd9   :  { %v959_v20 = vsub.f32 1.0, %v958_v63  ;;  %vm963_vm15 = vweird.f32 %v2864_v8  ;;  %v1678_v21 = vpop.eup %1677  ;;  %v942_v22 = vadd.f32 %v2831_v28, %v941_v18  ;;  %vm2912_vm1 = vcmp.eq.f32.partialorder %v985_v15, 8.507059e+37  ;;  %s3033_s20 = sld [smem:[#allocation2 + $0x113]] }
  0xda   :  { %v988_v25 = vor.u32 1.1754944e-38, %v987_v4  ;;  %1681 = vrcp.f32 %v2851_v53  ;;  %v927_v33 = vsel %vm2886_vm12, %v1670_v48, %v923_v62  ;;  %v977_v34 = vmul.f32 %v1678_v21, %v2822_v47  ;;  %vm2936_vm0 = vmor %vm962_vm6, %vm963_vm15  ;;  %s3046_s1 = sld [smem:[#allocation2 + $0x114]] }
  0xdb   :  { %v960_v31 = vmul.f32 %v2864_v8, %v959_v20  ;;  %v1006_v11 = vand.u32 2147483648, %v2829_v52  ;;  %v2930_v59 = vsel %vm2817_vm5, %v931_v49, %v927_v33  ;;  %vm982_vm3 = vweird.f32 %v1678_v21  ;;  %s3055_s23 = sld [smem:[#allocation2 + $0x115]] }
  0xdc   :  { %v2926_v24 = vpop.eup %1679  ;;  %vm2940_vm4 = vcmp.eq.f32.partialorder %v1004_v10, 8.507059e+37  ;;  %vm1019_vm7 = vweird.f32 %v2851_v53  ;;  %v1023_v0 = vand.u32 2147483647, %v2851_v53  ;;  %v946_v32 = vsel %vm2908_vm14, %v2831_v28, %v942_v22  ;;  %vm2979_vm6 = vmor %vm981_vm2, %vm982_vm3  ;;  %s3063_s19 = sld [smem:[#allocation2 + $0x116]] }
  0xdd   :  { %v961_v40 = vadd.f32 %v2864_v8, %v960_v31  ;;  %v978_v44 = vsub.f32 1.0, %v977_v34  ;;  %v996_v6 = vmul.f32 %v2926_v24, %v2829_v52  ;;  %vm1001_vm5 = vweird.f32 %v2926_v24  ;;  %s3070_s18 = sld [smem:[#allocation2 + $0x117]] }
  0xde   :  { %v1025_v37 = vand.u32 2147483648, %v2851_v53  ;;  %v2958_v1 = vadd.f32 1.0, %v1676_v19  ;;  %v1532_v3 = vmul.f32 -1.442695, %v2838_v55  ;;  %v1068_v2 = vstv %s2804_s4  ;;  %s3074_s21 = sld [smem:[#allocation2 + $0x118]] }
  0xdf   :  { %v965_v13 = vsel %vm2936_vm0, %v2864_v8, %v961_v40  ;;  %v979_v46 = vmul.f32 %v1678_v21, %v978_v44  ;;  %v997_v42 = vsub.f32 1.0, %v996_v6  ;;  %v2974_v60 = vsel %vm2856_vm9, %v2826_v51, %v946_v32  ;;  %vm3004_vm9 = vmor %vm1000_vm13, %vm1001_vm5  ;;  %s3082_s24 = sld [smem:[#allocation2 + $0x119]] }
  0xe0   :  { %v2969_v30 = vpop.eup %1681  ;;  %v1007_v26 = vor.u32 1.1754944e-38, %v1006_v11  ;;  %vm2983_vm8 = vcmp.eq.f32.partialorder %v1023_v0, 8.507059e+37  ;;  %1683 = vrcp.f32 %v2958_v1  ;;  %v2993_v45 = vsel %vm2866_vm10, %v2860_v5, %v965_v13  ;;  %s3093_s25 = sld [smem:[#allocation2 + $0x11a]] }
  0xe1   :  { %v980_v7 = vadd.f32 %v1678_v21, %v979_v46  ;;  %v998_v47 = vmul.f32 %v2926_v24, %v997_v42  ;;  %v1015_v48 = vmul.f32 %v2969_v30, %v2851_v53  ;;  %vm1020_vm11 = vweird.f32 %v2969_v30  ;;  %s3098_s26 = sld [smem:[#allocation2 + $0x191]] }
  0xe2   :  { %v1026_v51 = vor.u32 1.1754944e-38, %v1025_v37  ;;  %1685 = vpow2.f32 %v1532_v3  ;;  %v1069_v41 = vmul.f32 %v1068_v2, %v2898_v39  ;;  %v1071_v54 = vstv %s2809_s6  ;;  %vm3039_vm12 = vmor %vm1019_vm7, %vm1020_vm11  ;;  %s3103_s4 = sld [smem:[#allocation2 + $0x192]] }
  0xe3   :  { %v984_v28 = vsel %vm2979_vm6, %v1678_v21, %v980_v7  ;;  %v999_v58 = vadd.f32 %v2926_v24, %v998_v47  ;;  %v1016_v52 = vsub.f32 1.0, %v1015_v48  ;;  %vm1038_vm10 = vweird.f32 %v2958_v1  ;;  %s3110_s6 = sld [smem:[#allocation2 + $0x193]] }
  0xe4   :  { %v3020_v55 = vsel %vm2912_vm1, %v988_v25, %v984_v28  ;;  %v1042_v57 = vand.u32 2147483647, %v2958_v1  ;;  %v1072_v17 = vmul.f32 %v1071_v54, %v2930_v59  ;;  %v1075_v56 = vstv %s2814_s28  ;;  %s3118_s28 = sld [smem:[#allocation2 + $0x194]] }
  0xe5   :  { %v1003_v61 = vsel %vm3004_vm9, %v2926_v24, %v999_v58  ;;  %v1017_v29 = vmul.f32 %v2969_v30, %v1016_v52  ;;  %v1079_v5 = vstv %s2824_s0  ;;  %v1044_v35 = vand.u32 2147483648, %v2958_v1  ;;  %s3126_s0 = sld [smem:[#allocation2 + $0x195]] }
  0xe6   :  { %v1684_v8 = vpop.eup %1683  ;;  %v1073_v15 = vadd.f32 %v1072_v17, %v1069_v41  ;;  %v1076_v4 = vmul.f32 %v1075_v56, %v2974_v60  ;;  %v1080_v9 = vmul.f32 %v1079_v5, %v2993_v45  ;;  %v3050_v27 = vsel %vm2940_vm4, %v1007_v26, %v1003_v61 }
  0xe7   :  { %v1018_v53 = vadd.f32 %v2969_v30, %v1017_v29  ;;  %v1034_v63 = vmul.f32 %v1684_v8, %v2958_v1  ;;  %v1083_v43 = vstv %s2836_s29  ;;  %vm3057_vm2 = vcmp.eq.f32.partialorder %v1042_v57, 8.507059e+37  ;;  %s3130_s29 = sld [smem:[#allocation2 + $0x196]] }
  0xe8   :  { %v1686_v18 = vpop.eup %1685  ;;  %v1077_v19 = vadd.f32 %v1076_v4, %v1073_v15  ;;  %v1084_v62 = vmul.f32 %v1083_v43, %v3020_v55  ;;  %v1087_v20 = vstv %s2853_s27  ;;  %vm1039_vm13 = vweird.f32 %v1684_v8  ;;  %s3135_s27 = sld [smem:[#allocation2 + $0x197]] }
  0xe9   :  { %v1022_v21 = vsel %vm3039_vm12, %v2969_v30, %v1018_v53  ;;  %v1035_v22 = vsub.f32 1.0, %v1034_v63  ;;  %v3068_v23 = vadd.f32 1.0, %v1686_v18  ;;  %v1045_v12 = vor.u32 1.1754944e-38, %v1044_v35  ;;  %vm3086_vm15 = vmor %vm1038_vm10, %vm1039_vm13 }
  0xea   :  { %v1081_v25 = vadd.f32 %v1080_v9, %v1077_v19  ;;  %v1088_v33 = vmul.f32 %v1087_v20, %v3050_v27  ;;  %v1091_v31 = vstv %s2862_s7  ;;  %v3078_v34 = vsel %vm2983_vm8, %v1026_v51, %v1022_v21  ;;  %s3139_s7 = sld [smem:[#allocation2 + $0x198]] }
  0xeb   :  { %v1036_v11 = vmul.f32 %v1684_v8, %v1035_v22  ;;  %1687 = vrcp.f32 %v3068_v23  ;;  %v1095_v24 = vstv %s2873_s2  ;;  %vm1057_vm14 = vweird.f32 %v3068_v23  ;;  %s3145_s2 = sld [smem:[#allocation2 + $0x199]] }
  0xec   :  { %v1061_v36 = vand.u32 2147483647, %v3068_v23  ;;  %v1085_v0 = vadd.f32 %v1084_v62, %v1081_v25  ;;  %v1099_v32 = vstv %s2881_s3  ;;  %v1063_v44 = vand.u32 2147483648, %v3068_v23  ;;  %s3199_s3 = sld [smem:[#allocation2 + $0x218]] }
  0xed   :  { %v1037_v40 = vadd.f32 %v1684_v8, %v1036_v11  ;;  %v1106_v6 = vstv %s2901_s5  ;;  %v1109_v37 = vstv %s2917_s13  ;;  %v1092_v3 = vmul.f32 %v1091_v31, %v3078_v34  ;;  %s3149_s5 = sld [smem:[#allocation2 + $0x19a]] }
  0xee   :  { %v1089_v1 = vadd.f32 %v1088_v33, %v1085_v0  ;;  %v1107_v13 = vmul.f32 %v1106_v6, %v2898_v39  ;;  %v1110_v46 = vmul.f32 %v1109_v37, %v2930_v59  ;;  %v1113_v2 = vstv %s2924_s14  ;;  %s3162_s13 = sld [smem:[#allocation2 + $0x211]] }
  0xef   :  { %v1041_v42 = vsel %vm3086_vm15, %v1684_v8, %v1037_v40  ;;  %v1117_v30 = vstv %s2946_s22  ;;  %v1121_v16 = vstv %s2954_s9  ;;  %v1103_v14 = vstv %s2894_s12  ;;  %s3165_s14 = sld [smem:[#allocation2 + $0x212]] }
  0xf0   :  { %v3114_v26 = vsel %vm3057_vm2, %v1045_v12, %v1041_v42  ;;  %v1111_v7 = vadd.f32 %v1110_v46, %v1107_v13  ;;  %v1114_v47 = vmul.f32 %v1113_v2, %v2974_v60  ;;  %vm3120_vm1 = vcmp.eq.f32.partialorder %v1061_v36, 8.507059e+37  ;;  %s3170_s22 = sld [smem:[#allocation2 + $0x213]] }
  0xf1   :  { %v1688_v48 = vpop.eup %1687  ;;  %v1064_v51 = vor.u32 1.1754944e-38, %v1063_v44  ;;  %v1118_v41 = vmul.f32 %v1117_v30, %v2993_v45  ;;  %v1125_v28 = vstv %s2961_s15  ;;  %v1093_v52 = vadd.f32 %v1092_v3, %v1089_v1  ;;  %s3175_s9 = sld [smem:[#allocation2 + $0x214]] }
  0xf2   :  { %v1053_v58 = vmul.f32 %v1688_v48, %v3068_v23  ;;  %v1115_v54 = vadd.f32 %v1114_v47, %v1111_v7  ;;  %v1122_v57 = vmul.f32 %v1121_v16, %v3020_v55  ;;  %vm1058_vm0 = vweird.f32 %v1688_v48  ;;  %s3184_s15 = sld [smem:[#allocation2 + $0x215]] }
  0xf3   :  { %v1096_v17 = vmul.f32 %v1095_v24, %v3114_v26  ;;  %v1129_v61 = vstv %s2967_s16  ;;  %v1133_v29 = vstv %s2988_s17  ;;  %v1126_v8 = vmul.f32 %v1125_v28, %v3050_v27  ;;  %vm3154_vm3 = vmor %vm1057_vm14, %vm1058_vm0  ;;  %s3190_s16 = sld [smem:[#allocation2 + $0x216]] }
  0xf4   :  { %v1054_v56 = vsub.f32 1.0, %v1053_v58  ;;  %v1119_v5 = vadd.f32 %v1118_v41, %v1115_v54  ;;  %v1130_v50 = vmul.f32 %v1129_v61, %v3078_v34  ;;  %v1134_v35 = vmul.f32 %v1133_v29, %v3114_v26  ;;  %s3196_s17 = sld [smem:[#allocation2 + $0x217]] }
  0xf5   :  { %v1144_v15 = vstv %s3016_s30  ;;  %v1147_v4 = vstv %s3025_s11  ;;  %v1151_v9 = vstv %s3033_s20  ;;  %v1155_v62 = vstv %s3046_s1  ;;  %s3214_s30 = sld [smem:[#allocation2 + $0x292]] }
  0xf6   :  { %v1055_v53 = vmul.f32 %v1688_v48, %v1054_v56  ;;  %v1123_v63 = vadd.f32 %v1122_v57, %v1119_v5  ;;  %v1145_v43 = vmul.f32 %v1144_v15, %v2898_v39  ;;  %v1148_v18 = vmul.f32 %v1147_v4, %v2930_v59  ;;  %s3223_s11 = sld [smem:[#allocation2 + $0x293]] }
  0xf7   :  { %v1152_v19 = vmul.f32 %v1151_v9, %v2974_v60  ;;  %v1159_v20 = vstv %s3055_s23  ;;  %v1163_v21 = vstv %s3063_s19  ;;  %v1156_v33 = vmul.f32 %v1155_v62, %v2993_v45  ;;  %s3228_s20 = sld [smem:[#allocation2 + $0x294]] }
  0xf8   :  { %v1056_v22 = vadd.f32 %v1688_v48, %v1055_v53  ;;  %v1127_v12 = vadd.f32 %v1126_v8, %v1123_v63  ;;  %v1149_v25 = vadd.f32 %v1148_v18, %v1145_v43  ;;  %v1097_v23 = vadd.f32 %v1096_v17, %v1093_v52  ;;  %s3233_s12 = sld [smem:[#allocation2 + $0x295]] }
  0xf9   :  { %v1137_v31 = vstv %s2998_s8  ;;  %v1141_v11 = vstv %s3010_s10  ;;  %v1167_v24 = vstv %s3070_s18  ;;  %v1160_v40 = vmul.f32 %v1159_v20, %v3020_v55  ;;  %s3205_s8 = sld [smem:[#allocation2 + $0x219]] }
  0xfa   :  { %v1060_v38 = vsel %vm3154_vm3, %v1688_v48, %v1056_v22  ;;  %v1131_v36 = vadd.f32 %v1130_v50, %v1127_v12  ;;  %v1153_v0 = vadd.f32 %v1152_v19, %v1149_v25  ;;  %v1164_v6 = vmul.f32 %v1163_v21, %v3050_v27  ;;  %s3209_s10 = sld [smem:[#allocation2 + $0x291]] }
  0xfb   :  { %v3179_v44 = vsel %vm3120_vm1, %v1064_v51, %v1060_v38  ;;  %v1168_v37 = vmul.f32 %v1167_v24, %v3078_v34  ;;  %v1171_v1 = vstv %s3074_s21  ;;  %v1175_v2 = vstv %s3082_s24  ;;  %s3238_s1 = sld [smem:[#allocation2 + $0x296]] }
  0xfc   :  { %v1100_v3 = vmul.f32 %v1099_v32, %v3179_v44  ;;  %v1135_v13 = vadd.f32 %v1134_v35, %v1131_v36  ;;  %v1138_v46 = vmul.f32 %v1137_v31, %v3179_v44  ;;  %v1157_v42 = vadd.f32 %v1156_v33, %v1153_v0  ;;  %s3244_s23 = sld [smem:[#allocation2 + $0x297]] }
  0xfd   :  { %v1182_v30 = vstv %s3098_s26  ;;  %v1185_v16 = vstv %s3103_s4  ;;  %v1189_v7 = vstv %s3110_s6  ;;  %v1193_v28 = vstv %s3118_s28  ;;  %s3248_s19 = sld [smem:[#allocation2 + $0x21a]] }
  0xfe   :  { %v1101_v47 = vadd.f32 %v1100_v3, %v1097_v23  ;;  %v1139_v48 = vadd.f32 %v1138_v46, %v1135_v13  ;;  %v1161_v49 = vadd.f32 %v1160_v40, %v1157_v42  ;;  %v1183_v32 = vmul.f32 %v1182_v30, %v2898_v39  ;;  %s3254_s18 = sld [smem:[#allocation2 + $0x298]] }
  0xff   :  { %v1186_v51 = vmul.f32 %v1185_v16, %v2930_v59  ;;  %v1190_v41 = vmul.f32 %v1189_v7, %v2974_v60  ;;  %v1197_v58 = vstv %s3126_s0  ;;  %v1172_v54 = vmul.f32 %v1171_v1, %v3114_v26  ;;  %s3257_s21 = sld [smem:[#allocation2 + $0x299]] }
 0x100   :  { %v1165_v52 = vadd.f32 %v1164_v6, %v1161_v49  ;;  %v1179_v57 = vstv %s3093_s25  ;;  %v1176_v17 = vmul.f32 %v1175_v2, %v3179_v44  ;;  %v1194_v29 = vmul.f32 %v1193_v28, %v2993_v45  ;;  %s3263_s24 = sld [smem:[#allocation2 + $0x1b]] }
 0x101   :  { %v1187_v61 = vadd.f32 %v1186_v51, %v1183_v32  ;;  %v1201_v56 = vstv %s3130_s29  ;;  %v3218_v5 = vadd.f32 %v1103_v14, %v1101_v47  ;;  %v3220_v8 = vadd.f32 %v1141_v11, %v1139_v48  ;;  %s3267_s26 = sld [smem:[#allocation2 + $0x1c]] }
 0x102   :  { %v1169_v50 = vadd.f32 %v1168_v37, %v1165_v52  ;;  %v1198_v35 = vmul.f32 %v1197_v58, %v3020_v55  ;;  %v1202_v4 = vmul.f32 %v1201_v56, %v3050_v27  ;;  %v1205_v9 = vstv %s3135_s27  ;;  %s3273_s4 = sld [smem:[#allocation2 + $0x1d]]  ;;  %s1759_s27 = smov [#allocation7]  }
 0x103   :  { %v1191_v15 = vadd.f32 %v1190_v41, %v1187_v61  ;;  %v1209_v53 = vstv %s3139_s7  ;;  %v1213_v14 = vstv %s3145_s2  ;;  %v1220_v43 = vstv %s3162_s13  ;;  %s3282_s6 = sld [smem:[#allocation2 + $0x1e]]  ;;  %s1333_s7 = sshll.u32 %s1759_s27, 4  ;;  %s1334_s7 = int_to_ptr.vmem [resolvable:$true] %s1333_s7 }
 0x104   :  { %v1173_v63 = vadd.f32 %v1172_v54, %v1169_v50  ;;  %v1223_v18 = vstv %s3165_s14  ;;  %v1221_v19 = vmul.f32 %v1220_v43, %v2898_v39  ;;  %v1227_v20 = vstv %s3170_s22  ;;  %s3293_s25 = sld [smem:[#allocation2 + $0x1f]] }
 0x105   :  { %v1195_v10 = vadd.f32 %v1194_v29, %v1191_v15  ;;  %v1224_v62 = vmul.f32 %v1223_v18, %v2930_v59  ;;  %v1206_v21 = vmul.f32 %v1205_v9, %v3078_v34  ;;  %v1228_v22 = vmul.f32 %v1227_v20, %v2974_v60  ;;  %s1592_s28 = sld [smem:[#allocation2 + $0x29a]] }
 0x106   :  { %v1231_v12 = vstv %s3175_s9  ;;  %v1235_v25 = vstv %s3184_s15  ;;  %v1210_v23 = vmul.f32 %v1209_v53, %v3114_v26  ;;  %v1214_v24 = vmul.f32 %v1213_v14, %v3179_v44  ;;  %s1598_s0 = sld [smem:[#allocation2 + $0x20]] }
 0x107   :  { %v1199_v33 = vadd.f32 %v1198_v35, %v1195_v10  ;;  %v1225_v31 = vadd.f32 %v1224_v62, %v1221_v19  ;;  %v1232_v11 = vmul.f32 %v1231_v12, %v2993_v45  ;;  %v1217_v38 = vstv %s3149_s5  ;;  %s1599_s29 = sld [smem:[#allocation2 + $0x21]] }
 0x108   :  { %v1239_v36 = vstv %s3190_s16  ;;  %v1243_v0 = vstv %s3196_s17  ;;  %v1177_v40 = vadd.f32 %v1176_v17, %v1173_v63  ;;  %v1236_v1 = vmul.f32 %v1235_v25, %v3020_v55  ;;  %s3404_s13 = sld [smem:[#allocation18_spill]] }
 0x109   :  { %v1203_v6 = vadd.f32 %v1202_v4, %v1199_v33  ;;  %v1229_v37 = vadd.f32 %v1228_v22, %v1225_v31  ;;  %v1240_v3 = vmul.f32 %v1239_v36, %v3050_v27  ;;  %v1244_v13 = vmul.f32 %v1243_v0, %v3078_v34 }
 0x10a   :  { %v1247_v46 = vstv %s3199_s3  ;;  %v1258_v42 = vstv %s3209_s10  ;;  %v1251_v16 = vstv %s3205_s8  ;;  %v1261_v47 = vstv %s3214_s30 }
 0x10b   :  { %v1207_v2 = vadd.f32 %v1206_v21, %v1203_v6  ;;  %v1233_v30 = vadd.f32 %v1232_v11, %v1229_v37  ;;  %v1259_v7 = vmul.f32 %v1258_v42, %v2898_v39  ;;  %v1265_v48 = vstv %s3223_s11 }
 0x10c   :  { %v1269_v49 = vstv %s3228_s20  ;;  %v1273_v32 = vstv %s3233_s12  ;;  %v1262_v28 = vmul.f32 %v1261_v47, %v2930_v59  ;;  %v1266_v58 = vmul.f32 %v1265_v48, %v2974_v60 }
 0x10d   :  { %v1211_v51 = vadd.f32 %v1210_v23, %v1207_v2  ;;  %v1237_v41 = vadd.f32 %v1236_v1, %v1233_v30  ;;  %v1180_v52 = vadd.f32 %v1179_v57, %v1177_v40  ;;  %v1248_v54 = vmul.f32 %v1247_v46, %v3114_v26 }
 0x10e   :  { %v1277_v39 = vstv %s3238_s1  ;;  %v1281_v17 = vstv %s3244_s23  ;;  %v1263_v56 = vadd.f32 %v1262_v28, %v1259_v7  ;;  %v1270_v50 = vmul.f32 %v1269_v49, %v2993_v45  ;;  %s1335_s14 = sshll.u32 %s3404_s13, 4  ;;  %s1336_s14 = int_to_ptr.hbm [resolvable:$true] %s1335_s14 }
 0x10f   :  { %v1215_v61 = vadd.f32 %v1214_v24, %v1211_v51  ;;  %v1241_v29 = vadd.f32 %v1240_v3, %v1237_v41  ;;  %v1252_v35 = vmul.f32 %v1251_v16, %v3179_v44  ;;  %v1255_v59 = vstv %s3248_s19 }
 0x110   :  { %v1274_v60 = vmul.f32 %v1273_v32, %v3020_v55  ;;  %v1278_v57 = vmul.f32 %v1277_v39, %v3050_v27  ;;  %v1267_v9 = vadd.f32 %v1266_v58, %v1263_v56  ;;  %v1282_v53 = vmul.f32 %v1281_v17, %v3078_v34 }
 0x111   :  { %v1218_v15 = vadd.f32 %v1217_v38, %v1215_v61  ;;  %v1245_v4 = vadd.f32 %v1244_v13, %v1241_v29  ;;  %v1285_v63 = vstv %s3254_s18  ;;  %v1295_v14 = vmax.f32 %v3218_v5, 0.0 }
 0x112   :  { %v1296_v45 = vmax.f32 %v3220_v8, 0.0  ;;  %v1297_v43 = vmax.f32 %v1180_v52, 0.0  ;;  %v1271_v55 = vadd.f32 %v1270_v50, %v1267_v9  ;;  %v1289_v10 = vstv %s3257_s21 }
 0x113   :  { %v1249_v18 = vadd.f32 %v1248_v54, %v1245_v4  ;;  %v1302_v27 = vstv %s3263_s24  ;;  %v1298_v19 = vmax.f32 %v1218_v15, 0.0  ;;  %v1305_v20 = vstv %s3267_s26 }
 0x114   :  { %v1303_v62 = vmul.f32 %v1302_v27, %v1295_v14  ;;  %v1309_v21 = vstv %s3273_s4  ;;  %v1275_v22 = vadd.f32 %v1274_v60, %v1271_v55  ;;  %v1306_v12 = vmul.f32 %v1305_v20, %v1296_v45 }
 0x115   :  { %v1253_v34 = vadd.f32 %v1252_v35, %v1249_v18  ;;  %v1310_v5 = vmul.f32 %v1309_v21, %v1297_v43  ;;  %v1313_v25 = vstv %s3282_s6  ;;  %v1286_v23 = vmul.f32 %v1285_v63, %v3114_v26 }
 0x116   :  { %v1279_v33 = vadd.f32 %v1278_v57, %v1275_v22  ;;  %v1307_v31 = vadd.f32 %v1306_v12, %v1303_v62  ;;  %v1290_v11 = vmul.f32 %v1289_v10, %v3179_v44  ;;  %v1314_v0 = vmul.f32 %v1313_v25, %v1298_v19 }
 0x117   :  { %v1256_v8 = vadd.f32 %v1255_v59, %v1253_v34  ;;  %v1317_v40 = vstv %s3293_s25  ;;  %v1293_v37 = vstv %s1592_s28  ;;  %v1321_v42 = vstv %s1598_s0 }
 0x118   :  { %v1283_v24 = vadd.f32 %v1282_v53, %v1279_v33  ;;  %v1311_v36 = vadd.f32 %v1310_v5, %v1307_v31  ;;  %v1325_v16 = vstv %s1599_s29 }
 0x119   :  { %v1299_v38 = vmax.f32 %v1256_v8, 0.0 }
 0x11a   :  { %v1287_v6 = vadd.f32 %v1286_v23, %v1283_v24  ;;  %v1315_v3 = vadd.f32 %v1314_v0, %v1311_v36 }
 0x11b   :  { %v1318_v13 = vmul.f32 %v1317_v40, %v1299_v38 }
 0x11c   :  { %v1291_v1 = vadd.f32 %v1290_v11, %v1287_v6 }
 0x11d   :  { %v1319_v30 = vadd.f32 %v1318_v13, %v1315_v3 }
 0x11e   :  { %v1294_v46 = vadd.f32 %v1293_v37, %v1291_v1 }
 0x120   :  { %v1300_v2 = vmax.f32 %v1294_v46, 0.0 }
 0x122   :  { %v1322_v26 = vmul.f32 %v1321_v42, %v1300_v2 }
 0x124   :  { %v1323_v44 = vadd.f32 %v1322_v26, %v1319_v30 }
 0x126   :  { %v1326_v7 = vadd.f32 %v1325_v16, %v1323_v44 }
 0x128   :  { %1327 = vst [vmem:[#allocation7] sm:$0xff] %v1326_v7 }
 0x129   :  { %1338 = dma.vmem_to_hbm [thread:$0]  %s1334_s7, 128, %s1336_s14, [#allocation4]  }
 0x12a   :  { %1753 = dma.done.wait [#allocation4], 128  }
 0x12b   :  { %1754 = vsyncadd [#allocation4], 4294967168 }
 0x12c   :  { %1343 = vsyncpa [#allocation3], 1 }
 0x12d   :  { %1344 = vsyncpa [#allocation4], 1 }
 0x12e   :  { %1345 = vsyncpa [#allocation5], 1 }

</bundles_post_ra>
